<compile_context>
chip_gen: v7x
topology: tpu7x:2x2x1
jax: 0.10.0
libtpu: 0.0.40
codegen_flags: <defaults>
</compile_context>

<pallas_src>
import functools

import jax
import jax.numpy as jnp
import numpy as np
from jax.experimental import pallas as pl
from jax.experimental.pallas import tpu as pltpu


# ---------------------------------------------------------------------------
# Fused forward-pass kernel (single program, everything VMEM resident)
# ---------------------------------------------------------------------------
def _alphazero_fused_kernel(
    xp_ref, bmask_ref,
    w1_ref, b1_ref, w2_ref, b2_ref, w3_ref, b3_ref,
    wpc_ref, bpc_ref, wp0_ref, wp1_ref, bpfc_ref,
    wvc_ref, bvc_ref, wv1_ref, bv1_ref, wv2_ref, bv2_ref,
    logpi_ref, value_ref,
    ext_ref, p2_ref, p3_ref,
    *, B, H, W, HW, P):
    Wp = W + 2
    PP = (H + 2) * Wp                 # padded-plane rows per image
    Bp = B * PP
    # Static 3x3 tap row-offsets in the padded plane layout.
    offs = [(kh - 1) * Wp + (kw - 1) for kh in range(3) for kw in range(3)]

    mask = bmask_ref[...]             # (Bp, 1): 1.0 at real pixels, 0.0 at borders

    # ---- conv1: one K=27 MXU matmul on the wrapper-built im2col rows ----------
    a1 = jnp.dot(xp_ref[...], w1_ref[...], preferred_element_type=jnp.float32)
    a1 = jnp.maximum(a1 + b1_ref[...], 0.0) * mask               # (Bp, 64)

    # Zero-bordered activation plane: guard rows + all lanes start at 0; only the
    # real-pixel rows are ever overwritten (border rows are written as exact zeros).
    ext_ref[...] = jnp.zeros(ext_ref.shape, jnp.float32)
    ext_ref[P:P + Bp, 0:64] = a1

    # ---- conv2: build (Bp, 9*64) bf16 patch slab, then ONE long-K matmul ------
    for t, off in enumerate(offs):
        p2_ref[0:Bp, t * 64:(t + 1) * 64] = (
            ext_ref[P + off:P + off + Bp, 0:64].astype(jnp.bfloat16))
    a2 = jnp.dot(p2_ref[...], w2_ref[...], preferred_element_type=jnp.float32)
    a2 = jnp.maximum(a2 + b2_ref[...], 0.0) * mask               # (Bp, 128)
    ext_ref[P:P + Bp, :] = a2

    # ---- conv3: (Bp, 9*128) bf16 patch slab (vreg-aligned copies) + one matmul --
    for t, off in enumerate(offs):
        p3_ref[0:Bp, t * 128:(t + 1) * 128] = (
            ext_ref[P + off:P + off + Bp, :].astype(jnp.bfloat16))
    feat = jnp.dot(p3_ref[...], w3_ref[...], preferred_element_type=jnp.float32)
    feat = jnp.maximum(feat + b3_ref[...], 0.0)                  # (Bp, 128)
    # feat border rows hold garbage, but every head weight row at a border
    # position is zero, so they contribute nothing downstream — no mask needed.

    # ---- policy / value 1x1 convs: results stay in vregs (no narrow scratch) ---
    pol = jnp.dot(feat.astype(jnp.bfloat16), wpc_ref[...],
                  preferred_element_type=jnp.float32) + bpc_ref[...]
    pol = jnp.maximum(pol, 0.0)                                  # (Bp, 2)
    # Cout=1 value conv: VPU multiply + lane reduce beats a 1-wide MXU pass.
    val = jnp.sum(feat * wvc_ref[...], axis=-1, keepdims=True) + bvc_ref[...]
    val = jnp.maximum(val, 0.0)                                  # (Bp, 1)

    wp0 = wp0_ref[...]                # (PP, 128) channel-0 policy-FC block (lane padded)
    wp1 = wp1_ref[...]                # (PP, 128) channel-1 block
    wv1 = wv1_ref[...]                # (PP, 64)
    wv2 = wv2_ref[...]                # (1, 64)
    lane = jax.lax.broadcasted_iota(jnp.int32, (1, wp0.shape[-1]), 1)
    lane_ok = lane < HW

    # TODO(synk): for large MCTS batches, switch these per-board XLU reductions to
    # matmul form (P0(B,PP)@wp0 + P1(B,PP)@wp1), add a "parallel" batch grid sized
    # for v7x's 64 MiB VMEM, and consider fp8 weight slabs on v7x. At B=2 the static
    # loop + single program is cheaper.
    for b in range(B):
        lo = b * PP
        # Policy FC with torch's channel-major flatten folded into wp0/wp1.
        p0 = pol[lo:lo + PP, 0:1]
        p1 = pol[lo:lo + PP, 1:2]
        logits = jnp.sum(p0 * wp0 + p1 * wp1, axis=0, keepdims=True) + bpfc_ref[...]
        logits = jnp.where(lane_ok, logits, -jnp.inf)            # mask padded lanes
        mx = jnp.max(logits, axis=-1, keepdims=True)             # fused log_softmax
        sh = logits - mx
        lse = jnp.log(jnp.sum(jnp.exp(sh), axis=-1, keepdims=True))
        logpi_ref[b:b + 1, :] = jnp.where(lane_ok, sh - lse, 0.0)  # lane-dense store

        # Value FCs: fc1 as broadcast-multiply + sublane reduce, fc2 as lane reduce.
        vb = val[lo:lo + PP, :]                                  # (PP, 1)
        v1 = jnp.maximum(jnp.sum(vb * wv1, axis=0, keepdims=True) + bv1_ref[...], 0.0)
        v2 = jnp.sum(v1 * wv2, axis=-1, keepdims=True) + bv2_ref[...]
        value_ref[b:b + 1, :] = jnp.tanh(v2)


# ---------------------------------------------------------------------------
# Parameters (torch layouts: conv OIHW, fc (out, in)) + one-time kernel re-layout
# ---------------------------------------------------------------------------
def init_params(rows, cols, key):
    def rnd(k, shape, scale):
        return scale * jax.random.normal(k, shape, dtype=jnp.float32)

    ks = jax.random.split(key, 16)
    hw = rows * cols
    return {
        "conv1_w": rnd(ks[0], (64, 3, 3, 3), 0.10),
        "conv1_b": rnd(ks[1], (64,), 0.10),
        "conv2_w": rnd(ks[2], (128, 64, 3, 3), 0.05),
        "conv2_b": rnd(ks[3], (128,), 0.05),
        "conv3_w": rnd(ks[4], (128, 128, 3, 3), 0.05),
        "conv3_b": rnd(ks[5], (128,), 0.05),
        "policy_conv_w": rnd(ks[6], (2, 128, 1, 1), 0.10),
        "policy_conv_b": rnd(ks[7], (2,), 0.10),
        "policy_fc_w": rnd(ks[8], (hw, 2 * hw), 0.10),
        "policy_fc_b": rnd(ks[9], (hw,), 0.10),
        "value_conv_w": rnd(ks[10], (1, 128, 1, 1), 0.10),
        "value_conv_b": rnd(ks[11], (1,), 0.10),
        "value_fc1_w": rnd(ks[12], (64, hw), 0.10),
        "value_fc1_b": rnd(ks[13], (64,), 0.10),
        "value_fc2_w": rnd(ks[14], (1, 64), 0.10),
        "value_fc2_b": rnd(ks[15], (1,), 0.10),
    }


def prepare_params(params, rows, cols):
    """One-time (outside jit) re-layout of torch-format weights into kernel-ready
    matrices; conv / policy-conv weights are K-stacked and pre-cast to bf16; the
    head FC weights are scattered onto the padded-plane row layout (zero rows at
    border positions) and lane-padded so the policy logits come out lane-dense."""
    H, W = rows, cols
    HW = H * W
    PP = (H + 2) * (W + 2)
    LP = ((HW + 127) // 128) * 128          # lane-dense policy width

    def conv_stack(w, dtype):
        # OIHW -> (9*Cin, Cout); row index = (kh*3 + kw)*Cin + ci
        co, ci = w.shape[0], w.shape[1]
        return jnp.transpose(w, (2, 3, 1, 0)).reshape(9 * ci, co).astype(dtype)

    def embed_rows(src_hw_n, lanes):
        # (HW, n) -> (PP, lanes): real-pixel rows hold weights, border rows and
        # padded lanes are zero (nullifies padded-plane garbage in the kernel).
        n = src_hw_n.shape[-1]
        m = jnp.zeros((H + 2, W + 2, lanes), jnp.float32)
        m = m.at[1:H + 1, 1:W + 1, :n].set(src_hw_n.reshape(H, W, n))
        return m.reshape(PP, lanes)

    pfc = params["policy_fc_w"]             # (HW, 2*HW), torch (out, in)
    return {
        "w1": conv_stack(params["conv1_w"], jnp.bfloat16),       # (27, 64)
        "b1": params["conv1_b"].reshape(1, -1),
        "w2": conv_stack(params["conv2_w"], jnp.bfloat16),       # (576, 128)
        "b2": params["conv2_b"].reshape(1, -1),
        "w3": conv_stack(params["conv3_w"], jnp.bfloat16),       # (1152, 128)
        "b3": params["conv3_b"].reshape(1, -1),
        "wpc": params["policy_conv_w"].reshape(2, 128).T.astype(jnp.bfloat16),
        "bpc": params["policy_conv_b"].reshape(1, -1),
        "wp0": embed_rows(pfc[:, :HW].T, LP),                    # (PP, LP)
        "wp1": embed_rows(pfc[:, HW:].T, LP),                    # (PP, LP)
        "bpfc": jnp.pad(params["policy_fc_b"].reshape(1, -1), ((0, 0), (0, LP - HW))),
        "wvc": params["value_conv_w"].reshape(1, 128),
        "bvc": params["value_conv_b"].reshape(1, 1),
        "wv1": embed_rows(params["value_fc1_w"].T, 64),          # (PP, 64)
        "bv1": params["value_fc1_b"].reshape(1, -1),
        "wv2": params["value_fc2_w"].reshape(1, -1),             # (1, 64)
        "bv2": params["value_fc2_b"].reshape(1, 1),
    }


# ---------------------------------------------------------------------------
# Forward pass (mirrors AlphaZeroNet.forward) — one pallas_call total
# ---------------------------------------------------------------------------
def alpha_zero_forward(board, prep, rows, cols):
    H, W = rows, cols
    HW = H * W
    Hp, Wp = H + 2, W + 2
    PP = Hp * Wp
    x = board.reshape(-1, 3, H, W).astype(jnp.float32)   # torch .view(-1,3,R,C).float()
    B = x.shape[0]
    Bp = B * PP
    P = -(-(Wp + 1) // 8) * 8          # 8-aligned guard rows >= max 3x3 tap offset

    # Wrapper-side layout plumbing only: NCHW -> padded-plane NHWC im2col rows for
    # conv1 (Bp x 27).  The pad=2 ring keeps even the (masked-away) border output
    # rows reading in-bounds values; their conv1 outputs are zeroed in the kernel.
    x = jnp.transpose(x, (0, 2, 3, 1))
    xp = jnp.pad(x, ((0, 0), (2, 2), (2, 2), (0, 0)))
    taps = [xp[:, kh:kh + Hp, kw:kw + Wp, :] for kh in range(3) for kw in range(3)]
    x_patch = jnp.concatenate(taps, axis=-1).reshape(Bp, 27).astype(jnp.bfloat16)

    # (Bp, 1) real-pixel mask for padded-plane rows (compile-time numpy constant).
    bm = np.zeros((Hp, Wp), np.float32)
    bm[1:H + 1, 1:W + 1] = 1.0
    bmask = jnp.asarray(np.tile(bm.reshape(-1), B).reshape(Bp, 1))

    args = (x_patch, bmask,
            prep["w1"], prep["b1"], prep["w2"], prep["b2"], prep["w3"], prep["b3"],
            prep["wpc"], prep["bpc"], prep["wp0"], prep["wp1"], prep["bpfc"],
            prep["wvc"], prep["bvc"], prep["wv1"], prep["bv1"], prep["wv2"], prep["bv2"])
    vmem = pl.BlockSpec(memory_space=pltpu.MemorySpace.VMEM)
    LP = prep["wp0"].shape[-1]

    log_pi_full, value = pl.pallas_call(
        functools.partial(_alphazero_fused_kernel, B=B, H=H, W=W, HW=HW, P=P),
        out_shape=(jax.ShapeDtypeStruct((B, LP), jnp.float32),
                   jax.ShapeDtypeStruct((B, 1), jnp.float32)),
        in_specs=[vmem] * len(args),
        out_specs=(vmem, vmem),
        scratch_shapes=[
            pltpu.VMEM((Bp + 2 * P, 128), jnp.float32),   # zero-bordered activation plane
            pltpu.VMEM((Bp, 9 * 64), jnp.bfloat16),       # conv2 K-stacked patch slab
            pltpu.VMEM((Bp, 9 * 128), jnp.bfloat16),      # conv3 K-stacked patch slab
        ],
    )(*args)
    return log_pi_full[:, :HW], value


if __name__ == "__main__":
    rows, cols, batch = 6, 7, 2
    key = jax.random.PRNGKey(0)
    k_board, k_params = jax.random.split(key)

    board = jax.random.normal(k_board, (batch, 3, rows, cols), dtype=jnp.float32)
    params = init_params(rows, cols, k_params)
    prep = prepare_params(params, rows, cols)    # one-time weight re-layout (outside jit)

    fwd = jax.jit(functools.partial(alpha_zero_forward, rows=rows, cols=cols))
    log_pi, value = fwd(board, prep)
    jax.block_until_ready((log_pi, value))

    assert log_pi.shape == (batch, rows * cols)
    assert value.shape == (batch, 1)
    assert jnp.all(jnp.isfinite(log_pi)) and jnp.all(jnp.isfinite(value))
    # log_softmax rows must normalize to 1 in prob space; value is tanh-bounded.
    assert jnp.allclose(jnp.sum(jnp.exp(log_pi), axis=-1), 1.0, atol=1e-4)
    assert jnp.all(jnp.abs(value) <= 1.0)
    print("KERNEL_OK")
</pallas_src>

<mosaic_0001>
module attributes {stable_mosaic.version = 11 : i64} {
  func.func @_alphazero_fused_kernel(%arg0: memref<144x27xbf16, #tpu.memory_space<vmem>>, %arg1: memref<144x1xf32, #tpu.memory_space<vmem>>, %arg2: memref<27x64xbf16, #tpu.memory_space<vmem>>, %arg3: memref<1x64xf32, #tpu.memory_space<vmem>>, %arg4: memref<576x128xbf16, #tpu.memory_space<vmem>>, %arg5: memref<1x128xf32, #tpu.memory_space<vmem>>, %arg6: memref<1152x128xbf16, #tpu.memory_space<vmem>>, %arg7: memref<1x128xf32, #tpu.memory_space<vmem>>, %arg8: memref<128x2xbf16, #tpu.memory_space<vmem>>, %arg9: memref<1x2xf32, #tpu.memory_space<vmem>>, %arg10: memref<72x128xf32, #tpu.memory_space<vmem>>, %arg11: memref<72x128xf32, #tpu.memory_space<vmem>>, %arg12: memref<1x128xf32, #tpu.memory_space<vmem>>, %arg13: memref<1x128xf32, #tpu.memory_space<vmem>>, %arg14: memref<1x1xf32, #tpu.memory_space<vmem>>, %arg15: memref<72x64xf32, #tpu.memory_space<vmem>>, %arg16: memref<1x64xf32, #tpu.memory_space<vmem>>, %arg17: memref<1x64xf32, #tpu.memory_space<vmem>>, %arg18: memref<1x1xf32, #tpu.memory_space<vmem>>, %arg19: memref<2x128xf32, #tpu.memory_space<vmem>>, %arg20: memref<2x1xf32, #tpu.memory_space<vmem>>, %arg21: memref<176x128xf32, #tpu.memory_space<vmem>>, %arg22: memref<144x576xbf16, #tpu.memory_space<vmem>>, %arg23: memref<144x1152xbf16, #tpu.memory_space<vmem>>) attributes {dimension_semantics = [], scalar_prefetch = 0 : i64, scratch_operands = 3 : i64, tpu.core_type = #tpu.core_type<tc>} {
    %c0 = arith.constant 0 : index
    %c0_0 = arith.constant 0 : index
    %0 = vector.load %arg1[%c0, %c0_0] : memref<144x1xf32, #tpu.memory_space<vmem>>, vector<144x1xf32>
    %c0_1 = arith.constant 0 : index
    %c0_2 = arith.constant 0 : index
    %1 = vector.load %arg0[%c0_1, %c0_2] : memref<144x27xbf16, #tpu.memory_space<vmem>>, vector<144x27xbf16>
    %c0_3 = arith.constant 0 : index
    %c0_4 = arith.constant 0 : index
    %2 = vector.load %arg2[%c0_3, %c0_4] : memref<27x64xbf16, #tpu.memory_space<vmem>>, vector<27x64xbf16>
    %cst = arith.constant dense<0.000000e+00> : vector<144x64xf32>
    %3 = tpu.matmul %1, %2, %cst {dimension_numbers = #tpu.dot_dimension_numbers<[1], [0], [0], [1], [0, 0, 1, 1], [], []>} : vector<144x27xbf16>, vector<27x64xbf16>, vector<144x64xf32> -> vector<144x64xf32>
    %c0_5 = arith.constant 0 : index
    %c0_6 = arith.constant 0 : index
    %4 = vector.load %arg3[%c0_5, %c0_6] : memref<1x64xf32, #tpu.memory_space<vmem>>, vector<1x64xf32>
    %5 = vector.broadcast %4 : vector<1x64xf32> to vector<144x64xf32>
    %6 = arith.addf %3, %5 : vector<144x64xf32>
    %cst_7 = arith.constant 0.000000e+00 : f32
    %7 = vector.broadcast %cst_7 : f32 to vector<144x64xf32>
    %8 = arith.maximumf %6, %7 : vector<144x64xf32>
    %9 = vector.broadcast %0 : vector<144x1xf32> to vector<144x64xf32>
    %10 = arith.mulf %8, %9 : vector<144x64xf32>
    %cst_8 = arith.constant 0.000000e+00 : f32
    %11 = vector.broadcast %cst_8 : f32 to vector<176x128xf32>
    %c0_9 = arith.constant 0 : index
    %c0_10 = arith.constant 0 : index
    %12 = vector.load %arg21[%c0_9, %c0_10] : memref<176x128xf32, #tpu.memory_space<vmem>>, vector<176x128xf32>
    tpu.vector_store %arg21[%c0_9, %c0_10], %11 {strides = array<i32>} : memref<176x128xf32, #tpu.memory_space<vmem>>, vector<176x128xf32>,
    %c16 = arith.constant 16 : index
    %c0_11 = arith.constant 0 : index
    %13 = vector.load %arg21[%c16, %c0_11] : memref<176x128xf32, #tpu.memory_space<vmem>>, vector<144x64xf32>
    tpu.vector_store %arg21[%c16, %c0_11], %10 {strides = array<i32>} : memref<176x128xf32, #tpu.memory_space<vmem>>, vector<144x64xf32>,
    %c6 = arith.constant 6 : index
    %c0_12 = arith.constant 0 : index
    %14 = vector.load %arg21[%c6, %c0_12] : memref<176x128xf32, #tpu.memory_space<vmem>>, vector<144x64xf32>
    %15 = arith.truncf %14 : vector<144x64xf32> to vector<144x64xbf16>
    %c0_13 = arith.constant 0 : index
    %c0_14 = arith.constant 0 : index
    %16 = vector.load %arg22[%c0_13, %c0_14] : memref<144x576xbf16, #tpu.memory_space<vmem>>, vector<144x64xbf16>
    tpu.vector_store %arg22[%c0_13, %c0_14], %15 {strides = array<i32>} : memref<144x576xbf16, #tpu.memory_space<vmem>>, vector<144x64xbf16>,
    %c7 = arith.constant 7 : index
    %c0_15 = arith.constant 0 : index
    %17 = vector.load %arg21[%c7, %c0_15] : memref<176x128xf32, #tpu.memory_space<vmem>>, vector<144x64xf32>
    %18 = arith.truncf %17 : vector<144x64xf32> to vector<144x64xbf16>
    %c0_16 = arith.constant 0 : index
    %c64 = arith.constant 64 : index
    %19 = vector.load %arg22[%c0_16, %c64] : memref<144x576xbf16, #tpu.memory_space<vmem>>, vector<144x64xbf16>
    tpu.vector_store %arg22[%c0_16, %c64], %18 {strides = array<i32>} : memref<144x576xbf16, #tpu.memory_space<vmem>>, vector<144x64xbf16>,
    %c8 = arith.constant 8 : index
    %c0_17 = arith.constant 0 : index
    %20 = vector.load %arg21[%c8, %c0_17] : memref<176x128xf32, #tpu.memory_space<vmem>>, vector<144x64xf32>
    %21 = arith.truncf %20 : vector<144x64xf32> to vector<144x64xbf16>
    %c0_18 = arith.constant 0 : index
    %c128 = arith.constant 128 : index
    %22 = vector.load %arg22[%c0_18, %c128] : memref<144x576xbf16, #tpu.memory_space<vmem>>, vector<144x64xbf16>
    tpu.vector_store %arg22[%c0_18, %c128], %21 {strides = array<i32>} : memref<144x576xbf16, #tpu.memory_space<vmem>>, vector<144x64xbf16>,
    %c15 = arith.constant 15 : index
    %c0_19 = arith.constant 0 : index
    %23 = vector.load %arg21[%c15, %c0_19] : memref<176x128xf32, #tpu.memory_space<vmem>>, vector<144x64xf32>
    %24 = arith.truncf %23 : vector<144x64xf32> to vector<144x64xbf16>
    %c0_20 = arith.constant 0 : index
    %c192 = arith.constant 192 : index
    %25 = vector.load %arg22[%c0_20, %c192] : memref<144x576xbf16, #tpu.memory_space<vmem>>, vector<144x64xbf16>
    tpu.vector_store %arg22[%c0_20, %c192], %24 {strides = array<i32>} : memref<144x576xbf16, #tpu.memory_space<vmem>>, vector<144x64xbf16>,
    %c16_21 = arith.constant 16 : index
    %c0_22 = arith.constant 0 : index
    %26 = vector.load %arg21[%c16_21, %c0_22] : memref<176x128xf32, #tpu.memory_space<vmem>>, vector<144x64xf32>
    %27 = arith.truncf %26 : vector<144x64xf32> to vector<144x64xbf16>
    %c0_23 = arith.constant 0 : index
    %c256 = arith.constant 256 : index
    %28 = vector.load %arg22[%c0_23, %c256] : memref<144x576xbf16, #tpu.memory_space<vmem>>, vector<144x64xbf16>
    tpu.vector_store %arg22[%c0_23, %c256], %27 {strides = array<i32>} : memref<144x576xbf16, #tpu.memory_space<vmem>>, vector<144x64xbf16>,
    %c17 = arith.constant 17 : index
    %c0_24 = arith.constant 0 : index
    %29 = vector.load %arg21[%c17, %c0_24] : memref<176x128xf32, #tpu.memory_space<vmem>>, vector<144x64xf32>
    %30 = arith.truncf %29 : vector<144x64xf32> to vector<144x64xbf16>
    %c0_25 = arith.constant 0 : index
    %c320 = arith.constant 320 : index
    %31 = vector.load %arg22[%c0_25, %c320] : memref<144x576xbf16, #tpu.memory_space<vmem>>, vector<144x64xbf16>
    tpu.vector_store %arg22[%c0_25, %c320], %30 {strides = array<i32>} : memref<144x576xbf16, #tpu.memory_space<vmem>>, vector<144x64xbf16>,
    %c24 = arith.constant 24 : index
    %c0_26 = arith.constant 0 : index
    %32 = vector.load %arg21[%c24, %c0_26] : memref<176x128xf32, #tpu.memory_space<vmem>>, vector<144x64xf32>
    %33 = arith.truncf %32 : vector<144x64xf32> to vector<144x64xbf16>
    %c0_27 = arith.constant 0 : index
    %c384 = arith.constant 384 : index
    %34 = vector.load %arg22[%c0_27, %c384] : memref<144x576xbf16, #tpu.memory_space<vmem>>, vector<144x64xbf16>
    tpu.vector_store %arg22[%c0_27, %c384], %33 {strides = array<i32>} : memref<144x576xbf16, #tpu.memory_space<vmem>>, vector<144x64xbf16>,
    %c25 = arith.constant 25 : index
    %c0_28 = arith.constant 0 : index
    %35 = vector.load %arg21[%c25, %c0_28] : memref<176x128xf32, #tpu.memory_space<vmem>>, vector<144x64xf32>
    %36 = arith.truncf %35 : vector<144x64xf32> to vector<144x64xbf16>
    %c0_29 = arith.constant 0 : index
    %c448 = arith.constant 448 : index
    %37 = vector.load %arg22[%c0_29, %c448] : memref<144x576xbf16, #tpu.memory_space<vmem>>, vector<144x64xbf16>
    tpu.vector_store %arg22[%c0_29, %c448], %36 {strides = array<i32>} : memref<144x576xbf16, #tpu.memory_space<vmem>>, vector<144x64xbf16>,
    %c26 = arith.constant 26 : index
    %c0_30 = arith.constant 0 : index
    %38 = vector.load %arg21[%c26, %c0_30] : memref<176x128xf32, #tpu.memory_space<vmem>>, vector<144x64xf32>
    %39 = arith.truncf %38 : vector<144x64xf32> to vector<144x64xbf16>
    %c0_31 = arith.constant 0 : index
    %c512 = arith.constant 512 : index
    %40 = vector.load %arg22[%c0_31, %c512] : memref<144x576xbf16, #tpu.memory_space<vmem>>, vector<144x64xbf16>
    tpu.vector_store %arg22[%c0_31, %c512], %39 {strides = array<i32>} : memref<144x576xbf16, #tpu.memory_space<vmem>>, vector<144x64xbf16>,
    %c0_32 = arith.constant 0 : index
    %c0_33 = arith.constant 0 : index
    %41 = vector.load %arg22[%c0_32, %c0_33] : memref<144x576xbf16, #tpu.memory_space<vmem>>, vector<144x576xbf16>
    %c0_34 = arith.constant 0 : index
    %c0_35 = arith.constant 0 : index
    %42 = vector.load %arg4[%c0_34, %c0_35] : memref<576x128xbf16, #tpu.memory_space<vmem>>, vector<576x128xbf16>
    %cst_36 = arith.constant dense<0.000000e+00> : vector<144x128xf32>
    %43 = tpu.matmul %41, %42, %cst_36 {dimension_numbers = #tpu.dot_dimension_numbers<[1], [0], [0], [1], [0, 0, 1, 1], [], []>} : vector<144x576xbf16>, vector<576x128xbf16>, vector<144x128xf32> -> vector<144x128xf32>
    %c0_37 = arith.constant 0 : index
    %c0_38 = arith.constant 0 : index
    %44 = vector.load %arg5[%c0_37, %c0_38] : memref<1x128xf32, #tpu.memory_space<vmem>>, vector<1x128xf32>
    %45 = vector.broadcast %44 : vector<1x128xf32> to vector<144x128xf32>
    %46 = arith.addf %43, %45 : vector<144x128xf32>
    %cst_39 = arith.constant 0.000000e+00 : f32
    %47 = vector.broadcast %cst_39 : f32 to vector<144x128xf32>
    %48 = arith.maximumf %46, %47 : vector<144x128xf32>
    %49 = vector.broadcast %0 : vector<144x1xf32> to vector<144x128xf32>
    %50 = arith.mulf %48, %49 : vector<144x128xf32>
    %c16_40 = arith.constant 16 : index
    %c0_41 = arith.constant 0 : index
    %51 = vector.load %arg21[%c16_40, %c0_41] : memref<176x128xf32, #tpu.memory_space<vmem>>, vector<144x128xf32>
    tpu.vector_store %arg21[%c16_40, %c0_41], %50 {strides = array<i32>} : memref<176x128xf32, #tpu.memory_space<vmem>>, vector<144x128xf32>,
    %c6_42 = arith.constant 6 : index
    %c0_43 = arith.constant 0 : index
    %52 = vector.load %arg21[%c6_42, %c0_43] : memref<176x128xf32, #tpu.memory_space<vmem>>, vector<144x128xf32>
    %53 = arith.truncf %52 : vector<144x128xf32> to vector<144x128xbf16>
    %c0_44 = arith.constant 0 : index
    %c0_45 = arith.constant 0 : index
    %54 = vector.load %arg23[%c0_44, %c0_45] : memref<144x1152xbf16, #tpu.memory_space<vmem>>, vector<144x128xbf16>
    tpu.vector_store %arg23[%c0_44, %c0_45], %53 {strides = array<i32>} : memref<144x1152xbf16, #tpu.memory_space<vmem>>, vector<144x128xbf16>,
    %c7_46 = arith.constant 7 : index
    %c0_47 = arith.constant 0 : index
    %55 = vector.load %arg21[%c7_46, %c0_47] : memref<176x128xf32, #tpu.memory_space<vmem>>, vector<144x128xf32>
    %56 = arith.truncf %55 : vector<144x128xf32> to vector<144x128xbf16>
    %c0_48 = arith.constant 0 : index
    %c128_49 = arith.constant 128 : index
    %57 = vector.load %arg23[%c0_48, %c128_49] : memref<144x1152xbf16, #tpu.memory_space<vmem>>, vector<144x128xbf16>
    tpu.vector_store %arg23[%c0_48, %c128_49], %56 {strides = array<i32>} : memref<144x1152xbf16, #tpu.memory_space<vmem>>, vector<144x128xbf16>,
    %c8_50 = arith.constant 8 : index
    %c0_51 = arith.constant 0 : index
    %58 = vector.load %arg21[%c8_50, %c0_51] : memref<176x128xf32, #tpu.memory_space<vmem>>, vector<144x128xf32>
    %59 = arith.truncf %58 : vector<144x128xf32> to vector<144x128xbf16>
    %c0_52 = arith.constant 0 : index
    %c256_53 = arith.constant 256 : index
    %60 = vector.load %arg23[%c0_52, %c256_53] : memref<144x1152xbf16, #tpu.memory_space<vmem>>, vector<144x128xbf16>
    tpu.vector_store %arg23[%c0_52, %c256_53], %59 {strides = array<i32>} : memref<144x1152xbf16, #tpu.memory_space<vmem>>, vector<144x128xbf16>,
    %c15_54 = arith.constant 15 : index
    %c0_55 = arith.constant 0 : index
    %61 = vector.load %arg21[%c15_54, %c0_55] : memref<176x128xf32, #tpu.memory_space<vmem>>, vector<144x128xf32>
    %62 = arith.truncf %61 : vector<144x128xf32> to vector<144x128xbf16>
    %c0_56 = arith.constant 0 : index
    %c384_57 = arith.constant 384 : index
    %63 = vector.load %arg23[%c0_56, %c384_57] : memref<144x1152xbf16, #tpu.memory_space<vmem>>, vector<144x128xbf16>
    tpu.vector_store %arg23[%c0_56, %c384_57], %62 {strides = array<i32>} : memref<144x1152xbf16, #tpu.memory_space<vmem>>, vector<144x128xbf16>,
    %c16_58 = arith.constant 16 : index
    %c0_59 = arith.constant 0 : index
    %64 = vector.load %arg21[%c16_58, %c0_59] : memref<176x128xf32, #tpu.memory_space<vmem>>, vector<144x128xf32>
    %65 = arith.truncf %64 : vector<144x128xf32> to vector<144x128xbf16>
    %c0_60 = arith.constant 0 : index
    %c512_61 = arith.constant 512 : index
    %66 = vector.load %arg23[%c0_60, %c512_61] : memref<144x1152xbf16, #tpu.memory_space<vmem>>, vector<144x128xbf16>
    tpu.vector_store %arg23[%c0_60, %c512_61], %65 {strides = array<i32>} : memref<144x1152xbf16, #tpu.memory_space<vmem>>, vector<144x128xbf16>,
    %c17_62 = arith.constant 17 : index
    %c0_63 = arith.constant 0 : index
    %67 = vector.load %arg21[%c17_62, %c0_63] : memref<176x128xf32, #tpu.memory_space<vmem>>, vector<144x128xf32>
    %68 = arith.truncf %67 : vector<144x128xf32> to vector<144x128xbf16>
    %c0_64 = arith.constant 0 : index
    %c640 = arith.constant 640 : index
    %69 = vector.load %arg23[%c0_64, %c640] : memref<144x1152xbf16, #tpu.memory_space<vmem>>, vector<144x128xbf16>
    tpu.vector_store %arg23[%c0_64, %c640], %68 {strides = array<i32>} : memref<144x1152xbf16, #tpu.memory_space<vmem>>, vector<144x128xbf16>,
    %c24_65 = arith.constant 24 : index
    %c0_66 = arith.constant 0 : index
    %70 = vector.load %arg21[%c24_65, %c0_66] : memref<176x128xf32, #tpu.memory_space<vmem>>, vector<144x128xf32>
    %71 = arith.truncf %70 : vector<144x128xf32> to vector<144x128xbf16>
    %c0_67 = arith.constant 0 : index
    %c768 = arith.constant 768 : index
    %72 = vector.load %arg23[%c0_67, %c768] : memref<144x1152xbf16, #tpu.memory_space<vmem>>, vector<144x128xbf16>
    tpu.vector_store %arg23[%c0_67, %c768], %71 {strides = array<i32>} : memref<144x1152xbf16, #tpu.memory_space<vmem>>, vector<144x128xbf16>,
    %c25_68 = arith.constant 25 : index
    %c0_69 = arith.constant 0 : index
    %73 = vector.load %arg21[%c25_68, %c0_69] : memref<176x128xf32, #tpu.memory_space<vmem>>, vector<144x128xf32>
    %74 = arith.truncf %73 : vector<144x128xf32> to vector<144x128xbf16>
    %c0_70 = arith.constant 0 : index
    %c896 = arith.constant 896 : index
    %75 = vector.load %arg23[%c0_70, %c896] : memref<144x1152xbf16, #tpu.memory_space<vmem>>, vector<144x128xbf16>
    tpu.vector_store %arg23[%c0_70, %c896], %74 {strides = array<i32>} : memref<144x1152xbf16, #tpu.memory_space<vmem>>, vector<144x128xbf16>,
    %c26_71 = arith.constant 26 : index
    %c0_72 = arith.constant 0 : index
    %76 = vector.load %arg21[%c26_71, %c0_72] : memref<176x128xf32, #tpu.memory_space<vmem>>, vector<144x128xf32>
    %77 = arith.truncf %76 : vector<144x128xf32> to vector<144x128xbf16>
    %c0_73 = arith.constant 0 : index
    %c1024 = arith.constant 1024 : index
    %78 = vector.load %arg23[%c0_73, %c1024] : memref<144x1152xbf16, #tpu.memory_space<vmem>>, vector<144x128xbf16>
    tpu.vector_store %arg23[%c0_73, %c1024], %77 {strides = array<i32>} : memref<144x1152xbf16, #tpu.memory_space<vmem>>, vector<144x128xbf16>,
    %c0_74 = arith.constant 0 : index
    %c0_75 = arith.constant 0 : index
    %79 = vector.load %arg23[%c0_74, %c0_75] : memref<144x1152xbf16, #tpu.memory_space<vmem>>, vector<144x1152xbf16>
    %c0_76 = arith.constant 0 : index
    %c0_77 = arith.constant 0 : index
    %80 = vector.load %arg6[%c0_76, %c0_77] : memref<1152x128xbf16, #tpu.memory_space<vmem>>, vector<1152x128xbf16>
    %cst_78 = arith.constant dense<0.000000e+00> : vector<144x128xf32>
    %81 = tpu.matmul %79, %80, %cst_78 {dimension_numbers = #tpu.dot_dimension_numbers<[1], [0], [0], [1], [0, 0, 1, 1], [], []>} : vector<144x1152xbf16>, vector<1152x128xbf16>, vector<144x128xf32> -> vector<144x128xf32>
    %c0_79 = arith.constant 0 : index
    %c0_80 = arith.constant 0 : index
    %82 = vector.load %arg7[%c0_79, %c0_80] : memref<1x128xf32, #tpu.memory_space<vmem>>, vector<1x128xf32>
    %83 = vector.broadcast %82 : vector<1x128xf32> to vector<144x128xf32>
    %84 = arith.addf %81, %83 : vector<144x128xf32>
    %cst_81 = arith.constant 0.000000e+00 : f32
    %85 = vector.broadcast %cst_81 : f32 to vector<144x128xf32>
    %86 = arith.maximumf %84, %85 : vector<144x128xf32>
    %87 = arith.truncf %86 : vector<144x128xf32> to vector<144x128xbf16>
    %c0_82 = arith.constant 0 : index
    %c0_83 = arith.constant 0 : index
    %88 = vector.load %arg8[%c0_82, %c0_83] : memref<128x2xbf16, #tpu.memory_space<vmem>>, vector<128x2xbf16>
    %cst_84 = arith.constant dense<0.000000e+00> : vector<144x2xf32>
    %89 = tpu.matmul %87, %88, %cst_84 {dimension_numbers = #tpu.dot_dimension_numbers<[1], [0], [0], [1], [0, 0, 1, 1], [], []>} : vector<144x128xbf16>, vector<128x2xbf16>, vector<144x2xf32> -> vector<144x2xf32>
    %c0_85 = arith.constant 0 : index
    %c0_86 = arith.constant 0 : index
    %90 = vector.load %arg9[%c0_85, %c0_86] : memref<1x2xf32, #tpu.memory_space<vmem>>, vector<1x2xf32>
    %91 = vector.broadcast %90 : vector<1x2xf32> to vector<144x2xf32>
    %92 = arith.addf %89, %91 : vector<144x2xf32>
    %cst_87 = arith.constant 0.000000e+00 : f32
    %93 = vector.broadcast %cst_87 : f32 to vector<144x2xf32>
    %94 = arith.maximumf %92, %93 : vector<144x2xf32>
    %c0_88 = arith.constant 0 : index
    %c0_89 = arith.constant 0 : index
    %95 = vector.load %arg13[%c0_88, %c0_89] : memref<1x128xf32, #tpu.memory_space<vmem>>, vector<1x128xf32>
    %96 = vector.broadcast %95 : vector<1x128xf32> to vector<144x128xf32>
    %97 = arith.mulf %86, %96 : vector<144x128xf32>
    %cst_90 = arith.constant dense<0.000000e+00> : vector<144xf32>
    %98 = vector.multi_reduction <add>, %97, %cst_90 [1] : vector<144x128xf32> to vector<144xf32>
    %99 = vector.shape_cast %98 : vector<144xf32> to vector<144x1xf32>
    %c0_91 = arith.constant 0 : index
    %c0_92 = arith.constant 0 : index
    %100 = vector.load %arg14[%c0_91, %c0_92] : memref<1x1xf32, #tpu.memory_space<vmem>>, vector<1x1xf32>
    %101 = vector.broadcast %100 : vector<1x1xf32> to vector<144x1xf32>
    %102 = arith.addf %99, %101 : vector<144x1xf32>
    %cst_93 = arith.constant 0.000000e+00 : f32
    %103 = vector.broadcast %cst_93 : f32 to vector<144x1xf32>
    %104 = arith.maximumf %102, %103 : vector<144x1xf32>
    %c0_94 = arith.constant 0 : index
    %c0_95 = arith.constant 0 : index
    %105 = vector.load %arg10[%c0_94, %c0_95] : memref<72x128xf32, #tpu.memory_space<vmem>>, vector<72x128xf32>
    %c0_96 = arith.constant 0 : index
    %c0_97 = arith.constant 0 : index
    %106 = vector.load %arg11[%c0_96, %c0_97] : memref<72x128xf32, #tpu.memory_space<vmem>>, vector<72x128xf32>
    %c0_98 = arith.constant 0 : index
    %c0_99 = arith.constant 0 : index
    %107 = vector.load %arg15[%c0_98, %c0_99] : memref<72x64xf32, #tpu.memory_space<vmem>>, vector<72x64xf32>
    %c0_100 = arith.constant 0 : index
    %c0_101 = arith.constant 0 : index
    %108 = vector.load %arg17[%c0_100, %c0_101] : memref<1x64xf32, #tpu.memory_space<vmem>>, vector<1x64xf32>
    %109 = tpu.iota {dimensions = array<i32: 1>} : vector<1x128xi32>
    %c42_i32 = arith.constant 42 : i32
    %110 = vector.broadcast %c42_i32 : i32 to vector<1x128xi32>
    %111 = arith.cmpi slt, %109, %110 : vector<1x128xi32>
    %112 = vector.extract_strided_slice %94 {offsets = [0, 0], sizes = [72, 1], strides = [1, 1]} : vector<144x2xf32> to vector<72x1xf32>
    %113 = vector.extract_strided_slice %94 {offsets = [0, 1], sizes = [72, 1], strides = [1, 1]} : vector<144x2xf32> to vector<72x1xf32>
    %114 = vector.broadcast %112 : vector<72x1xf32> to vector<72x128xf32>
    %115 = arith.mulf %114, %105 : vector<72x128xf32>
    %116 = vector.broadcast %113 : vector<72x1xf32> to vector<72x128xf32>
    %117 = arith.mulf %116, %106 : vector<72x128xf32>
    %118 = arith.addf %115, %117 : vector<72x128xf32>
    %cst_102 = arith.constant dense<0.000000e+00> : vector<128xf32>
    %119 = vector.multi_reduction <add>, %118, %cst_102 [0] : vector<72x128xf32> to vector<128xf32>
    %120 = vector.shape_cast %119 : vector<128xf32> to vector<1x128xf32>
    %c0_103 = arith.constant 0 : index
    %c0_104 = arith.constant 0 : index
    %121 = vector.load %arg12[%c0_103, %c0_104] : memref<1x128xf32, #tpu.memory_space<vmem>>, vector<1x128xf32>
    %122 = arith.addf %120, %121 : vector<1x128xf32>
    %cst_105 = arith.constant 0xFF800000 : f32
    %123 = vector.broadcast %cst_105 : f32 to vector<1x128xf32>
    %124 = arith.select %111, %122, %123 : vector<1x128xi1>, vector<1x128xf32>
    %cst_106 = arith.constant dense<0xFF800000> : vector<1xf32>
    %125 = vector.multi_reduction <maximumf>, %124, %cst_106 [1] : vector<1x128xf32> to vector<1xf32>
    %126 = vector.shape_cast %125 : vector<1xf32> to vector<1x1xf32>
    %127 = vector.broadcast %126 : vector<1x1xf32> to vector<1x128xf32>
    %128 = arith.subf %124, %127 : vector<1x128xf32>
    %129 = math.exp %128 : vector<1x128xf32>
    %cst_107 = arith.constant dense<0.000000e+00> : vector<1xf32>
    %130 = vector.multi_reduction <add>, %129, %cst_107 [1] : vector<1x128xf32> to vector<1xf32>
    %131 = vector.shape_cast %130 : vector<1xf32> to vector<1x1xf32>
    %132 = math.log %131 : vector<1x1xf32>
    %133 = vector.broadcast %132 : vector<1x1xf32> to vector<1x128xf32>
    %134 = arith.subf %128, %133 : vector<1x128xf32>
    %cst_108 = arith.constant 0.000000e+00 : f32
    %135 = vector.broadcast %cst_108 : f32 to vector<1x128xf32>
    %136 = arith.select %111, %134, %135 : vector<1x128xi1>, vector<1x128xf32>
    %c0_109 = arith.constant 0 : index
    %c0_110 = arith.constant 0 : index
    %137 = vector.load %arg19[%c0_109, %c0_110] : memref<2x128xf32, #tpu.memory_space<vmem>>, vector<1x128xf32>
    tpu.vector_store %arg19[%c0_109, %c0_110], %136 {strides = array<i32>} : memref<2x128xf32, #tpu.memory_space<vmem>>, vector<1x128xf32>,
    %138 = vector.extract_strided_slice %104 {offsets = [0, 0], sizes = [72, 1], strides = [1, 1]} : vector<144x1xf32> to vector<72x1xf32>
    %139 = vector.broadcast %138 : vector<72x1xf32> to vector<72x64xf32>
    %140 = arith.mulf %139, %107 : vector<72x64xf32>
    %cst_111 = arith.constant dense<0.000000e+00> : vector<64xf32>
    %141 = vector.multi_reduction <add>, %140, %cst_111 [0] : vector<72x64xf32> to vector<64xf32>
    %142 = vector.shape_cast %141 : vector<64xf32> to vector<1x64xf32>
    %c0_112 = arith.constant 0 : index
    %c0_113 = arith.constant 0 : index
    %143 = vector.load %arg16[%c0_112, %c0_113] : memref<1x64xf32, #tpu.memory_space<vmem>>, vector<1x64xf32>
    %144 = arith.addf %142, %143 : vector<1x64xf32>
    %cst_114 = arith.constant 0.000000e+00 : f32
    %145 = vector.broadcast %cst_114 : f32 to vector<1x64xf32>
    %146 = arith.maximumf %144, %145 : vector<1x64xf32>
    %147 = arith.mulf %146, %108 : vector<1x64xf32>
    %cst_115 = arith.constant dense<0.000000e+00> : vector<1xf32>
    %148 = vector.multi_reduction <add>, %147, %cst_115 [1] : vector<1x64xf32> to vector<1xf32>
    %149 = vector.shape_cast %148 : vector<1xf32> to vector<1x1xf32>
    %c0_116 = arith.constant 0 : index
    %c0_117 = arith.constant 0 : index
    %150 = vector.load %arg18[%c0_116, %c0_117] : memref<1x1xf32, #tpu.memory_space<vmem>>, vector<1x1xf32>
    %151 = arith.addf %149, %150 : vector<1x1xf32>
    %152 = math.tanh %151 : vector<1x1xf32>
    %c0_118 = arith.constant 0 : index
    %c0_119 = arith.constant 0 : index
    %153 = vector.load %arg20[%c0_118, %c0_119] : memref<2x1xf32, #tpu.memory_space<vmem>>, vector<1x1xf32>
    tpu.vector_store %arg20[%c0_118, %c0_119], %152 {strides = array<i32>} : memref<2x1xf32, #tpu.memory_space<vmem>>, vector<1x1xf32>,
    %154 = vector.extract_strided_slice %94 {offsets = [72, 0], sizes = [72, 1], strides = [1, 1]} : vector<144x2xf32> to vector<72x1xf32>
    %155 = vector.extract_strided_slice %94 {offsets = [72, 1], sizes = [72, 1], strides = [1, 1]} : vector<144x2xf32> to vector<72x1xf32>
    %156 = vector.broadcast %154 : vector<72x1xf32> to vector<72x128xf32>
    %157 = arith.mulf %156, %105 : vector<72x128xf32>
    %158 = vector.broadcast %155 : vector<72x1xf32> to vector<72x128xf32>
    %159 = arith.mulf %158, %106 : vector<72x128xf32>
    %160 = arith.addf %157, %159 : vector<72x128xf32>
    %cst_120 = arith.constant dense<0.000000e+00> : vector<128xf32>
    %161 = vector.multi_reduction <add>, %160, %cst_120 [0] : vector<72x128xf32> to vector<128xf32>
    %162 = vector.shape_cast %161 : vector<128xf32> to vector<1x128xf32>
    %c0_121 = arith.constant 0 : index
    %c0_122 = arith.constant 0 : index
    %163 = vector.load %arg12[%c0_121, %c0_122] : memref<1x128xf32, #tpu.memory_space<vmem>>, vector<1x128xf32>
    %164 = arith.addf %162, %163 : vector<1x128xf32>
    %cst_123 = arith.constant 0xFF800000 : f32
    %165 = vector.broadcast %cst_123 : f32 to vector<1x128xf32>
    %166 = arith.select %111, %164, %165 : vector<1x128xi1>, vector<1x128xf32>
    %cst_124 = arith.constant dense<0xFF800000> : vector<1xf32>
    %167 = vector.multi_reduction <maximumf>, %166, %cst_124 [1] : vector<1x128xf32> to vector<1xf32>
    %168 = vector.shape_cast %167 : vector<1xf32> to vector<1x1xf32>
    %169 = vector.broadcast %168 : vector<1x1xf32> to vector<1x128xf32>
    %170 = arith.subf %166, %169 : vector<1x128xf32>
    %171 = math.exp %170 : vector<1x128xf32>
    %cst_125 = arith.constant dense<0.000000e+00> : vector<1xf32>
    %172 = vector.multi_reduction <add>, %171, %cst_125 [1] : vector<1x128xf32> to vector<1xf32>
    %173 = vector.shape_cast %172 : vector<1xf32> to vector<1x1xf32>
    %174 = math.log %173 : vector<1x1xf32>
    %175 = vector.broadcast %174 : vector<1x1xf32> to vector<1x128xf32>
    %176 = arith.subf %170, %175 : vector<1x128xf32>
    %cst_126 = arith.constant 0.000000e+00 : f32
    %177 = vector.broadcast %cst_126 : f32 to vector<1x128xf32>
    %178 = arith.select %111, %176, %177 : vector<1x128xi1>, vector<1x128xf32>
    %c1 = arith.constant 1 : index
    %c0_127 = arith.constant 0 : index
    %179 = vector.load %arg19[%c1, %c0_127] : memref<2x128xf32, #tpu.memory_space<vmem>>, vector<1x128xf32>
    tpu.vector_store %arg19[%c1, %c0_127], %178 {strides = array<i32>} : memref<2x128xf32, #tpu.memory_space<vmem>>, vector<1x128xf32>,
    %180 = vector.extract_strided_slice %104 {offsets = [72, 0], sizes = [72, 1], strides = [1, 1]} : vector<144x1xf32> to vector<72x1xf32>
    %181 = vector.broadcast %180 : vector<72x1xf32> to vector<72x64xf32>
    %182 = arith.mulf %181, %107 : vector<72x64xf32>
    %cst_128 = arith.constant dense<0.000000e+00> : vector<64xf32>
    %183 = vector.multi_reduction <add>, %182, %cst_128 [0] : vector<72x64xf32> to vector<64xf32>
    %184 = vector.shape_cast %183 : vector<64xf32> to vector<1x64xf32>
    %c0_129 = arith.constant 0 : index
    %c0_130 = arith.constant 0 : index
    %185 = vector.load %arg16[%c0_129, %c0_130] : memref<1x64xf32, #tpu.memory_space<vmem>>, vector<1x64xf32>
    %186 = arith.addf %184, %185 : vector<1x64xf32>
    %cst_131 = arith.constant 0.000000e+00 : f32
    %187 = vector.broadcast %cst_131 : f32 to vector<1x64xf32>
    %188 = arith.maximumf %186, %187 : vector<1x64xf32>
    %189 = arith.mulf %188, %108 : vector<1x64xf32>
    %cst_132 = arith.constant dense<0.000000e+00> : vector<1xf32>
    %190 = vector.multi_reduction <add>, %189, %cst_132 [1] : vector<1x64xf32> to vector<1xf32>
    %191 = vector.shape_cast %190 : vector<1xf32> to vector<1x1xf32>
    %c0_133 = arith.constant 0 : index
    %c0_134 = arith.constant 0 : index
    %192 = vector.load %arg18[%c0_133, %c0_134] : memref<1x1xf32, #tpu.memory_space<vmem>>, vector<1x1xf32>
    %193 = arith.addf %191, %192 : vector<1x1xf32>
    %194 = math.tanh %193 : vector<1x1xf32>
    %c1_135 = arith.constant 1 : index
    %c0_136 = arith.constant 0 : index
    %195 = vector.load %arg20[%c1_135, %c0_136] : memref<2x1xf32, #tpu.memory_space<vmem>>, vector<1x1xf32>
    tpu.vector_store %arg20[%c1_135, %c0_136], %194 {strides = array<i32>} : memref<2x1xf32, #tpu.memory_space<vmem>>, vector<1x1xf32>,
    return
  }
}

</mosaic_0001>

<bundles_post_ra>
// kernel: alpha_zero_forward.1
= control target key start
LH: loop header
LB: loop body
LE: loop exit
PB: predicated region body
PF: predicated region fallthrough
CT: control target
= control target key end

     0   :  { %s6690_s0 = inlined_call_operand.vmem [shape: bf16[144,27], index: 0, kind: input, shape index: {}]   ;;  %s6691_s1 = inlined_call_operand.vmem [shape: f32[144,1], index: 1, kind: input, shape index: {}]   ;;  %s6692_s2 = inlined_call_operand.vmem [shape: bf16[27,64], index: 2, kind: input, shape index: {}]   ;;  %s6693_s3 = inlined_call_operand.vmem [shape: f32[1,64], index: 3, kind: input, shape index: {}]   ;;  %s6694_s4 = inlined_call_operand.vmem [shape: bf16[576,128], index: 4, kind: input, shape index: {}]   ;;  %s6695_s5 = inlined_call_operand.vmem [shape: f32[1,128], index: 5, kind: input, shape index: {}]   ;;  %s6696_s6 = inlined_call_operand.vmem [shape: bf16[1152,128], index: 6, kind: input, shape index: {}]   ;;  %s6697_s7 = inlined_call_operand.vmem [shape: f32[1,128], index: 7, kind: input, shape index: {}]   ;;  %s6698_s8 = inlined_call_operand.vmem [shape: bf16[128,2], index: 8, kind: input, shape index: {}]   ;;  %s6699_s9 = inlined_call_operand.vmem [shape: f32[1,2], index: 9, kind: input, shape index: {}]   ;;  %s6700_s10 = inlined_call_operand.vmem [shape: f32[72,128], index: 10, kind: input, shape index: {}]   ;;  %s6701_s11 = inlined_call_operand.vmem [shape: f32[72,128], index: 11, kind: input, shape index: {}]   ;;  %s6702_s12 = inlined_call_operand.vmem [shape: f32[1,128], index: 12, kind: input, shape index: {}]   ;;  %s6703_s13 = inlined_call_operand.vmem [shape: f32[1,128], index: 13, kind: input, shape index: {}]   ;;  %s6704_s14 = inlined_call_operand.<no memory space> [shape: f32[1,1], index: 14, kind: input, shape index: {}]   ;;  %s6705_s15 = inlined_call_operand.vmem [shape: f32[72,64], index: 15, kind: input, shape index: {}]   ;;  %s6706_s16 = inlined_call_operand.vmem [shape: f32[1,64], index: 16, kind: input, shape index: {}]   ;;  %s6707_s17 = inlined_call_operand.vmem [shape: f32[1,64], index: 17, kind: input, shape index: {}]   ;;  %s6708_s19 = inlined_call_operand.hbm [shape: f32[2,128], index: 19, kind: output, shape index: {0}]   ;;  %s6709_s20 = inlined_call_operand.vmem [shape: f32[2,1], index: 20, kind: output, shape index: {1}]   ;;  %s6710_s18 = inlined_call_operand.<no memory space> [shape: f32[1,1], index: 18, kind: input, shape index: {}]  }
   0x1   :  { %6715 = sst [smem:[#allocation10_spill]] %s6690_s0  ;;  %v26_v0 = vstv %s6704_s14  ;;  %v28_v1 = vstv %s6710_s18 }
   0x2   :  { %6716 = sst [smem:[#allocation11_spill]] %s6691_s1  ;;  %27 = vst [vmem:[#allocation5] sm:$0x1] %v26_v0  ;;  %29 = vst [vmem:[#allocation6] sm:$0x1] %v28_v1 }
   0x3   :  { %6717 = sst [smem:[#allocation12_spill]] %s6692_s2 }
   0x4   :  { %6718 = sst [smem:[#allocation13_spill]] %s6693_s3 }
   0x5   :  { %6719 = sst [smem:[#allocation14_spill]] %s6694_s4 }
   0x6   :  { %s6720_s3 = sld [smem:[#allocation12_spill]]  ;;  %v5063_v3 = vmov 0.0   ;;  %vm201_vm0 = vcmask 1044480   ;;  %vm202_vm1 = vcmask 1045504   ;;  %v5064_v5 = vmov 65535   ;;  %s6721_s28 = sld [smem:[#allocation10_spill]] }
   0x7   :  { %4658 = vmatprep.subr.bf16.mxu0 %v5063_v3  ;;  %439 = vst [vmem:[#allocation2] sm:$0xff] %v5063_v3  ;;  %440 = vst [vmem:[#allocation2 + $0x8] sm:$0xff] %v5063_v3  ;;  %v203_v6 = vsel %vm201_vm0, 4294967295, %v5064_v5  ;;  %vm5065_vm2 = vmmov 0   ;;  %vm173_vm3 = vcmask 220160   ;;  %v5066_v10 = vmov 0  }
   0x8   :  { %441 = vst [vmem:[#allocation2 + $0x10] sm:$0xff] %v5063_v3  ;;  %442 = vst [vmem:[#allocation2 + $0x18] sm:$0xff] %v5063_v3  ;;  %4662 = vmatprep.mubr.msk.bf16.mxu0 %vm5065_vm2, %v5063_v3  ;;  %v204_v7 = vsel %vm202_vm1, %v203_v6, 0  ;;  %4869 = vset.pattern.permute.xlu0 %v5066_v10  ;;  %s6722_s30 = sld [smem:[#allocation11_spill]] }
   0x9   :  { %443 = vst [vmem:[#allocation2 + $0x20] sm:$0xff] %v5063_v3  ;;  %444 = vst [vmem:[#allocation2 + $0x28] sm:$0xff] %v5063_v3  ;;  %4870 = vset.pattern.permute.xlu1 %v5066_v10 }
   0xa   :  { %445 = vst [vmem:[#allocation2 + $0x30] sm:$0xff] %v5063_v3  ;;  %446 = vst [vmem:[#allocation2 + $0x38] sm:$0xff] %v5063_v3 }
   0xb   :  { %447 = vst [vmem:[#allocation2 + $0x40] sm:$0xff] %v5063_v3  ;;  %448 = vst [vmem:[#allocation2 + $0x48] sm:$0xff] %v5063_v3 }
   0xc   :  { %v4897_v2 = vld [vmem:[%s6720_s3] sm:$0xff]   ;;  %449 = vst [vmem:[#allocation2 + $0x50] sm:$0xff] %v5063_v3  ;;  %450 = vst [vmem:[#allocation2 + $0x58] sm:$0xff] %v5063_v3  ;;  %v4898_v4 = vld [vmem:[%s6720_s3 + $0x8] sm:$0x3f]  }
   0xd   :  { %451 = vst [vmem:[#allocation2 + $0x60] sm:$0xff] %v5063_v3  ;;  %452 = vst [vmem:[#allocation2 + $0x68] sm:$0xff] %v5063_v3  ;;  %4659 = vmatpush3.bf16.msra.mxu0 %v4897_v2  ;;  %v206_v8 = vand.u32 %v4898_v4, %v204_v7  ;;  %v4899_v9 = vld [vmem:[%s6721_s28] sm:$0xff]   ;;  %v4900_v15 = vld [vmem:[%s6721_s28 + $0x8] sm:$0xff]  }
   0xe   :  { %453 = vst [vmem:[#allocation2 + $0x70] sm:$0xff] %v5063_v3  ;;  %454 = vst [vmem:[#allocation2 + $0x78] sm:$0xff] %v5063_v3  ;;  %4660 = vmatprep.subr.bf16.mxu0 %v5063_v3  ;;  %v70_v11 = vld [vmem:[%s6722_s30] sm:$0xff]  ;;  %v71_v12 = vld [vmem:[%s6722_s30 + $0x8] sm:$0xff] }
   0xf   :  { %455 = vst [vmem:[#allocation2 + $0x80] sm:$0xff] %v5063_v3  ;;  %456 = vst [vmem:[#allocation2 + $0x88] sm:$0xff] %v5063_v3  ;;  %333 = vperm.xlu0 %4869, %v70_v11   ;;  %v72_v13 = vld [vmem:[%s6722_s30 + $0x10] sm:$0xff]  ;;  %v73_v14 = vld [vmem:[%s6722_s30 + $0x18] sm:$0xff] }
  0x10   :  { %457 = vst [vmem:[#allocation2 + $0x90] sm:$0xff] %v5063_v3  ;;  %458 = vst [vmem:[#allocation2 + $0x98] sm:$0xff] %v5063_v3  ;;  %343 = vperm.xlu1 %4870, %v72_v13   ;;  %v74_v16 = vld [vmem:[%s6722_s30 + $0x20] sm:$0xff]  ;;  %v76_v17 = vld [vmem:[%s6722_s30 + $0x30] sm:$0xff] }
  0x11   :  { %459 = vst [vmem:[#allocation2 + $0xa0] sm:$0xff] %v5063_v3  ;;  %460 = vst [vmem:[#allocation2 + $0xa8] sm:$0xff] %v5063_v3  ;;  %4661 = vmatpush3.bf16.msra.mxu0 %v206_v8  ;;  %v75_v18 = vld [vmem:[%s6722_s30 + $0x28] sm:$0xff]  ;;  %v77_v19 = vld [vmem:[%s6722_s30 + $0x38] sm:$0xff] }
  0x12   :  { %v4901_v20 = vld [vmem:[%s6721_s28 + $0x10] sm:$0xff]   ;;  %v78_v21 = vld [vmem:[%s6722_s30 + $0x40] sm:$0xff]  ;;  %v79_v22 = vld [vmem:[%s6722_s30 + $0x48] sm:$0xff] }
  0x13   :  { %338 = vperm.xlu0 %4869, %v71_v12   ;;  %v80_v23 = vld [vmem:[%s6722_s30 + $0x50] sm:$0xff]  ;;  %v81_v24 = vld [vmem:[%s6722_s30 + $0x58] sm:$0xff]  ;;  %v82_v26 = vld [vmem:[%s6722_s30 + $0x60] sm:$0xff] }
  0x14   :  { %4663 = vmatmul.mubr.msk.bf16.vlgmr.msra.gmra.mrb[0].mxu0 %vm173_vm3, %v4899_v9  ;;  %348 = vperm.xlu1 %4870, %v73_v14   ;;  %v4902_v25 = vld [vmem:[%s6721_s28 + $0x18] sm:$0xff]   ;;  %v83_v27 = vld [vmem:[%s6722_s30 + $0x68] sm:$0xff]  ;;  %v84_v28 = vld [vmem:[%s6722_s30 + $0x70] sm:$0xff] }
  0x15   :  { %4666 = vmatprep.mubr.msk.bf16.mxu0 %vm5065_vm2, %v5063_v3  ;;  %v4903_v29 = vld [vmem:[%s6721_s28 + $0x20] sm:$0xff]   ;;  %v85_v31 = vld [vmem:[%s6722_s30 + $0x78] sm:$0xff]  ;;  %v87_v32 = vld [vmem:[%s6722_s30 + $0x88] sm:$0xff] }
  0x16   :  { %v86_v30 = vld [vmem:[%s6722_s30 + $0x80] sm:$0xff]  ;;  %v4904_v33 = vld [vmem:[%s6721_s28 + $0x28] sm:$0xff]   ;;  %v4905_v34 = vld [vmem:[%s6721_s28 + $0x30] sm:$0xff]  }
  0x17   :  { %353 = vperm.xlu0 %4869, %v74_v16   ;;  %v4906_v35 = vld [vmem:[%s6721_s28 + $0x38] sm:$0xff]   ;;  %v4907_v36 = vld [vmem:[%s6721_s28 + $0x40] sm:$0xff]  }
  0x18   :  { %358 = vperm.xlu1 %4870, %v75_v18  }
  0x1b   :  { %363 = vperm.xlu0 %4869, %v76_v17  }
  0x1c   :  { %4667 = vmatmul.mubr.msk.bf16.gmra.mrb[4].mxu0 %vm173_vm3, %v4900_v15  ;;  %368 = vperm.xlu1 %4870, %v77_v19  }
  0x1d   :  { %4670 = vmatprep.mubr.msk.bf16.mxu0 %vm5065_vm2, %v5063_v3 }
  0x1f   :  { %373 = vperm.xlu0 %4869, %v78_v21  }
  0x20   :  { %378 = vperm.xlu1 %4870, %v79_v22  }
  0x23   :  { %383 = vperm.xlu0 %4869, %v80_v23  }
  0x24   :  { %4671 = vmatmul.mubr.msk.bf16.gmra.mrb[8].mxu0 %vm173_vm3, %v4901_v20  ;;  %388 = vperm.xlu1 %4870, %v81_v24  }
  0x25   :  { %4674 = vmatprep.mubr.msk.bf16.mxu0 %vm5065_vm2, %v5063_v3 }
  0x27   :  { %393 = vperm.xlu0 %4869, %v82_v26  }
  0x28   :  { %398 = vperm.xlu1 %4870, %v83_v27  }
  0x2b   :  { %403 = vperm.xlu0 %4869, %v84_v28  }
  0x2c   :  { %4675 = vmatmul.mubr.msk.bf16.gmra.mrb[12].mxu0 %vm173_vm3, %v4902_v25  ;;  %408 = vperm.xlu1 %4870, %v85_v31  }
  0x2d   :  { %4678 = vmatprep.mubr.msk.bf16.mxu0 %vm5065_vm2, %v5063_v3 }
  0x2f   :  { %413 = vperm.xlu0 %4869, %v86_v30  }
  0x30   :  { %418 = vperm.xlu1 %4870, %v87_v32  }
  0x34   :  { %4679 = vmatmul.mubr.msk.bf16.gmra.mrb[16].mxu0 %vm173_vm3, %v4903_v29 }
  0x35   :  { %4682 = vmatprep.mubr.msk.bf16.mxu0 %vm5065_vm2, %v5063_v3 }
  0x3c   :  { %4683 = vmatmul.mubr.msk.bf16.gmra.mrb[20].mxu0 %vm173_vm3, %v4904_v33 }
  0x3d   :  { %4686 = vmatprep.mubr.msk.bf16.mxu0 %vm5065_vm2, %v5063_v3 }
  0x44   :  { %4687 = vmatmul.mubr.msk.bf16.gmra.mrb[24].mxu0 %vm173_vm3, %v4905_v34 }
  0x45   :  { %4690 = vmatprep.mubr.msk.bf16.mxu0 %vm5065_vm2, %v5063_v3 }
  0x4c   :  { %4691 = vmatmul.mubr.msk.bf16.gmra.mrb[28].mxu0 %vm173_vm3, %v4906_v35 }
  0x4d   :  { %4694 = vmatprep.mubr.msk.bf16.mxu0 %vm5065_vm2, %v5063_v3 }
  0x54   :  { %4695 = vmatmul.mubr.msk.bf16.gmra.mrb[32].mxu0 %vm173_vm3, %v4907_v36 }
  0x55   :  { %30 = vsyncpa [#allocation8], 0  ;;  %s6723_s2 = sld [smem:[#allocation14_spill]]  ;;  %s6724_s26 = sld [smem:[#allocation13_spill]]  ;;  %vm461_vm4 = vcmask 523264   ;;  %v516_v14 = vld [vmem:[#allocation2 + $0x7] sm:$0xff] }
  0x56   :  { %v480_v15 = vld [vmem:[#allocation2 + $0x6] sm:$0xff]  ;;  %s5067_s27 = smov 64   ;;  %vm579_vm5 = vcmask 1048064   ;;  %vm3679_vm7 = vcmask 1040384   ;;  %vm3775_vm8 = vcmask 516096   ;;  %vm3782_vm9 = vcmask 0  }
  0x5b   :  { %v4908_v37 = vld [vmem:[%s6723_s2 + $0x40] sm:$0xff]   ;;  %v4910_v39 = vld [vmem:[%s6723_s2 + $0x48] sm:$0xff]   ;;  %v4912_v41 = vld [vmem:[%s6723_s2 + $0x50] sm:$0xff]  }
  0x5c   :  { %v4909_v38 = vld [vmem:[%s6723_s2] sm:$0xff]   ;;  %4191 = vmatprep.subr.bf16.mxu1 %v4908_v37  ;;  %v4911_v40 = vld [vmem:[%s6723_s2 + $0x8] sm:$0xff]   ;;  %v4913_v42 = vld [vmem:[%s6723_s2 + $0x10] sm:$0xff]  }
  0x5d   :  { %4192 = vmatpush3.bf16.msra.mxu1 %v4909_v38  ;;  %v4914_v43 = vld [vmem:[%s6723_s2 + $0x58] sm:$0xff]   ;;  %v4916_v45 = vld [vmem:[%s6723_s2 + $0x60] sm:$0xff]   ;;  %v4918_v48 = vld [vmem:[%s6723_s2 + $0x68] sm:$0xff]  }
  0x5e   :  { %4193 = vmatprep.subr.bf16.mxu1 %v4910_v39  ;;  %v4915_v44 = vld [vmem:[%s6723_s2 + $0x18] sm:$0xff]   ;;  %v4917_v46 = vld [vmem:[%s6723_s2 + $0x20] sm:$0xff]   ;;  %v4919_v57 = vld [vmem:[%s6723_s2 + $0x28] sm:$0xff]  }
  0x5f   :  { %v5354_v47 = vld [vmem:[%s6724_s26] ss:$0 sm:$0xff]  ;;  %v4920_v61 = vld [vmem:[%s6723_s2 + $0x70] sm:$0xff]   ;;  %v4923_v1 = vld [vmem:[%s6723_s2 + $0x78] sm:$0xff]  }
  0x60   :  { %v4921_v62 = vld [vmem:[%s6723_s2 + $0x30] sm:$0xff]   ;;  %v4922_v63 = vld [vmem:[%s6723_s2 + $0xc0] sm:$0xff]   ;;  %v4925_v13 = vld [vmem:[%s6723_s2 + $0x38] sm:$0xff]  }
  0x61   :  { %4194 = vmatpush3.bf16.msra.mxu1 %v4911_v40  ;;  %v4924_v2 = vld [vmem:[%s6723_s2 + $0x80] sm:$0xff]   ;;  %4261 = vmatprep.subr.bf16.mxu0 %v4922_v63  ;;  %v4928_v38 = vld [vmem:[%s6723_s2 + $0x88] sm:$0xff]  }
  0x62   :  { %4195 = vmatprep.subr.bf16.mxu1 %v4912_v41  ;;  %4262 = vmatpush3.bf16.msra.mxu0 %v4924_v2 }
  0x65   :  { %4196 = vmatpush3.bf16.msra.mxu1 %v4913_v42 }
  0x66   :  { %4197 = vmatprep.subr.bf16.mxu1 %v4914_v43 }
  0x69   :  { %4198 = vmatpush3.bf16.msra.mxu1 %v4915_v44 }
  0x6a   :  { %4199 = vmatprep.subr.bf16.mxu1 %v4916_v45 }
  0x6d   :  { %4200 = vmatpush3.bf16.msra.mxu1 %v4917_v46 }
  0x6e   :  { %4201 = vmatprep.subr.bf16.mxu1 %v4918_v48 }
  0x71   :  { %4202 = vmatpush3.bf16.msra.mxu1 %v4919_v57 }
  0x72   :  { %4203 = vmatprep.subr.bf16.mxu1 %v4920_v61 }
  0x75   :  { %4204 = vmatpush3.bf16.msra.mxu1 %v4921_v62 }
  0x76   :  { %4205 = vmatprep.subr.bf16.mxu1 %v4923_v1 }
  0x79   :  { %4206 = vmatpush3.bf16.msra.mxu1 %v4925_v13 }
  0x7a   :  { %4698 = vmatprep.subr.bf16.mxu1 %v5063_v3 }
  0x8e   :  { %v5359_v49 = vpop.permute.xlu0 %333 }
  0x8f   :  { %v5386_v4 = vpop.permute.xlu1 %343 }
  0x92   :  { %v5367_v60 = vpop.permute.xlu0 %338 }
  0x93   :  { %v5395_v18 = vpop.permute.xlu1 %348 }
  0x96   :  { %v5411_v37 = vpop.permute.xlu0 %353 }
  0x97   :  { %v5418_v41 = vpop.permute.xlu1 %358 }
  0xe7   :  { %v242_v50 = vpop.f32.mrb[0].mxu0 }
  0xe8   :  { %v243_v51 = vadd.f32 %v5354_v47, %v242_v50  ;;  %v4664_v52 = vpop.f32.mrb[1].mxu0 }
  0xe9   :  { %v245_v53 = vpop.f32.mrb[2].mxu0 }
  0xea   :  { %v313_v54 = vmax.f32 %v243_v51, 0.0  ;;  %v246_v55 = vadd.f32 %v5354_v47, %v245_v53  ;;  %v4665_v56 = vpop.f32.mrb[3].mxu0 }
  0xec   :  { %v421_v58 = vmul.f32 %v5359_v49, %v313_v54  ;;  %v314_v59 = vmax.f32 %v246_v55, 0.0 }
  0xee   :  { %462 = vst.msk [vmem:[#allocation2 + $0x10] sm:$0xff] %vm461_vm4, %v421_v58  ;;  %v422_v0 = vmul.f32 %v5367_v60, %v314_v59 }
  0xef   :  { %v250_v5 = vpop.f32.mrb[4].mxu0 }
  0xf0   :  { %463 = vst.msk [vmem:[#allocation2 + $0x18] sm:$0xff] %vm461_vm4, %v422_v0  ;;  %v251_v6 = vadd.f32 %v5354_v47, %v250_v5  ;;  %v4668_v7 = vpop.f32.mrb[5].mxu0  ;;  %v5431_v5 = vpop.permute.xlu0 %363 }
  0xf1   :  { %v253_v8 = vpop.f32.mrb[6].mxu0  ;;  %v4930_v7 = vld [vmem:[%s6723_s2 + $0x90] sm:$0xff]  }
  0xf2   :  { %v315_v9 = vmax.f32 %v251_v6, 0.0  ;;  %v254_v11 = vadd.f32 %v5354_v47, %v253_v8  ;;  %v4669_v12 = vpop.f32.mrb[7].mxu0  ;;  %v4929_v6 = vld [vmem:[%s6723_s2 + $0xd0] sm:$0xff]  }
  0xf4   :  { %v423_v16 = vmul.f32 %v5386_v4, %v315_v9  ;;  %v316_v17 = vmax.f32 %v254_v11, 0.0  ;;  %v5441_v11 = vpop.permute.xlu1 %368 }
  0xf5   :  { %v517_v19 = vld [vmem:[#allocation2 + $0xf] sm:$0xff] }
  0xf6   :  { %v481_v20 = vld [vmem:[#allocation2 + $0xe] sm:$0xff]  ;;  %464 = vst.msk [vmem:[#allocation2 + $0x20] sm:$0xff] %vm461_vm4, %v423_v16  ;;  %v424_v22 = vmul.f32 %v5395_v18, %v316_v17  ;;  %v534_v23 = vpack.c.bf16 %v517_v19, %v516_v14 }
  0xf7   :  { %v590_v21 = vld [vmem:[#allocation2 + $0x10] sm:$0xff]  ;;  %v498_v24 = vpack.c.bf16 %v481_v20, %v480_v15  ;;  %v258_v26 = vpop.f32.mrb[8].mxu0  ;;  %v591_v31 = vld [vmem:[#allocation2 + $0x18] sm:$0xff] }
  0xf8   :  { %v607_v25 = vpack.c.bf16 %v590_v21, %v5063_v3  ;;  %v626_v27 = vld [vmem:[#allocation2 + $0x17] sm:$0xff]  ;;  %465 = vst.msk [vmem:[#allocation2 + $0x28] sm:$0xff] %vm461_vm4, %v424_v22  ;;  %v259_v28 = vadd.f32 %v5354_v47, %v258_v26  ;;  %v4672_v29 = vpop.f32.mrb[9].mxu0  ;;  %552 = vrot.lane.b32.xlu1 %v534_v23, %s5067_s27  ;;  %v4927_v3 = vld [vmem:[%s6723_s2 + $0xc8] sm:$0xff]   ;;  %v715_v33 = vpack.c.bf16 %v591_v31, %v590_v21 }
  0xf9   :  { %v643_v30 = vpack.c.bf16 %v626_v27, %v517_v19  ;;  %507 = vst.msk [vmem:[#allocation3] sm:$0xff] %vm461_vm4, %v498_v24  ;;  %v261_v32 = vpop.f32.mrb[10].mxu0  ;;  %4263 = vmatprep.subr.bf16.mxu0 %v4927_v3  ;;  %v482_v45 = vld [vmem:[#allocation2 + $0x16] sm:$0xff] }
  0xfa   :  { %616 = vst.msk [vmem:[#allocation3 + $0x8] sm:$0xff] %vm461_vm4, %v607_v25  ;;  %v317_v34 = vmax.f32 %v259_v28, 0.0  ;;  %v262_v35 = vadd.f32 %v5354_v47, %v261_v32  ;;  %v4673_v36 = vpop.f32.mrb[11].mxu0  ;;  %724 = vst.msk [vmem:[#allocation3 + $0x10] sm:$0xff] %vm461_vm4, %v715_v33  ;;  %4264 = vmatpush3.bf16.msra.mxu0 %v4928_v38 }
  0xfb   :  { %661 = vrot.lane.b32.xlu0 %v643_v30, %s5067_s27  ;;  %4265 = vmatprep.subr.bf16.mxu0 %v4929_v6 }
  0xfc   :  { %v425_v39 = vmul.f32 %v5411_v37, %v317_v34  ;;  %v318_v40 = vmax.f32 %v262_v35, 0.0  ;;  %v5454_v34 = vpop.permute.xlu0 %373  ;;  %v4932_v35 = vld [vmem:[%s6723_s2 + $0xd8] sm:$0xff]  }
  0xfd   :  { %v519_v42 = vld [vmem:[#allocation2 + $0x1f] sm:$0xff] }
  0xfe   :  { %466 = vst.msk [vmem:[#allocation2 + $0x30] sm:$0xff] %vm461_vm4, %v425_v39  ;;  %v426_v43 = vmul.f32 %v5418_v41, %v318_v40  ;;  %v535_v44 = vpack.c.bf16 %v519_v42, %v626_v27  ;;  %v483_v46 = vld [vmem:[#allocation2 + $0x1e] sm:$0xff]  ;;  %4266 = vmatpush3.bf16.msra.mxu0 %v4930_v7  ;;  %v5461_v39 = vpop.permute.xlu1 %378 }
  0xff   :  { %v592_v48 = vld [vmem:[#allocation2 + $0x20] sm:$0xff]  ;;  %v266_v52 = vpop.f32.mrb[12].mxu0  ;;  %v499_v54 = vpack.c.bf16 %v483_v46, %v482_v45  ;;  %v593_v61 = vld [vmem:[#allocation2 + $0x28] sm:$0xff]  ;;  %4267 = vmatprep.subr.bf16.mxu0 %v4932_v35 }
 0x100   :  { %v913_v50 = vld [vmem:[#allocation2 + $0x1a] sm:$0xff]  ;;  %v914_v51 = vld [vmem:[#allocation2 + $0x22] sm:$0xff]  ;;  %v608_v55 = vpack.c.bf16 %v592_v48, %v591_v31  ;;  %467 = vst.msk [vmem:[#allocation2 + $0x38] sm:$0xff] %vm461_vm4, %v426_v43  ;;  %v267_v57 = vadd.f32 %v5354_v47, %v266_v52  ;;  %v4676_v58 = vpop.f32.mrb[13].mxu0  ;;  %554 = vrot.lane.b32.xlu1 %v535_v44, %s5067_s27  ;;  %v716_v63 = vpack.c.bf16 %v593_v61, %v592_v48  ;;  %v5476_v6 = vpop.permute.xlu0 %383 }
 0x101   :  { %v628_v53 = vld [vmem:[#allocation2 + $0x27] sm:$0xff]  ;;  %v931_v56 = vpack.c.bf16 %v914_v51, %v913_v50  ;;  %v269_v62 = vpop.f32.mrb[14].mxu0  ;;  %508 = vst.msk [vmem:[#allocation3 + $0x28] sm:$0xff] %vm461_vm4, %v499_v54  ;;  %v4933_v48 = vld [vmem:[%s6723_s2 + $0x98] sm:$0xff]  }
 0x102   :  { %v644_v59 = vpack.c.bf16 %v628_v53, %v519_v42  ;;  %617 = vst.msk [vmem:[#allocation3 + $0x30] sm:$0xff] %vm461_vm4, %v608_v55  ;;  %832 = vst.msk [vmem:[#allocation3 + $0x18] sm:$0xff] %vm461_vm4, %v608_v55  ;;  %v319_v0 = vmax.f32 %v267_v57, 0.0  ;;  %v270_v1 = vadd.f32 %v5354_v47, %v269_v62  ;;  %v4677_v2 = vpop.f32.mrb[15].mxu0  ;;  %v484_v15 = vld [vmem:[#allocation2 + $0x26] sm:$0xff]  ;;  %4268 = vmatpush3.bf16.msra.mxu0 %v4933_v48 }
 0x103   :  { %940 = vst.msk [vmem:[#allocation3 + $0x20] sm:$0xff] %vm461_vm4, %v931_v56  ;;  %725 = vst.msk [vmem:[#allocation3 + $0x38] sm:$0xff] %vm461_vm4, %v716_v63 }
 0x104   :  { %663 = vrot.lane.b32.xlu0 %v644_v59, %s5067_s27  ;;  %v427_v8 = vmul.f32 %v5431_v5, %v319_v0  ;;  %v320_v9 = vmax.f32 %v270_v1, 0.0 }
 0x105   :  { %v521_v12 = vld [vmem:[#allocation2 + $0x2f] sm:$0xff] }
 0x106   :  { %468 = vst.msk [vmem:[#allocation2 + $0x40] sm:$0xff] %vm461_vm4, %v427_v8  ;;  %v428_v13 = vmul.f32 %v5441_v11, %v320_v9  ;;  %v536_v14 = vpack.c.bf16 %v521_v12, %v628_v53  ;;  %v485_v16 = vld [vmem:[#allocation2 + $0x2e] sm:$0xff]  ;;  %v5481_v9 = vpop.permute.xlu1 %388 }
 0x107   :  { %v594_v17 = vld [vmem:[#allocation2 + $0x30] sm:$0xff]  ;;  %v274_v21 = vpop.f32.mrb[16].mxu0  ;;  %v500_v23 = vpack.c.bf16 %v485_v16, %v484_v15  ;;  %v595_v28 = vld [vmem:[#allocation2 + $0x38] sm:$0xff] }
 0x108   :  { %v915_v19 = vld [vmem:[#allocation2 + $0x2a] sm:$0xff]  ;;  %v916_v20 = vld [vmem:[#allocation2 + $0x32] sm:$0xff]  ;;  %v609_v24 = vpack.c.bf16 %v594_v17, %v593_v61  ;;  %469 = vst.msk [vmem:[#allocation2 + $0x48] sm:$0xff] %vm461_vm4, %v428_v13  ;;  %v275_v25 = vadd.f32 %v5354_v47, %v274_v21  ;;  %v4680_v26 = vpop.f32.mrb[17].mxu0  ;;  %556 = vrot.lane.b32.xlu1 %v536_v14, %s5067_s27  ;;  %v717_v31 = vpack.c.bf16 %v595_v28, %v594_v17 }
 0x109   :  { %v630_v22 = vld [vmem:[#allocation2 + $0x37] sm:$0xff]  ;;  %v932_v29 = vpack.c.bf16 %v916_v20, %v915_v19  ;;  %v277_v30 = vpop.f32.mrb[18].mxu0  ;;  %509 = vst.msk [vmem:[#allocation3 + $0x50] sm:$0xff] %vm461_vm4, %v500_v23  ;;  %v4934_v19 = vld [vmem:[%s6723_s2 + $0xe0] sm:$0xff]  }
 0x10a   :  { %v645_v27 = vpack.c.bf16 %v630_v22, %v521_v12  ;;  %618 = vst.msk [vmem:[#allocation3 + $0x58] sm:$0xff] %vm461_vm4, %v609_v24  ;;  %833 = vst.msk [vmem:[#allocation3 + $0x40] sm:$0xff] %vm461_vm4, %v609_v24  ;;  %v321_v3 = vmax.f32 %v275_v25, 0.0  ;;  %v278_v32 = vadd.f32 %v5354_v47, %v277_v30  ;;  %v4681_v33 = vpop.f32.mrb[19].mxu0  ;;  %v486_v42 = vld [vmem:[#allocation2 + $0x36] sm:$0xff]  ;;  %4269 = vmatprep.subr.bf16.mxu0 %v4934_v19  ;;  %v4935_v30 = vld [vmem:[%s6723_s2 + $0xa0] sm:$0xff]  }
 0x10b   :  { %941 = vst.msk [vmem:[#allocation3 + $0x48] sm:$0xff] %vm461_vm4, %v932_v29  ;;  %726 = vst.msk [vmem:[#allocation3 + $0x60] sm:$0xff] %vm461_vm4, %v717_v31  ;;  %4270 = vmatpush3.bf16.msra.mxu0 %v4935_v30 }
 0x10c   :  { %665 = vrot.lane.b32.xlu0 %v645_v27, %s5067_s27  ;;  %v429_v36 = vmul.f32 %v5454_v34, %v321_v3  ;;  %v322_v38 = vmax.f32 %v278_v32, 0.0 }
 0x10d   :  { %v523_v40 = vld [vmem:[#allocation2 + $0x3f] sm:$0xff] }
 0x10e   :  { %470 = vst.msk [vmem:[#allocation2 + $0x50] sm:$0xff] %vm461_vm4, %v429_v36  ;;  %v430_v43 = vmul.f32 %v5461_v39, %v322_v38  ;;  %v537_v44 = vpack.c.bf16 %v523_v40, %v630_v22  ;;  %v487_v45 = vld [vmem:[#allocation2 + $0x3e] sm:$0xff]  ;;  %v5499_v38 = vpop.permute.xlu0 %393 }
 0x10f   :  { %v596_v46 = vld [vmem:[#allocation2 + $0x40] sm:$0xff]  ;;  %v282_v51 = vpop.f32.mrb[20].mxu0  ;;  %v501_v53 = vpack.c.bf16 %v487_v45, %v486_v42  ;;  %v597_v59 = vld [vmem:[#allocation2 + $0x48] sm:$0xff] }
 0x110   :  { %v918_v50 = vld [vmem:[#allocation2 + $0x42] sm:$0xff]  ;;  %v610_v54 = vpack.c.bf16 %v596_v46, %v595_v28  ;;  %v917_v55 = vld [vmem:[#allocation2 + $0x3a] sm:$0xff]  ;;  %471 = vst.msk [vmem:[#allocation2 + $0x58] sm:$0xff] %vm461_vm4, %v430_v43  ;;  %v283_v56 = vadd.f32 %v5354_v47, %v282_v51  ;;  %v4684_v57 = vpop.f32.mrb[21].mxu0  ;;  %558 = vrot.lane.b32.xlu1 %v537_v44, %s5067_s27  ;;  %v718_v62 = vpack.c.bf16 %v597_v59, %v596_v46  ;;  %v5504_v43 = vpop.permute.xlu1 %398 }
 0x111   :  { %v632_v52 = vld [vmem:[#allocation2 + $0x47] sm:$0xff]  ;;  %v285_v61 = vpop.f32.mrb[22].mxu0  ;;  %510 = vst.msk [vmem:[#allocation3 + $0x78] sm:$0xff] %vm461_vm4, %v501_v53  ;;  %v933_v63 = vpack.c.bf16 %v918_v50, %v917_v55 }
 0x112   :  { %v646_v58 = vpack.c.bf16 %v632_v52, %v523_v40  ;;  %619 = vst.msk [vmem:[#allocation3 + $0x80] sm:$0xff] %vm461_vm4, %v610_v54  ;;  %834 = vst.msk [vmem:[#allocation3 + $0x68] sm:$0xff] %vm461_vm4, %v610_v54  ;;  %v323_v0 = vmax.f32 %v283_v56, 0.0  ;;  %v286_v1 = vadd.f32 %v5354_v47, %v285_v61  ;;  %v4685_v2 = vpop.f32.mrb[23].mxu0  ;;  %v488_v13 = vld [vmem:[#allocation2 + $0x46] sm:$0xff] }
 0x113   :  { %727 = vst.msk [vmem:[#allocation3 + $0x88] sm:$0xff] %vm461_vm4, %v718_v62  ;;  %942 = vst.msk [vmem:[#allocation3 + $0x70] sm:$0xff] %vm461_vm4, %v933_v63 }
 0x114   :  { %667 = vrot.lane.b32.xlu0 %v646_v58, %s5067_s27  ;;  %v431_v7 = vmul.f32 %v5476_v6, %v323_v0  ;;  %v324_v8 = vmax.f32 %v286_v1, 0.0  ;;  %v4938_v0 = vld [vmem:[%s6723_s2 + $0xa8] sm:$0xff]  }
 0x115   :  { %v525_v12 = vld [vmem:[#allocation2 + $0x4f] sm:$0xff] }
 0x116   :  { %472 = vst.msk [vmem:[#allocation2 + $0x60] sm:$0xff] %vm461_vm4, %v431_v7  ;;  %v432_v14 = vmul.f32 %v5481_v9, %v324_v8  ;;  %v538_v15 = vpack.c.bf16 %v525_v12, %v632_v52  ;;  %v489_v16 = vld [vmem:[#allocation2 + $0x4e] sm:$0xff] }
 0x117   :  { %v598_v17 = vld [vmem:[#allocation2 + $0x50] sm:$0xff]  ;;  %v290_v21 = vpop.f32.mrb[24].mxu0  ;;  %v502_v23 = vpack.c.bf16 %v489_v16, %v488_v13  ;;  %v599_v29 = vld [vmem:[#allocation2 + $0x58] sm:$0xff]  ;;  %v4937_v52 = vld [vmem:[%s6723_s2 + $0xe8] sm:$0xff]  }
 0x118   :  { %v920_v20 = vld [vmem:[#allocation2 + $0x52] sm:$0xff]  ;;  %v611_v24 = vpack.c.bf16 %v598_v17, %v597_v59  ;;  %v919_v25 = vld [vmem:[#allocation2 + $0x4a] sm:$0xff]  ;;  %473 = vst.msk [vmem:[#allocation2 + $0x68] sm:$0xff] %vm461_vm4, %v432_v14  ;;  %v291_v26 = vadd.f32 %v5354_v47, %v290_v21  ;;  %v4688_v27 = vpop.f32.mrb[25].mxu0  ;;  %560 = vrot.lane.b32.xlu1 %v538_v15, %s5067_s27  ;;  %v719_v3 = vpack.c.bf16 %v599_v29, %v598_v17  ;;  %v5522_v14 = vpop.permute.xlu0 %403 }
 0x119   :  { %v634_v22 = vld [vmem:[#allocation2 + $0x57] sm:$0xff]  ;;  %v293_v31 = vpop.f32.mrb[26].mxu0  ;;  %511 = vst.msk [vmem:[#allocation3 + $0xa0] sm:$0xff] %vm461_vm4, %v502_v23  ;;  %v934_v32 = vpack.c.bf16 %v920_v20, %v919_v25  ;;  %4271 = vmatprep.subr.bf16.mxu0 %v4937_v52  ;;  %v5527_v17 = vpop.permute.xlu1 %408 }
 0x11a   :  { %v647_v28 = vpack.c.bf16 %v634_v22, %v525_v12  ;;  %620 = vst.msk [vmem:[#allocation3 + $0xa8] sm:$0xff] %vm461_vm4, %v611_v24  ;;  %835 = vst.msk [vmem:[#allocation3 + $0x90] sm:$0xff] %vm461_vm4, %v611_v24  ;;  %v325_v33 = vmax.f32 %v291_v26, 0.0  ;;  %v294_v35 = vadd.f32 %v5354_v47, %v293_v31  ;;  %v4689_v36 = vpop.f32.mrb[27].mxu0  ;;  %v490_v45 = vld [vmem:[#allocation2 + $0x56] sm:$0xff]  ;;  %4272 = vmatpush3.bf16.msra.mxu0 %v4938_v0 }
 0x11b   :  { %728 = vst.msk [vmem:[#allocation3 + $0xb0] sm:$0xff] %vm461_vm4, %v719_v3  ;;  %943 = vst.msk [vmem:[#allocation3 + $0x98] sm:$0xff] %vm461_vm4, %v934_v32  ;;  %v4939_v25 = vld [vmem:[%s6723_s2 + $0xf0] sm:$0xff]  }
 0x11c   :  { %669 = vrot.lane.b32.xlu0 %v647_v28, %s5067_s27  ;;  %v433_v40 = vmul.f32 %v5499_v38, %v325_v33  ;;  %v326_v42 = vmax.f32 %v294_v35, 0.0  ;;  %4273 = vmatprep.subr.bf16.mxu0 %v4939_v25  ;;  %v4940_v36 = vld [vmem:[%s6723_s2 + $0xb0] sm:$0xff]  }
 0x11d   :  { %v527_v44 = vld [vmem:[#allocation2 + $0x5f] sm:$0xff] }
 0x11e   :  { %474 = vst.msk [vmem:[#allocation2 + $0x70] sm:$0xff] %vm461_vm4, %v433_v40  ;;  %v434_v46 = vmul.f32 %v5504_v43, %v326_v42  ;;  %v539_v48 = vpack.c.bf16 %v527_v44, %v634_v22  ;;  %v491_v50 = vld [vmem:[#allocation2 + $0x5e] sm:$0xff]  ;;  %4274 = vmatpush3.bf16.msra.mxu0 %v4940_v36 }
 0x11f   :  { %v600_v51 = vld [vmem:[#allocation2 + $0x60] sm:$0xff]  ;;  %v298_v54 = vpop.f32.mrb[28].mxu0  ;;  %v503_v56 = vpack.c.bf16 %v491_v50, %v490_v45  ;;  %v601_v63 = vld [vmem:[#allocation2 + $0x68] sm:$0xff]  ;;  %v5545_v50 = vpop.permute.xlu0 %413 }
 0x120   :  { %v922_v53 = vld [vmem:[#allocation2 + $0x62] sm:$0xff]  ;;  %v612_v57 = vpack.c.bf16 %v600_v51, %v599_v29  ;;  %v921_v58 = vld [vmem:[#allocation2 + $0x5a] sm:$0xff]  ;;  %475 = vst.msk [vmem:[#allocation2 + $0x78] sm:$0xff] %vm461_vm4, %v434_v46  ;;  %v299_v59 = vadd.f32 %v5354_v47, %v298_v54  ;;  %v4692_v61 = vpop.f32.mrb[29].mxu0  ;;  %562 = vrot.lane.b32.xlu1 %v539_v48, %s5067_s27  ;;  %v720_v2 = vpack.c.bf16 %v601_v63, %v600_v51 }
 0x121   :  { %v636_v55 = vld [vmem:[#allocation2 + $0x67] sm:$0xff]  ;;  %v301_v1 = vpop.f32.mrb[30].mxu0  ;;  %512 = vst.msk [vmem:[#allocation3 + $0xc8] sm:$0xff] %vm461_vm4, %v503_v56  ;;  %v935_v7 = vpack.c.bf16 %v922_v53, %v921_v58  ;;  %v5550_v53 = vpop.permute.xlu1 %418 }
 0x122   :  { %v648_v62 = vpack.c.bf16 %v636_v55, %v527_v44  ;;  %621 = vst.msk [vmem:[#allocation3 + $0xd0] sm:$0xff] %vm461_vm4, %v612_v57  ;;  %836 = vst.msk [vmem:[#allocation3 + $0xb8] sm:$0xff] %vm461_vm4, %v612_v57  ;;  %v327_v8 = vmax.f32 %v299_v59, 0.0  ;;  %v302_v12 = vadd.f32 %v5354_v47, %v301_v1  ;;  %v4693_v13 = vpop.f32.mrb[31].mxu0  ;;  %v492_v20 = vld [vmem:[#allocation2 + $0x66] sm:$0xff] }
 0x123   :  { %729 = vst.msk [vmem:[#allocation3 + $0xd8] sm:$0xff] %vm461_vm4, %v720_v2  ;;  %944 = vst.msk [vmem:[#allocation3 + $0xc0] sm:$0xff] %vm461_vm4, %v935_v7  ;;  %v4942_v7 = vld [vmem:[%s6723_s2 + $0xf8] sm:$0xff]   ;;  %v5572_v36 = vld [vmem:[#allocation2] sm:$0xff] }
 0x124   :  { %671 = vrot.lane.b32.xlu0 %v648_v62, %s5067_s27  ;;  %v435_v15 = vmul.f32 %v5522_v14, %v327_v8  ;;  %v328_v16 = vmax.f32 %v302_v12, 0.0  ;;  %v4943_v12 = vld [vmem:[%s6723_s2 + $0xb8] sm:$0xff]   ;;  %4275 = vmatprep.subr.bf16.mxu0 %v4942_v7 }
 0x125   :  { %v529_v19 = vld [vmem:[#allocation2 + $0x6f] sm:$0xff]  ;;  %4276 = vmatpush3.bf16.msra.mxu0 %v4943_v12 }
 0x126   :  { %476 = vst.msk [vmem:[#allocation2 + $0x80] sm:$0xff] %vm461_vm4, %v435_v15  ;;  %v436_v21 = vmul.f32 %v5527_v17, %v328_v16  ;;  %v540_v22 = vpack.c.bf16 %v529_v19, %v636_v55  ;;  %v493_v23 = vld [vmem:[#allocation2 + $0x6e] sm:$0xff]  ;;  %v734_v16 = vld [vmem:[#allocation2 + $0x19] sm:$0xff] }
 0x127   :  { %v602_v24 = vld [vmem:[#allocation2 + $0x70] sm:$0xff]  ;;  %v306_v27 = vpop.f32.mrb[32].mxu0  ;;  %v504_v29 = vpack.c.bf16 %v493_v23, %v492_v20  ;;  %v603_v35 = vld [vmem:[#allocation2 + $0x78] sm:$0xff] }
 0x128   :  { %v924_v26 = vld [vmem:[#allocation2 + $0x72] sm:$0xff]  ;;  %v613_v30 = vpack.c.bf16 %v602_v24, %v601_v63  ;;  %v923_v31 = vld [vmem:[#allocation2 + $0x6a] sm:$0xff]  ;;  %477 = vst.msk [vmem:[#allocation2 + $0x88] sm:$0xff] %vm461_vm4, %v436_v21  ;;  %v307_v3 = vadd.f32 %v5354_v47, %v306_v27  ;;  %v4696_v32 = vpop.f32.mrb[33].mxu0  ;;  %564 = vrot.lane.b32.xlu1 %v540_v22, %s5067_s27  ;;  %v721_v42 = vpack.c.bf16 %v603_v35, %v602_v24 }
 0x129   :  { %v638_v28 = vld [vmem:[#allocation2 + $0x77] sm:$0xff]  ;;  %v309_v40 = vpop.f32.mrb[34].mxu0  ;;  %513 = vst.msk [vmem:[#allocation3 + $0xf0] sm:$0xff] %vm461_vm4, %v504_v29  ;;  %v936_v44 = vpack.c.bf16 %v924_v26, %v923_v31 }
 0x12a   :  { %v649_v33 = vpack.c.bf16 %v638_v28, %v529_v19  ;;  %622 = vst.msk [vmem:[#allocation3 + $0xf8] sm:$0xff] %vm461_vm4, %v613_v30  ;;  %837 = vst.msk [vmem:[#allocation3 + $0xe0] sm:$0xff] %vm461_vm4, %v613_v30  ;;  %v329_v45 = vmax.f32 %v307_v3, 0.0  ;;  %v310_v46 = vadd.f32 %v5354_v47, %v309_v40  ;;  %v4697_v48 = vpop.f32.mrb[35].mxu0  ;;  %v494_v56 = vld [vmem:[#allocation2 + $0x76] sm:$0xff]  ;;  %v930_v19 = vld [vmem:[#allocation2 + $0xa2] sm:$0xff] }
 0x12b   :  { %730 = vst.msk [vmem:[#allocation3 + $0x100] sm:$0xff] %vm461_vm4, %v721_v42  ;;  %945 = vst.msk [vmem:[#allocation3 + $0xe8] sm:$0xff] %vm461_vm4, %v936_v44  ;;  %v733_v32 = vld [vmem:[#allocation2 + $0x11] sm:$0xff] }
 0x12c   :  { %673 = vrot.lane.b32.xlu0 %v649_v33, %s5067_s27  ;;  %v437_v51 = vmul.f32 %v5545_v50, %v329_v45  ;;  %v330_v52 = vmax.f32 %v310_v46, 0.0  ;;  %v842_v33 = vld [vmem:[#allocation2 + $0x21] sm:$0xff]  ;;  %v751_v42 = vpack.c.bf16 %v734_v16, %v733_v32  ;;  %v736_v45 = vld [vmem:[#allocation2 + $0x29] sm:$0xff]  ;;  %v844_v48 = vld [vmem:[#allocation2 + $0x31] sm:$0xff] }
 0x12d   :  { %v531_v54 = vld [vmem:[#allocation2 + $0x7f] sm:$0xff]  ;;  %v859_v46 = vpack.c.bf16 %v842_v33, %v734_v16  ;;  %v852_v7 = vld [vmem:[#allocation2 + $0x71] sm:$0xff] }
 0x12e   :  { %478 = vst.msk [vmem:[#allocation2 + $0x90] sm:$0xff] %vm461_vm4, %v437_v51  ;;  %v438_v47 = vmul.f32 %v5550_v53, %v330_v52  ;;  %v541_v55 = vpack.c.bf16 %v531_v54, %v638_v28  ;;  %v495_v57 = vld [vmem:[#allocation2 + $0x7e] sm:$0xff]  ;;  %v752_v51 = vpack.c.bf16 %v736_v45, %v842_v33 }
 0x12f   :  { %v604_v58 = vld [vmem:[#allocation2 + $0x80] sm:$0xff]  ;;  %v505_v63 = vpack.c.bf16 %v495_v57, %v494_v56  ;;  %v605_v2 = vld [vmem:[#allocation2 + $0x88] sm:$0xff] }
 0x130   :  { %v925_v59 = vld [vmem:[#allocation2 + $0x7a] sm:$0xff]  ;;  %v926_v61 = vld [vmem:[#allocation2 + $0x82] sm:$0xff]  ;;  %v614_v0 = vpack.c.bf16 %v604_v58, %v603_v35  ;;  %479 = vst.msk [vmem:[#allocation2 + $0x98] sm:$0xff] %vm461_vm4, %v438_v47  ;;  %566 = vrot.lane.b32.xlu1 %v541_v55, %s5067_s27  ;;  %v722_v13 = vpack.c.bf16 %v605_v2, %v604_v58  ;;  %v848_v58 = vld [vmem:[#allocation2 + $0x51] sm:$0xff] }
 0x131   :  { %v640_v62 = vld [vmem:[#allocation2 + $0x87] sm:$0xff]  ;;  %v937_v8 = vpack.c.bf16 %v926_v61, %v925_v59  ;;  %514 = vst.msk [vmem:[#allocation3 + $0x118] sm:$0xff] %vm461_vm4, %v505_v63  ;;  %v738_v52 = vld [vmem:[#allocation2 + $0x39] sm:$0xff] }
 0x132   :  { %v650_v1 = vpack.c.bf16 %v640_v62, %v531_v54  ;;  %623 = vst.msk [vmem:[#allocation3 + $0x120] sm:$0xff] %vm461_vm4, %v614_v0  ;;  %838 = vst.msk [vmem:[#allocation3 + $0x108] sm:$0xff] %vm461_vm4, %v614_v0  ;;  %v496_v21 = vld [vmem:[#allocation2 + $0x86] sm:$0xff]  ;;  %v860_v54 = vpack.c.bf16 %v844_v48, %v736_v45  ;;  %v753_v55 = vpack.c.bf16 %v738_v52, %v844_v48  ;;  %v742_v61 = vld [vmem:[#allocation2 + $0x59] sm:$0xff] }
 0x133   :  { %946 = vst.msk [vmem:[#allocation3 + $0x110] sm:$0xff] %vm461_vm4, %v937_v8  ;;  %731 = vst.msk [vmem:[#allocation3 + $0x128] sm:$0xff] %vm461_vm4, %v722_v13  ;;  %v846_v47 = vld [vmem:[#allocation2 + $0x41] sm:$0xff]  ;;  %v740_v56 = vld [vmem:[#allocation2 + $0x49] sm:$0xff]  ;;  %v755_v0 = vpack.c.bf16 %v742_v61, %v848_v58 }
 0x134   :  { %675 = vrot.lane.b32.xlu0 %v650_v1, %s5067_s27  ;;  %v861_v57 = vpack.c.bf16 %v846_v47, %v738_v52  ;;  %v754_v59 = vpack.c.bf16 %v740_v56, %v846_v47  ;;  %v850_v63 = vld [vmem:[#allocation2 + $0x61] sm:$0xff]  ;;  %v744_v1 = vld [vmem:[#allocation2 + $0x69] sm:$0xff]  ;;  %v746_v12 = vld [vmem:[#allocation2 + $0x79] sm:$0xff] }
 0x135   :  { %v533_v15 = vld [vmem:[#allocation2 + $0x8f] sm:$0xff]  ;;  %v756_v8 = vpack.c.bf16 %v744_v1, %v850_v63  ;;  %v864_v13 = vpack.c.bf16 %v852_v7, %v744_v1  ;;  %v757_v16 = vpack.c.bf16 %v746_v12, %v852_v7  ;;  %v4941_v48 = vld [vmem:[%s6723_s2 + $0x118] sm:$0xff]  }
 0x136   :  { %v542_v20 = vpack.c.bf16 %v533_v15, %v640_v62  ;;  %v497_v22 = vld [vmem:[#allocation2 + $0x8e] sm:$0xff]  ;;  %v862_v62 = vpack.c.bf16 %v848_v58, %v740_v56 }
 0x137   :  { %v606_v23 = vld [vmem:[#allocation2 + $0x90] sm:$0xff]  ;;  %v506_v27 = vpack.c.bf16 %v497_v22, %v496_v21  ;;  %v714_v30 = vld [vmem:[#allocation2 + $0x98] sm:$0xff] }
 0x138   :  { %v927_v24 = vld [vmem:[#allocation2 + $0x8a] sm:$0xff]  ;;  %v928_v25 = vld [vmem:[#allocation2 + $0x92] sm:$0xff]  ;;  %v615_v28 = vpack.c.bf16 %v606_v23, %v605_v2  ;;  %568 = vrot.lane.b32.xlu1 %v542_v20, %s5067_s27  ;;  %v929_v3 = vld [vmem:[#allocation2 + $0x9a] sm:$0xff]  ;;  %v723_v35 = vpack.c.bf16 %v714_v30, %v606_v23  ;;  %v831_v40 = vpack.c.bf16 %v5572_v36, %v714_v30  ;;  %v863_v2 = vpack.c.bf16 %v850_v63, %v742_v61 }
 0x139   :  { %v642_v26 = vld [vmem:[#allocation2 + $0x97] sm:$0xff]  ;;  %v938_v31 = vpack.c.bf16 %v928_v25, %v927_v24  ;;  %515 = vst.msk [vmem:[#allocation3 + $0x140] sm:$0xff] %vm461_vm4, %v506_v27  ;;  %v939_v44 = vpack.c.bf16 %v930_v19, %v929_v3  ;;  %v748_v19 = vld [vmem:[#allocation2 + $0x89] sm:$0xff]  ;;  %v858_v25 = vld [vmem:[#allocation2 + $0xa1] sm:$0xff] }
 0x13a   :  { %v651_v29 = vpack.c.bf16 %v642_v26, %v533_v15  ;;  %624 = vst.msk [vmem:[#allocation3 + $0x148] sm:$0xff] %vm461_vm4, %v615_v28  ;;  %839 = vst.msk [vmem:[#allocation3 + $0x130] sm:$0xff] %vm461_vm4, %v615_v28  ;;  %v854_v15 = vld [vmem:[#allocation2 + $0x81] sm:$0xff]  ;;  %v856_v21 = vld [vmem:[#allocation2 + $0x91] sm:$0xff] }
 0x13b   :  { %947 = vst.msk [vmem:[#allocation3 + $0x138] sm:$0xff] %vm461_vm4, %v938_v31  ;;  %732 = vst.msk [vmem:[#allocation3 + $0x150] sm:$0xff] %vm461_vm4, %v723_v35  ;;  %v865_v20 = vpack.c.bf16 %v854_v15, %v746_v12  ;;  %v758_v22 = vpack.c.bf16 %v748_v19, %v854_v15  ;;  %v750_v23 = vld [vmem:[#allocation2 + $0x99] sm:$0xff]  ;;  %v866_v24 = vpack.c.bf16 %v856_v21, %v748_v19  ;;  %v4931_v35 = vld [vmem:[%s6723_s2 + $0x108] sm:$0xff]  }
 0x13c   :  { %677 = vrot.lane.b32.xlu0 %v651_v29, %s5067_s27  ;;  %840 = vst.msk [vmem:[#allocation3 + $0x158] sm:$0xff] %vm461_vm4, %v831_v40  ;;  %769 = vrot.lane.b32.xlu1 %v751_v42, %s5067_s27  ;;  %948 = vst.msk [vmem:[#allocation3 + $0x160] sm:$0xff] %vm461_vm4, %v939_v44  ;;  %v759_v26 = vpack.c.bf16 %v750_v23, %v856_v21  ;;  %v867_v27 = vpack.c.bf16 %v858_v25, %v750_v23  ;;  %v4926_v31 = vld [vmem:[%s6723_s2 + $0x100] sm:$0xff]   ;;  %v4936_v42 = vld [vmem:[%s6723_s2 + $0x110] sm:$0xff]  }
 0x140   :  { %877 = vrot.lane.b32.xlu0 %v859_v46, %s5067_s27  ;;  %771 = vrot.lane.b32.xlu1 %v752_v51, %s5067_s27 }
 0x144   :  { %879 = vrot.lane.b32.xlu0 %v860_v54, %s5067_s27  ;;  %773 = vrot.lane.b32.xlu1 %v753_v55, %s5067_s27 }
 0x148   :  { %881 = vrot.lane.b32.xlu0 %v861_v57, %s5067_s27  ;;  %775 = vrot.lane.b32.xlu1 %v754_v59, %s5067_s27 }
 0x14c   :  { %883 = vrot.lane.b32.xlu0 %v862_v62, %s5067_s27  ;;  %777 = vrot.lane.b32.xlu1 %v755_v0, %s5067_s27 }
 0x150   :  { %885 = vrot.lane.b32.xlu0 %v863_v2, %s5067_s27  ;;  %779 = vrot.lane.b32.xlu1 %v756_v8, %s5067_s27 }
 0x154   :  { %887 = vrot.lane.b32.xlu0 %v864_v13, %s5067_s27  ;;  %781 = vrot.lane.b32.xlu1 %v757_v16, %s5067_s27 }
 0x158   :  { %889 = vrot.lane.b32.xlu0 %v865_v20, %s5067_s27  ;;  %783 = vrot.lane.b32.xlu1 %v758_v22, %s5067_s27 }
 0x15c   :  { %891 = vrot.lane.b32.xlu0 %v866_v24, %s5067_s27  ;;  %785 = vrot.lane.b32.xlu1 %v759_v26, %s5067_s27 }
 0x160   :  { %893 = vrot.lane.b32.xlu0 %v867_v27, %s5067_s27 }
 0x16a   :  { %v553_v28 = vpop.permute.xlu1 %552 }
 0x16b   :  { %580 = vst.msk [vmem:[#allocation3] sm:$0xff] %vm579_vm5, %v553_v28 }
 0x16d   :  { %v662_v29 = vpop.permute.xlu0 %661 }
 0x16e   :  { %688 = vst.msk [vmem:[#allocation3 + $0x8] sm:$0xff] %vm579_vm5, %v662_v29 }
 0x172   :  { %v555_v30 = vpop.permute.xlu1 %554  ;;  %v949_v33 = vld [vmem:[#allocation3] sm:$0xff] }
 0x173   :  { %581 = vst.msk [vmem:[#allocation3 + $0x28] sm:$0xff] %vm579_vm5, %v555_v30 }
 0x175   :  { %v950_v32 = vld [vmem:[#allocation3 + $0x8] sm:$0xff] }
 0x176   :  { %v664_v3 = vpop.permute.xlu0 %663  ;;  %1348 = vmatprep.mubr.bf16.mxu1 %v950_v32 }
 0x177   :  { %689 = vst.msk [vmem:[#allocation3 + $0x30] sm:$0xff] %vm579_vm5, %v664_v3  ;;  %1349 = vmatmul.mubr.bf16.vlgmr.msra.gmra.mrb[0].mxu1 %v949_v33 }
 0x178   :  { %4699 = vmatpush3.bf16.msra.mxu1 %v4926_v31 }
 0x179   :  { %4700 = vmatprep.subr.bf16.mxu1 %v5572_v36 }
 0x17a   :  { %v557_v40 = vpop.permute.xlu1 %556  ;;  %v954_v46 = vld [vmem:[#allocation3 + $0x28] sm:$0xff] }
 0x17b   :  { %582 = vst.msk [vmem:[#allocation3 + $0x50] sm:$0xff] %vm579_vm5, %v557_v40 }
 0x17c   :  { %4701 = vmatpush3.bf16.msra.mxu1 %v4931_v35  ;;  %v953_v35 = vld [vmem:[#allocation3 + $0x20] sm:$0xff] }
 0x17d   :  { %4702 = vmatprep.subr.bf16.mxu1 %v5572_v36 }
 0x17e   :  { %v666_v44 = vpop.permute.xlu0 %665  ;;  %v955_v45 = vld [vmem:[#allocation3 + $0x30] sm:$0xff] }
 0x17f   :  { %690 = vst.msk [vmem:[#allocation3 + $0x58] sm:$0xff] %vm579_vm5, %v666_v44  ;;  %1356 = vmatprep.mubr.bf16.mxu1 %v955_v45 }
 0x180   :  { %1357 = vmatmul.mubr.bf16.gmra.mrb[4].mxu1 %v954_v46 }
 0x181   :  { %4703 = vmatpush3.bf16.msra.mxu1 %v4936_v42 }
 0x182   :  { %4704 = vmatprep.subr.bf16.mxu1 %v5572_v36  ;;  %v559_v51 = vpop.permute.xlu1 %558  ;;  %v959_v47 = vld [vmem:[#allocation3 + $0x50] sm:$0xff] }
 0x183   :  { %583 = vst.msk [vmem:[#allocation3 + $0x78] sm:$0xff] %vm579_vm5, %v559_v51  ;;  %v958_v51 = vld [vmem:[#allocation3 + $0x48] sm:$0xff] }
 0x185   :  { %4705 = vmatpush3.bf16.msra.mxu1 %v4941_v48 }
 0x186   :  { %v668_v52 = vpop.permute.xlu0 %667  ;;  %v960_v54 = vld [vmem:[#allocation3 + $0x58] sm:$0xff] }
 0x187   :  { %691 = vst.msk [vmem:[#allocation3 + $0x80] sm:$0xff] %vm579_vm5, %v668_v52  ;;  %1364 = vmatprep.mubr.bf16.mxu1 %v960_v54 }
 0x188   :  { %1365 = vmatmul.mubr.bf16.gmra.mrb[8].mxu1 %v959_v47 }
 0x18a   :  { %v561_v55 = vpop.permute.xlu1 %560  ;;  %v964_v58 = vld [vmem:[#allocation3 + $0x78] sm:$0xff] }
 0x18b   :  { %584 = vst.msk [vmem:[#allocation3 + $0xa0] sm:$0xff] %vm579_vm5, %v561_v55 }
 0x18e   :  { %v670_v56 = vpop.permute.xlu0 %669  ;;  %v965_v57 = vld [vmem:[#allocation3 + $0x80] sm:$0xff] }
 0x18f   :  { %692 = vst.msk [vmem:[#allocation3 + $0xa8] sm:$0xff] %vm579_vm5, %v670_v56  ;;  %1372 = vmatprep.mubr.bf16.mxu1 %v965_v57 }
 0x190   :  { %1373 = vmatmul.mubr.bf16.gmra.mrb[12].mxu1 %v964_v58  ;;  %v963_v58 = vld [vmem:[#allocation3 + $0x70] sm:$0xff] }
 0x192   :  { %v563_v59 = vpop.permute.xlu1 %562  ;;  %v969_v63 = vld [vmem:[#allocation3 + $0xa0] sm:$0xff] }
 0x193   :  { %585 = vst.msk [vmem:[#allocation3 + $0xc8] sm:$0xff] %vm579_vm5, %v563_v59 }
 0x196   :  { %v672_v61 = vpop.permute.xlu0 %671  ;;  %v970_v62 = vld [vmem:[#allocation3 + $0xa8] sm:$0xff] }
 0x197   :  { %693 = vst.msk [vmem:[#allocation3 + $0xd0] sm:$0xff] %vm579_vm5, %v672_v61  ;;  %1380 = vmatprep.mubr.bf16.mxu1 %v970_v62 }
 0x198   :  { %1381 = vmatmul.mubr.bf16.gmra.mrb[16].mxu1 %v969_v63 }
 0x19a   :  { %v565_v0 = vpop.permute.xlu1 %564  ;;  %v974_v7 = vld [vmem:[#allocation3 + $0xc8] sm:$0xff] }
 0x19b   :  { %586 = vst.msk [vmem:[#allocation3 + $0xf0] sm:$0xff] %vm579_vm5, %v565_v0  ;;  %v968_v0 = vld [vmem:[#allocation3 + $0x98] sm:$0xff] }
 0x19e   :  { %v674_v1 = vpop.permute.xlu0 %673  ;;  %v975_v2 = vld [vmem:[#allocation3 + $0xd0] sm:$0xff] }
 0x19f   :  { %694 = vst.msk [vmem:[#allocation3 + $0xf8] sm:$0xff] %vm579_vm5, %v674_v1  ;;  %1388 = vmatprep.mubr.bf16.mxu1 %v975_v2 }
 0x1a0   :  { %1389 = vmatmul.mubr.bf16.gmra.mrb[20].mxu1 %v974_v7  ;;  %v973_v7 = vld [vmem:[#allocation3 + $0xc0] sm:$0xff] }
 0x1a2   :  { %v567_v8 = vpop.permute.xlu1 %566  ;;  %v979_v15 = vld [vmem:[#allocation3 + $0xf0] sm:$0xff] }
 0x1a3   :  { %587 = vst.msk [vmem:[#allocation3 + $0x118] sm:$0xff] %vm579_vm5, %v567_v8  ;;  %v4944_v8 = vld [vmem:[%s6696_s6 + $0x40] sm:$0xff]  }
 0x1a4   :  { %4344 = vmatprep.subr.bf16.mxu0 %v4944_v8 }
 0x1a6   :  { %v676_v12 = vpop.permute.xlu0 %675  ;;  %v980_v13 = vld [vmem:[#allocation3 + $0xf8] sm:$0xff] }
 0x1a7   :  { %695 = vst.msk [vmem:[#allocation3 + $0x120] sm:$0xff] %vm579_vm5, %v676_v12  ;;  %1396 = vmatprep.mubr.bf16.mxu1 %v980_v13  ;;  %v4945_v12 = vld [vmem:[%s6696_s6] sm:$0xff]  }
 0x1a8   :  { %1397 = vmatmul.mubr.bf16.gmra.mrb[24].mxu1 %v979_v15 }
 0x1aa   :  { %v569_v16 = vpop.permute.xlu1 %568  ;;  %v984_v21 = vld [vmem:[#allocation3 + $0x118] sm:$0xff] }
 0x1ab   :  { %588 = vst.msk [vmem:[#allocation3 + $0x140] sm:$0xff] %vm579_vm5, %v569_v16  ;;  %v978_v16 = vld [vmem:[#allocation3 + $0xe8] sm:$0xff] }
 0x1ae   :  { %v678_v19 = vpop.permute.xlu0 %677  ;;  %v985_v20 = vld [vmem:[#allocation3 + $0x120] sm:$0xff]  ;;  %v770_v22 = vpop.permute.xlu1 %769 }
 0x1af   :  { %696 = vst.msk [vmem:[#allocation3 + $0x148] sm:$0xff] %vm579_vm5, %v678_v19  ;;  %1404 = vmatprep.mubr.bf16.mxu1 %v985_v20  ;;  %796 = vst.msk [vmem:[#allocation3 + $0x10] sm:$0xff] %vm579_vm5, %v770_v22  ;;  %v4946_v19 = vld [vmem:[%s6696_s6 + $0x48] sm:$0xff]  }
 0x1b0   :  { %1405 = vmatmul.mubr.bf16.gmra.mrb[28].mxu1 %v984_v21  ;;  %v4947_v20 = vld [vmem:[%s6696_s6 + $0x8] sm:$0xff]  }
 0x1b2   :  { %v878_v23 = vpop.permute.xlu0 %877  ;;  %v772_v24 = vpop.permute.xlu1 %771  ;;  %v989_v27 = vld [vmem:[#allocation3 + $0x140] sm:$0xff] }
 0x1b3   :  { %904 = vst.msk [vmem:[#allocation3 + $0x18] sm:$0xff] %vm579_vm5, %v878_v23  ;;  %797 = vst.msk [vmem:[#allocation3 + $0x38] sm:$0xff] %vm579_vm5, %v772_v24  ;;  %v983_v23 = vld [vmem:[#allocation3 + $0x110] sm:$0xff]  ;;  %v4948_v24 = vld [vmem:[%s6696_s6 + $0x50] sm:$0xff]  }
 0x1b6   :  { %v880_v25 = vpop.permute.xlu0 %879  ;;  %v990_v26 = vld [vmem:[#allocation3 + $0x148] sm:$0xff]  ;;  %v774_v28 = vpop.permute.xlu1 %773  ;;  %v951_v31 = vld [vmem:[#allocation3 + $0x10] sm:$0xff] }
 0x1b7   :  { %905 = vst.msk [vmem:[#allocation3 + $0x40] sm:$0xff] %vm579_vm5, %v880_v25  ;;  %1412 = vmatprep.mubr.bf16.mxu1 %v990_v26  ;;  %798 = vst.msk [vmem:[#allocation3 + $0x60] sm:$0xff] %vm579_vm5, %v774_v28  ;;  %v4949_v25 = vld [vmem:[%s6696_s6 + $0x10] sm:$0xff]   ;;  %v988_v28 = vld [vmem:[#allocation3 + $0x138] sm:$0xff] }
 0x1b8   :  { %1413 = vmatmul.mubr.bf16.gmra.mrb[32].mxu1 %v989_v27 }
 0x1b9   :  { %4706 = vmatprep.mubr.msk.bf16.mxu1 %vm5065_vm2, %v5572_v36 }
 0x1ba   :  { %v882_v29 = vpop.permute.xlu0 %881  ;;  %v952_v30 = vld [vmem:[#allocation3 + $0x18] sm:$0xff]  ;;  %v776_v3 = vpop.permute.xlu1 %775 }
 0x1bb   :  { %906 = vst.msk [vmem:[#allocation3 + $0x68] sm:$0xff] %vm579_vm5, %v882_v29  ;;  %1453 = vmatprep.mubr.bf16.mxu0 %v952_v30  ;;  %799 = vst.msk [vmem:[#allocation3 + $0x88] sm:$0xff] %vm579_vm5, %v776_v3  ;;  %v956_v44 = vld [vmem:[#allocation3 + $0x38] sm:$0xff]  ;;  %v4950_v29 = vld [vmem:[%s6696_s6 + $0x58] sm:$0xff]  }
 0x1bc   :  { %1454 = vmatmul.mubr.bf16.vlgmr.msra.gmra.mrb[36].mxu0 %v951_v31  ;;  %v4951_v30 = vld [vmem:[%s6696_s6 + $0x18] sm:$0xff]   ;;  %v993_v3 = vld [vmem:[#allocation3 + $0x160] sm:$0xff] }
 0x1bd   :  { %4345 = vmatpush3.bf16.msra.mxu0 %v4945_v12 }
 0x1be   :  { %v884_v32 = vpop.permute.xlu0 %883  ;;  %v957_v33 = vld [vmem:[#allocation3 + $0x40] sm:$0xff]  ;;  %v778_v40 = vpop.permute.xlu1 %777  ;;  %4346 = vmatprep.subr.bf16.mxu0 %v4946_v19 }
 0x1bf   :  { %907 = vst.msk [vmem:[#allocation3 + $0x90] sm:$0xff] %vm579_vm5, %v884_v32  ;;  %1461 = vmatprep.mubr.bf16.mxu0 %v957_v33  ;;  %800 = vst.msk [vmem:[#allocation3 + $0xb0] sm:$0xff] %vm579_vm5, %v778_v40  ;;  %v961_v47 = vld [vmem:[#allocation3 + $0x60] sm:$0xff]  ;;  %v4952_v32 = vld [vmem:[%s6696_s6 + $0x60] sm:$0xff]  }
 0x1c0   :  { %4707 = vmatmul.mubr.msk.bf16.vlgmr.msra.gmra.mrb[36].mxu1 %vm461_vm4, %v953_v35  ;;  %v4953_v33 = vld [vmem:[%s6696_s6 + $0x20] sm:$0xff]  }
 0x1c1   :  { %4710 = vmatprep.mubr.msk.bf16.mxu1 %vm5065_vm2, %v5572_v36  ;;  %4347 = vmatpush3.bf16.msra.mxu0 %v4947_v20  ;;  %v4954_v35 = vld [vmem:[%s6696_s6 + $0xc0] sm:$0xff]  }
 0x1c2   :  { %v886_v42 = vpop.permute.xlu0 %885  ;;  %v780_v45 = vpop.permute.xlu1 %779  ;;  %v962_v46 = vld [vmem:[#allocation3 + $0x68] sm:$0xff]  ;;  %4348 = vmatprep.subr.bf16.mxu0 %v4948_v24  ;;  %v4955_v40 = vld [vmem:[%s6696_s6 + $0x80] sm:$0xff]   ;;  %4414 = vmatprep.subr.bf16.mxu1 %v4954_v35 }
 0x1c3   :  { %908 = vst.msk [vmem:[#allocation3 + $0xb8] sm:$0xff] %vm579_vm5, %v886_v42  ;;  %801 = vst.msk [vmem:[#allocation3 + $0xd8] sm:$0xff] %vm579_vm5, %v780_v45  ;;  %v966_v62 = vld [vmem:[#allocation3 + $0x88] sm:$0xff]  ;;  %v4956_v42 = vld [vmem:[%s6696_s6 + $0x68] sm:$0xff]   ;;  %4415 = vmatpush3.bf16.msra.mxu1 %v4955_v40 }
 0x1c4   :  { %1462 = vmatmul.mubr.bf16.gmra.mrb[40].mxu0 %v956_v44  ;;  %v4957_v44 = vld [vmem:[%s6696_s6 + $0x28] sm:$0xff]   ;;  %v4986_v20 = vld [vmem:[%s6696_s6 + $0x1c0] sm:$0xff]  }
 0x1c5   :  { %1469 = vmatprep.mubr.bf16.mxu0 %v962_v46  ;;  %4349 = vmatpush3.bf16.msra.mxu0 %v4949_v25  ;;  %v4958_v45 = vld [vmem:[%s6696_s6 + $0xc8] sm:$0xff]  }
 0x1c6   :  { %v888_v48 = vpop.permute.xlu0 %887  ;;  %v782_v52 = vpop.permute.xlu1 %781  ;;  %v967_v56 = vld [vmem:[#allocation3 + $0x90] sm:$0xff]  ;;  %4350 = vmatprep.subr.bf16.mxu0 %v4950_v29  ;;  %v4959_v46 = vld [vmem:[%s6696_s6 + $0x88] sm:$0xff]   ;;  %4416 = vmatprep.subr.bf16.mxu1 %v4958_v45 }
 0x1c7   :  { %909 = vst.msk [vmem:[#allocation3 + $0xe0] sm:$0xff] %vm579_vm5, %v888_v48  ;;  %802 = vst.msk [vmem:[#allocation3 + $0x100] sm:$0xff] %vm579_vm5, %v782_v52  ;;  %v971_v1 = vld [vmem:[#allocation3 + $0xb0] sm:$0xff]  ;;  %4417 = vmatpush3.bf16.msra.mxu1 %v4959_v46  ;;  %v4960_v48 = vld [vmem:[%s6696_s6 + $0xd0] sm:$0xff]  }
 0x1c8   :  { %4711 = vmatmul.mubr.msk.bf16.gmra.mrb[40].mxu1 %vm461_vm4, %v958_v51  ;;  %v4961_v51 = vld [vmem:[%s6696_s6 + $0x90] sm:$0xff]   ;;  %4418 = vmatprep.subr.bf16.mxu1 %v4960_v48  ;;  %v4964_v52 = vld [vmem:[%s6696_s6 + $0xd8] sm:$0xff]  }
 0x1c9   :  { %4714 = vmatprep.mubr.msk.bf16.mxu1 %vm5065_vm2, %v5572_v36  ;;  %4351 = vmatpush3.bf16.msra.mxu0 %v4951_v30 }
 0x1ca   :  { %v890_v54 = vpop.permute.xlu0 %889  ;;  %v784_v55 = vpop.permute.xlu1 %783  ;;  %v972_v63 = vld [vmem:[#allocation3 + $0xb8] sm:$0xff]  ;;  %4352 = vmatprep.subr.bf16.mxu0 %v4952_v32 }
 0x1cb   :  { %910 = vst.msk [vmem:[#allocation3 + $0x108] sm:$0xff] %vm579_vm5, %v890_v54  ;;  %803 = vst.msk [vmem:[#allocation3 + $0x128] sm:$0xff] %vm579_vm5, %v784_v55  ;;  %v976_v13 = vld [vmem:[#allocation3 + $0xd8] sm:$0xff]  ;;  %4419 = vmatpush3.bf16.msra.mxu1 %v4961_v51  ;;  %v4965_v54 = vld [vmem:[%s6696_s6 + $0x98] sm:$0xff]  }
 0x1cc   :  { %1470 = vmatmul.mubr.bf16.gmra.mrb[44].mxu0 %v961_v47  ;;  %4420 = vmatprep.subr.bf16.mxu1 %v4964_v52  ;;  %v4966_v47 = vld [vmem:[%s6696_s6 + $0xe0] sm:$0xff]  }
 0x1cd   :  { %1477 = vmatprep.mubr.bf16.mxu0 %v967_v56  ;;  %4353 = vmatpush3.bf16.msra.mxu0 %v4953_v33  ;;  %v4967_v55 = vld [vmem:[%s6696_s6 + $0xa0] sm:$0xff]   ;;  %v4962_v56 = vld [vmem:[%s6696_s6 + $0x70] sm:$0xff]  }
 0x1ce   :  { %v892_v57 = vpop.permute.xlu0 %891  ;;  %v786_v59 = vpop.permute.xlu1 %785  ;;  %v977_v2 = vld [vmem:[#allocation3 + $0xe0] sm:$0xff]  ;;  %4354 = vmatprep.subr.bf16.mxu0 %v4956_v42 }
 0x1cf   :  { %911 = vst.msk [vmem:[#allocation3 + $0x130] sm:$0xff] %vm579_vm5, %v892_v57  ;;  %804 = vst.msk [vmem:[#allocation3 + $0x150] sm:$0xff] %vm579_vm5, %v786_v59  ;;  %v981_v21 = vld [vmem:[#allocation3 + $0x100] sm:$0xff]  ;;  %4421 = vmatpush3.bf16.msra.mxu1 %v4965_v54  ;;  %v4971_v59 = vld [vmem:[%s6696_s6 + $0xa8] sm:$0xff]  }
 0x1d0   :  { %4715 = vmatmul.mubr.msk.bf16.gmra.mrb[44].mxu1 %vm461_vm4, %v963_v58  ;;  %4422 = vmatprep.subr.bf16.mxu1 %v4966_v47  ;;  %v4963_v57 = vld [vmem:[%s6696_s6 + $0x30] sm:$0xff]   ;;  %v4969_v58 = vld [vmem:[%s6696_s6 + $0xe8] sm:$0xff]  }
 0x1d1   :  { %4718 = vmatprep.mubr.msk.bf16.mxu1 %vm5065_vm2, %v5572_v36  ;;  %4355 = vmatpush3.bf16.msra.mxu0 %v4957_v44 }
 0x1d2   :  { %v894_v61 = vpop.permute.xlu0 %893  ;;  %v982_v15 = vld [vmem:[#allocation3 + $0x108] sm:$0xff]  ;;  %4356 = vmatprep.subr.bf16.mxu0 %v4962_v56 }
 0x1d3   :  { %912 = vst.msk [vmem:[#allocation3 + $0x158] sm:$0xff] %vm579_vm5, %v894_v61  ;;  %v986_v26 = vld [vmem:[#allocation3 + $0x128] sm:$0xff]  ;;  %4423 = vmatpush3.bf16.msra.mxu1 %v4967_v55  ;;  %v4972_v61 = vld [vmem:[%s6696_s6 + $0xf0] sm:$0xff]  }
 0x1d4   :  { %1478 = vmatmul.mubr.bf16.gmra.mrb[48].mxu0 %v966_v62  ;;  %4424 = vmatprep.subr.bf16.mxu1 %v4969_v58  ;;  %v4973_v62 = vld [vmem:[%s6696_s6 + $0xb0] sm:$0xff]  }
 0x1d5   :  { %1485 = vmatprep.mubr.bf16.mxu0 %v972_v63  ;;  %4357 = vmatpush3.bf16.msra.mxu0 %v4963_v57  ;;  %v4968_v63 = vld [vmem:[%s6696_s6 + $0x78] sm:$0xff]  }
 0x1d6   :  { %v987_v22 = vld [vmem:[#allocation3 + $0x130] sm:$0xff]  ;;  %4358 = vmatprep.subr.bf16.mxu0 %v4968_v63 }
 0x1d7   :  { %v991_v31 = vld [vmem:[#allocation3 + $0x150] sm:$0xff]  ;;  %4425 = vmatpush3.bf16.msra.mxu1 %v4971_v59 }
 0x1d8   :  { %4719 = vmatmul.mubr.msk.bf16.gmra.mrb[48].mxu1 %vm461_vm4, %v968_v0  ;;  %4426 = vmatprep.subr.bf16.mxu1 %v4972_v61  ;;  %v4970_v0 = vld [vmem:[%s6696_s6 + $0x38] sm:$0xff]  }
 0x1d9   :  { %4722 = vmatprep.mubr.msk.bf16.mxu1 %vm5065_vm2, %v5572_v36  ;;  %4359 = vmatpush3.bf16.msra.mxu0 %v4970_v0 }
 0x1da   :  { %v992_v27 = vld [vmem:[#allocation3 + $0x158] sm:$0xff] }
 0x1db   :  { %4427 = vmatpush3.bf16.msra.mxu1 %v4973_v62 }
 0x1dc   :  { %1486 = vmatmul.mubr.bf16.gmra.mrb[52].mxu0 %v971_v1  ;;  %v4974_v1 = vld [vmem:[%s6696_s6 + $0xf8] sm:$0xff]  }
 0x1dd   :  { %1493 = vmatprep.mubr.bf16.mxu0 %v977_v2  ;;  %v4975_v2 = vld [vmem:[%s6696_s6 + $0xb8] sm:$0xff]   ;;  %4428 = vmatprep.subr.bf16.mxu1 %v4974_v1 }
 0x1df   :  { %4429 = vmatpush3.bf16.msra.mxu1 %v4975_v2 }
 0x1e0   :  { %4723 = vmatmul.mubr.msk.bf16.gmra.mrb[52].mxu1 %vm461_vm4, %v973_v7  ;;  %v4976_v7 = vld [vmem:[%s6696_s6 + $0x140] sm:$0xff]   ;;  %4554 = vmatprep.subr.bf16.mxu1 %v4986_v20 }
 0x1e1   :  { %4726 = vmatprep.mubr.msk.bf16.mxu1 %vm5065_vm2, %v5572_v36  ;;  %4484 = vmatprep.subr.bf16.mxu0 %v4976_v7 }
 0x1e4   :  { %1494 = vmatmul.mubr.bf16.gmra.mrb[56].mxu0 %v976_v13 }
 0x1e5   :  { %1501 = vmatprep.mubr.bf16.mxu0 %v982_v15 }
 0x1e8   :  { %4727 = vmatmul.mubr.msk.bf16.gmra.mrb[56].mxu1 %vm461_vm4, %v978_v16 }
 0x1e9   :  { %4730 = vmatprep.mubr.msk.bf16.mxu1 %vm5065_vm2, %v5572_v36 }
 0x1ec   :  { %1502 = vmatmul.mubr.bf16.gmra.mrb[60].mxu0 %v981_v21 }
 0x1ed   :  { %1509 = vmatprep.mubr.bf16.mxu0 %v987_v22 }
 0x1f0   :  { %4731 = vmatmul.mubr.msk.bf16.gmra.mrb[60].mxu1 %vm461_vm4, %v983_v23 }
 0x1f1   :  { %4734 = vmatprep.mubr.msk.bf16.mxu1 %vm5065_vm2, %v5572_v36 }
 0x1f4   :  { %1510 = vmatmul.mubr.bf16.gmra.mrb[64].mxu0 %v986_v26 }
 0x1f5   :  { %1517 = vmatprep.mubr.bf16.mxu0 %v992_v27 }
 0x1f8   :  { %4735 = vmatmul.mubr.msk.bf16.gmra.mrb[64].mxu1 %vm461_vm4, %v988_v28 }
 0x1f9   :  { %4738 = vmatprep.mubr.msk.bf16.mxu1 %vm5065_vm2, %v5572_v36 }
 0x1fc   :  { %1518 = vmatmul.mubr.bf16.gmra.mrb[68].mxu0 %v991_v31 }
 0x200   :  { %4739 = vmatmul.mubr.msk.bf16.gmra.mrb[68].mxu1 %vm461_vm4, %v993_v3 }
 0x24a   :  { %v4207_v8 = vpop.f32.mrb[0].mxu1 }
 0x24b   :  { %v4208_v12 = vpop.f32.mrb[1].mxu1 }
 0x24c   :  { %v4209_v13 = vadd.f32 %v4208_v12, %v4207_v8  ;;  %v4210_v15 = vpop.f32.mrb[2].mxu1 }
 0x24d   :  { %v4211_v16 = vpop.f32.mrb[3].mxu1 }
 0x24e   :  { %v4212_v19 = vadd.f32 %v4211_v16, %v4210_v15 }
 0x253   :  { %v4213_v21 = vpop.f32.mrb[4].mxu1 }
 0x254   :  { %v4214_v22 = vpop.f32.mrb[5].mxu1 }
 0x255   :  { %v5778_v23 = vadd.f32 %v4214_v22, %v4213_v21  ;;  %v4216_v24 = vpop.f32.mrb[6].mxu1 }
 0x256   :  { %v4217_v25 = vpop.f32.mrb[7].mxu1 }
 0x257   :  { %v5780_v26 = vadd.f32 %v4217_v25, %v4216_v24 }
 0x25b   :  { %v4219_v27 = vpop.f32.mrb[8].mxu1 }
 0x25c   :  { %v4220_v28 = vpop.f32.mrb[9].mxu1 }
 0x25d   :  { %v5782_v29 = vadd.f32 %v4220_v28, %v4219_v27  ;;  %v4222_v30 = vpop.f32.mrb[10].mxu1  ;;  %v5811_v27 = vld [vmem:[%s6695_s5] ss:$0 sm:$0xff] }
 0x25e   :  { %v4223_v31 = vpop.f32.mrb[11].mxu1 }
 0x25f   :  { %v5784_v3 = vadd.f32 %v4223_v31, %v4222_v30 }
 0x263   :  { %v4225_v32 = vpop.f32.mrb[12].mxu1 }
 0x264   :  { %v4226_v33 = vpop.f32.mrb[13].mxu1 }
 0x265   :  { %v5786_v35 = vadd.f32 %v4226_v33, %v4225_v32  ;;  %v4228_v40 = vpop.f32.mrb[14].mxu1  ;;  %v1351_v33 = vadd.f32 %v4209_v13, %v5811_v27  ;;  %v1359_v13 = vadd.f32 %v5778_v23, %v5811_v27 }
 0x266   :  { %v4229_v42 = vpop.f32.mrb[15].mxu1 }
 0x267   :  { %v5788_v44 = vadd.f32 %v4229_v42, %v4228_v40 }
 0x26b   :  { %v4231_v45 = vpop.f32.mrb[16].mxu1 }
 0x26c   :  { %v4232_v46 = vpop.f32.mrb[17].mxu1 }
 0x26d   :  { %v5790_v48 = vadd.f32 %v4232_v46, %v4231_v45  ;;  %v4234_v51 = vpop.f32.mrb[18].mxu1  ;;  %v1354_v46 = vadd.f32 %v4212_v19, %v5811_v27 }
 0x26e   :  { %v4235_v52 = vpop.f32.mrb[19].mxu1 }
 0x26f   :  { %v5792_v54 = vadd.f32 %v4235_v52, %v4234_v51 }
 0x273   :  { %v4237_v47 = vpop.f32.mrb[20].mxu1 }
 0x274   :  { %v4238_v55 = vpop.f32.mrb[21].mxu1 }
 0x275   :  { %v5794_v56 = vadd.f32 %v4238_v55, %v4237_v47  ;;  %v4240_v57 = vpop.f32.mrb[22].mxu1 }
 0x276   :  { %v4241_v58 = vpop.f32.mrb[23].mxu1 }
 0x277   :  { %v5796_v59 = vadd.f32 %v4241_v58, %v4240_v57 }
 0x27b   :  { %v4243_v61 = vpop.f32.mrb[24].mxu1 }
 0x27c   :  { %v4244_v62 = vpop.f32.mrb[25].mxu1 }
 0x27d   :  { %v5798_v63 = vadd.f32 %v4244_v62, %v4243_v61  ;;  %v4246_v0 = vpop.f32.mrb[26].mxu1 }
 0x27e   :  { %v4247_v1 = vpop.f32.mrb[27].mxu1 }
 0x27f   :  { %v5800_v2 = vadd.f32 %v4247_v1, %v4246_v0 }
 0x283   :  { %v4249_v7 = vpop.f32.mrb[28].mxu1 }
 0x284   :  { %v4250_v8 = vpop.f32.mrb[29].mxu1 }
 0x285   :  { %v5802_v12 = vadd.f32 %v4250_v8, %v4249_v7  ;;  %v4252_v15 = vpop.f32.mrb[30].mxu1 }
 0x286   :  { %v4253_v16 = vpop.f32.mrb[31].mxu1 }
 0x287   :  { %v5804_v20 = vadd.f32 %v4253_v16, %v4252_v15 }
 0x28b   :  { %v4255_v21 = vpop.f32.mrb[32].mxu1 }
 0x28c   :  { %v4256_v22 = vpop.f32.mrb[33].mxu1 }
 0x28d   :  { %v5806_v24 = vadd.f32 %v4256_v22, %v4255_v21  ;;  %v4258_v25 = vpop.f32.mrb[34].mxu1 }
 0x28e   :  { %v4259_v28 = vpop.f32.mrb[35].mxu1 }
 0x28f   :  { %v5813_v30 = vadd.f32 %v4259_v28, %v4258_v25  ;;  %v4277_v31 = vpop.f32.mrb[36].mxu0  ;;  %v1362_v25 = vadd.f32 %v5780_v26, %v5811_v27 }
 0x290   :  { %v4278_v32 = vpop.f32.mrb[37].mxu0 }
 0x291   :  { %v4279_v40 = vadd.f32 %v4278_v32, %v4277_v31  ;;  %v4280_v42 = vpop.f32.mrb[38].mxu0 }
 0x292   :  { %v4281_v45 = vpop.f32.mrb[39].mxu0 }
 0x293   :  { %v4282_v51 = vadd.f32 %v4281_v45, %v4280_v42  ;;  %v1456_v52 = vadd.f32 %v4279_v40, %v1351_v33  ;;  %v1560_v47 = vpop.f32.mrb[36].mxu1 }
 0x294   :  { %v4708_v55 = vpop.f32.mrb[37].mxu1 }
 0x295   :  { %v1561_v57 = vadd.f32 %v1560_v47, %v1456_v52  ;;  %v1459_v58 = vadd.f32 %v4282_v51, %v1354_v46  ;;  %v1563_v61 = vpop.f32.mrb[38].mxu1  ;;  %v1721_v55 = vld [vmem:[#allocation2 + $0x7] sm:$0xff] }
 0x296   :  { %v4709_v62 = vpop.f32.mrb[39].mxu1 }
 0x297   :  { %v1631_v0 = vmax.f32 %v1561_v57, 0.0  ;;  %v1564_v1 = vadd.f32 %v1563_v61, %v1459_v58  ;;  %v4283_v7 = vpop.f32.mrb[40].mxu0 }
 0x298   :  { %v4284_v8 = vpop.f32.mrb[41].mxu0 }
 0x299   :  { %v5820_v15 = vmul.f32 %v1631_v0, %v5359_v49  ;;  %v1632_v16 = vmax.f32 %v1564_v1, 0.0  ;;  %v4285_v19 = vadd.f32 %v4284_v8, %v4283_v7  ;;  %v4286_v21 = vpop.f32.mrb[42].mxu0  ;;  %v1685_v0 = vld [vmem:[#allocation2 + $0x6] sm:$0xff]  ;;  %v1370_v1 = vadd.f32 %v5784_v3, %v5811_v27 }
 0x29a   :  { %v4287_v22 = vpop.f32.mrb[43].mxu0  ;;  %v4978_v3 = vld [vmem:[%s6696_s6 + $0x148] sm:$0xff]  }
 0x29b   :  { %1667 = vst [vmem:[#allocation2 + $0x10] sm:$0xff] %v5820_v15  ;;  %v5826_v28 = vmul.f32 %v1632_v16, %v5367_v60  ;;  %v4288_v31 = vadd.f32 %v4287_v22, %v4286_v21  ;;  %v1464_v32 = vadd.f32 %v4285_v19, %v1359_v13  ;;  %v1568_v33 = vpop.f32.mrb[40].mxu1  ;;  %v1367_v60 = vadd.f32 %v5782_v29, %v5811_v27  ;;  %v4977_v22 = vld [vmem:[%s6696_s6 + $0x100] sm:$0xff]  }
 0x29c   :  { %v4712_v40 = vpop.f32.mrb[41].mxu1 }
 0x29d   :  { %1668 = vst [vmem:[#allocation2 + $0x18] sm:$0xff] %v5826_v28  ;;  %v1569_v49 = vadd.f32 %v1568_v33, %v1464_v32  ;;  %v1467_v23 = vadd.f32 %v4288_v31, %v1362_v25  ;;  %v1571_v42 = vpop.f32.mrb[42].mxu1  ;;  %v1847_v45 = vpack.c.bf16 %v5826_v28, %v5820_v15 }
 0x29e   :  { %v4713_v46 = vpop.f32.mrb[43].mxu1 }
 0x29f   :  { %v1633_v51 = vmax.f32 %v1569_v49, 0.0  ;;  %v1572_v26 = vadd.f32 %v1571_v42, %v1467_v23  ;;  %v4289_v52 = vpop.f32.mrb[44].mxu0  ;;  %v4987_v42 = vld [vmem:[%s6696_s6 + $0x180] sm:$0xff]  }
 0x2a0   :  { %v4290_v47 = vpop.f32.mrb[45].mxu0 }
 0x2a1   :  { %v5834_v57 = vmul.f32 %v1633_v51, %v5386_v4  ;;  %v1634_v58 = vmax.f32 %v1572_v26, 0.0  ;;  %v4291_v61 = vadd.f32 %v4290_v47, %v4289_v52  ;;  %v4292_v62 = vpop.f32.mrb[46].mxu0  ;;  %v1775_v26 = vpack.c.bf16 %v5820_v15, %v5572_v36  ;;  %v4990_v52 = vld [vmem:[%s6696_s6 + $0x1c8] sm:$0xff]   ;;  %v4980_v36 = vld [vmem:[%s6696_s6 + $0x150] sm:$0xff]  }
 0x2a2   :  { %v4293_v7 = vpop.f32.mrb[47].mxu0  ;;  %v1722_v8 = vld [vmem:[#allocation2 + $0xf] sm:$0xff] }
 0x2a3   :  { %v1686_v13 = vld [vmem:[#allocation2 + $0xe] sm:$0xff]  ;;  %1669 = vst [vmem:[#allocation2 + $0x20] sm:$0xff] %v5834_v57  ;;  %v5840_v16 = vmul.f32 %v1634_v58, %v5395_v18  ;;  %v4294_v19 = vadd.f32 %v4293_v7, %v4292_v62  ;;  %v1472_v29 = vadd.f32 %v4291_v61, %v1367_v60  ;;  %v1576_v21 = vpop.f32.mrb[44].mxu1  ;;  %v1739_v4 = vpack.c.bf16 %v1722_v8, %v1721_v55 }
 0x2a4   :  { %v4716_v25 = vpop.f32.mrb[45].mxu1  ;;  %v1703_v31 = vpack.c.bf16 %v1686_v13, %v1685_v0  ;;  %v1794_v32 = vld [vmem:[#allocation2 + $0x17] sm:$0xff]  ;;  %v5850_v33 = vpack.c.bf16 %v5834_v57, %v5826_v28  ;;  %v4979_v58 = vld [vmem:[%s6696_s6 + $0x108] sm:$0xff]   ;;  %v1375_v62 = vadd.f32 %v5786_v35, %v5811_v27 }
 0x2a5   :  { %1670 = vst [vmem:[#allocation2 + $0x28] sm:$0xff] %v5840_v16  ;;  %v1577_v18 = vadd.f32 %v1576_v21, %v1472_v29  ;;  %v1475_v40 = vadd.f32 %v4294_v19, %v1370_v1  ;;  %v1579_v49 = vpop.f32.mrb[46].mxu1  ;;  %2705 = vmatprep.mubr.bf16.mxu0 %v1739_v4  ;;  %v1811_v23 = vpack.c.bf16 %v1794_v32, %v1722_v8  ;;  %v4991_v13 = vld [vmem:[%s6696_s6 + $0x188] sm:$0xff]  }
 0x2a6   :  { %v1848_v46 = vpack.c.bf16 %v5840_v16, %v5834_v57  ;;  %v4717_v51 = vpop.f32.mrb[47].mxu1  ;;  %2706 = vmatmul.mubr.bf16.vlgmr.msra.gmra.mrb[72].mxu0 %v1703_v31  ;;  %v1378_v19 = vadd.f32 %v5788_v44, %v5811_v27  ;;  %v4981_v44 = vld [vmem:[%s6696_s6 + $0x110] sm:$0xff]  }
 0x2a7   :  { %v1635_v47 = vmax.f32 %v1577_v18, 0.0  ;;  %v1580_v55 = vadd.f32 %v1579_v49, %v1475_v40  ;;  %4485 = vmatpush3.bf16.msra.mxu0 %v4977_v22  ;;  %v4295_v60 = vpop.f32.mrb[48].mxu0  ;;  %2810 = vmatprep.mubr.bf16.mxu1 %v1811_v23  ;;  %v1687_v18 = vld [vmem:[#allocation2 + $0x16] sm:$0xff] }
 0x2a8   :  { %v4296_v61 = vpop.f32.mrb[49].mxu0  ;;  %2811 = vmatmul.mubr.bf16.vlgmr.msra.gmra.mrb[72].mxu1 %v1775_v26  ;;  %4486 = vmatprep.subr.bf16.mxu0 %v4978_v3 }
 0x2a9   :  { %v5872_v0 = vmul.f32 %v1635_v47, %v5411_v37  ;;  %v1636_v1 = vmax.f32 %v1580_v55, 0.0  ;;  %v4297_v7 = vadd.f32 %v4296_v61, %v4295_v60  ;;  %v4298_v8 = vpop.f32.mrb[50].mxu0  ;;  %4555 = vmatpush3.bf16.msra.mxu1 %v4987_v42  ;;  %v4992_v37 = vld [vmem:[%s6696_s6 + $0x1d0] sm:$0xff]   ;;  %v4996_v60 = vld [vmem:[%s6696_s6 + $0x1d8] sm:$0xff]  }
 0x2aa   :  { %v4299_v29 = vpop.f32.mrb[51].mxu0  ;;  %v1724_v21 = vld [vmem:[#allocation2 + $0x1f] sm:$0xff]  ;;  %4556 = vmatprep.subr.bf16.mxu1 %v4990_v52  ;;  %v4993_v47 = vld [vmem:[%s6696_s6 + $0x190] sm:$0xff]  }
 0x2ab   :  { %v1688_v4 = vld [vmem:[#allocation2 + $0x1e] sm:$0xff]  ;;  %1671 = vst [vmem:[#allocation2 + $0x30] sm:$0xff] %v5872_v0  ;;  %v5884_v35 = vmul.f32 %v1636_v1, %v5418_v41  ;;  %v4300_v22 = vadd.f32 %v4299_v29, %v4298_v8  ;;  %v1480_v25 = vadd.f32 %v4297_v7, %v1375_v62  ;;  %v1584_v31 = vpop.f32.mrb[48].mxu1  ;;  %v1740_v3 = vpack.c.bf16 %v1724_v21, %v1794_v32 }
 0x2ac   :  { %4487 = vmatpush3.bf16.msra.mxu0 %v4979_v58  ;;  %v4720_v40 = vpop.f32.mrb[49].mxu1  ;;  %v1704_v49 = vpack.c.bf16 %v1688_v4, %v1687_v18  ;;  %v1796_v23 = vld [vmem:[#allocation2 + $0x27] sm:$0xff]  ;;  %v5891_v42 = vpack.c.bf16 %v5872_v0, %v5840_v16  ;;  %v4982_v41 = vld [vmem:[%s6696_s6 + $0x158] sm:$0xff]  }
 0x2ad   :  { %4488 = vmatprep.subr.bf16.mxu0 %v4980_v36  ;;  %1672 = vst [vmem:[#allocation2 + $0x38] sm:$0xff] %v5884_v35  ;;  %v1585_v32 = vadd.f32 %v1584_v31, %v1480_v25  ;;  %v1483_v51 = vadd.f32 %v4300_v22, %v1378_v19  ;;  %v1587_v26 = vpop.f32.mrb[50].mxu1  ;;  %2713 = vmatprep.mubr.bf16.mxu0 %v1740_v3  ;;  %v4983_v1 = vld [vmem:[%s6696_s6 + $0x118] sm:$0xff]   ;;  %v4984_v8 = vld [vmem:[%s6696_s6 + $0x160] sm:$0xff]  }
 0x2ae   :  { %v1812_v52 = vpack.c.bf16 %v1796_v23, %v1724_v21  ;;  %4557 = vmatpush3.bf16.msra.mxu1 %v4991_v13  ;;  %v4721_v55 = vpop.f32.mrb[51].mxu1  ;;  %2714 = vmatmul.mubr.bf16.gmra.mrb[76].mxu0 %v1704_v49  ;;  %v1849_v58 = vpack.c.bf16 %v5884_v35, %v5872_v0  ;;  %v1383_v13 = vadd.f32 %v5790_v48, %v5811_v27 }
 0x2af   :  { %4558 = vmatprep.subr.bf16.mxu1 %v4992_v37  ;;  %v1637_v61 = vmax.f32 %v1585_v32, 0.0  ;;  %v1588_v36 = vadd.f32 %v1587_v26, %v1483_v51  ;;  %v4301_v62 = vpop.f32.mrb[52].mxu0  ;;  %v4997_v37 = vld [vmem:[%s6696_s6 + $0x198] sm:$0xff]   ;;  %v1386_v22 = vadd.f32 %v5792_v54, %v5811_v27  ;;  %v4985_v54 = vld [vmem:[%s6696_s6 + $0x120] sm:$0xff]  }
 0x2b0   :  { %2818 = vmatprep.mubr.bf16.mxu1 %v1812_v52  ;;  %4489 = vmatpush3.bf16.msra.mxu0 %v4981_v44  ;;  %v4302_v7 = vpop.f32.mrb[53].mxu0 }
 0x2b1   :  { %2819 = vmatmul.mubr.bf16.gmra.mrb[76].mxu1 %v5850_v33  ;;  %4490 = vmatprep.subr.bf16.mxu0 %v4982_v41  ;;  %v5915_v19 = vmul.f32 %v1637_v61, %v5431_v5  ;;  %v1638_v29 = vmax.f32 %v1588_v36, 0.0  ;;  %v4303_v21 = vadd.f32 %v4302_v7, %v4301_v62  ;;  %v4304_v4 = vpop.f32.mrb[54].mxu0  ;;  %v4998_v5 = vld [vmem:[%s6696_s6 + $0x1e0] sm:$0xff]   ;;  %v5001_v62 = vld [vmem:[%s6696_s6 + $0x1e8] sm:$0xff]  }
 0x2b2   :  { %4559 = vmatpush3.bf16.msra.mxu1 %v4993_v47  ;;  %v4305_v25 = vpop.f32.mrb[55].mxu0  ;;  %v1726_v31 = vld [vmem:[#allocation2 + $0x2f] sm:$0xff]  ;;  %v1689_v41 = vld [vmem:[#allocation2 + $0x26] sm:$0xff] }
 0x2b3   :  { %v1690_v3 = vld [vmem:[#allocation2 + $0x2e] sm:$0xff]  ;;  %4560 = vmatprep.subr.bf16.mxu1 %v4996_v60  ;;  %1673 = vst [vmem:[#allocation2 + $0x40] sm:$0xff] %v5915_v19  ;;  %v5927_v48 = vmul.f32 %v1638_v29, %v5441_v11  ;;  %v4306_v18 = vadd.f32 %v4305_v25, %v4304_v4  ;;  %v1488_v44 = vadd.f32 %v4303_v21, %v1383_v13  ;;  %v1592_v40 = vpop.f32.mrb[52].mxu1  ;;  %v4999_v61 = vld [vmem:[%s6696_s6 + $0x1a0] sm:$0xff]  }
 0x2b4   :  { %v1741_v49 = vpack.c.bf16 %v1726_v31, %v1796_v23  ;;  %4491 = vmatpush3.bf16.msra.mxu0 %v4983_v1  ;;  %v4724_v32 = vpop.f32.mrb[53].mxu1  ;;  %v1705_v51 = vpack.c.bf16 %v1690_v3, %v1689_v41  ;;  %v1798_v26 = vld [vmem:[#allocation2 + $0x37] sm:$0xff]  ;;  %v5934_v52 = vpack.c.bf16 %v5915_v19, %v5884_v35  ;;  %v4988_v11 = vld [vmem:[%s6696_s6 + $0x168] sm:$0xff]  }
 0x2b5   :  { %4492 = vmatprep.subr.bf16.mxu0 %v4984_v8  ;;  %1674 = vst [vmem:[#allocation2 + $0x48] sm:$0xff] %v5927_v48  ;;  %v1593_v23 = vadd.f32 %v1592_v40, %v1488_v44  ;;  %v1491_v47 = vadd.f32 %v4306_v18, %v1386_v22  ;;  %v1595_v55 = vpop.f32.mrb[54].mxu1  ;;  %v1813_v60 = vpack.c.bf16 %v1798_v26, %v1726_v31  ;;  %v4989_v29 = vld [vmem:[%s6696_s6 + $0x128] sm:$0xff]   ;;  %v4994_v4 = vld [vmem:[%s6696_s6 + $0x170] sm:$0xff]  }
 0x2b6   :  { %2721 = vmatprep.mubr.bf16.mxu0 %v1741_v49  ;;  %4561 = vmatpush3.bf16.msra.mxu1 %v4997_v37  ;;  %v4725_v36 = vpop.f32.mrb[55].mxu1  ;;  %v1850_v1 = vpack.c.bf16 %v5927_v48, %v5915_v19  ;;  %v1391_v37 = vadd.f32 %v5794_v56, %v5811_v27  ;;  %v1394_v18 = vadd.f32 %v5796_v59, %v5811_v27  ;;  %v4995_v59 = vld [vmem:[%s6696_s6 + $0x130] sm:$0xff]  }
 0x2b7   :  { %2722 = vmatmul.mubr.bf16.gmra.mrb[80].mxu0 %v1705_v51  ;;  %4562 = vmatprep.subr.bf16.mxu1 %v4998_v5  ;;  %v1639_v7 = vmax.f32 %v1593_v23, 0.0  ;;  %v1596_v8 = vadd.f32 %v1595_v55, %v1491_v47  ;;  %v4307_v13 = vpop.f32.mrb[56].mxu0  ;;  %v5003_v5 = vld [vmem:[%s6696_s6 + $0x1a8] sm:$0xff]  }
 0x2b8   :  { %2826 = vmatprep.mubr.bf16.mxu1 %v1813_v60  ;;  %4493 = vmatpush3.bf16.msra.mxu0 %v4985_v54  ;;  %v4308_v21 = vpop.f32.mrb[57].mxu0 }
 0x2b9   :  { %2827 = vmatmul.mubr.bf16.gmra.mrb[80].mxu1 %v5891_v42  ;;  %4494 = vmatprep.subr.bf16.mxu0 %v4988_v11  ;;  %v5958_v22 = vmul.f32 %v1639_v7, %v5454_v34  ;;  %v1640_v25 = vmax.f32 %v1596_v8, 0.0  ;;  %v4309_v31 = vadd.f32 %v4308_v21, %v4307_v13  ;;  %v4310_v3 = vpop.f32.mrb[58].mxu0  ;;  %v5004_v34 = vld [vmem:[%s6696_s6 + $0x1f0] sm:$0xff]   ;;  %v5006_v13 = vld [vmem:[%s6696_s6 + $0x1f8] sm:$0xff]  }
 0x2ba   :  { %4563 = vmatpush3.bf16.msra.mxu1 %v4999_v61  ;;  %v4311_v44 = vpop.f32.mrb[59].mxu0  ;;  %v1728_v40 = vld [vmem:[#allocation2 + $0x3f] sm:$0xff]  ;;  %v1691_v11 = vld [vmem:[#allocation2 + $0x36] sm:$0xff] }
 0x2bb   :  { %v1692_v49 = vld [vmem:[#allocation2 + $0x3e] sm:$0xff]  ;;  %4564 = vmatprep.subr.bf16.mxu1 %v5001_v62  ;;  %1675 = vst [vmem:[#allocation2 + $0x50] sm:$0xff] %v5958_v22  ;;  %v5970_v56 = vmul.f32 %v1640_v25, %v5461_v39  ;;  %v4312_v41 = vadd.f32 %v4311_v44, %v4310_v3  ;;  %v1496_v54 = vadd.f32 %v4309_v31, %v1391_v37  ;;  %v1600_v32 = vpop.f32.mrb[56].mxu1  ;;  %v5005_v7 = vld [vmem:[%s6696_s6 + $0x1b0] sm:$0xff]  }
 0x2bc   :  { %v1742_v51 = vpack.c.bf16 %v1728_v40, %v1798_v26  ;;  %4495 = vmatpush3.bf16.msra.mxu0 %v4989_v29  ;;  %v4728_v23 = vpop.f32.mrb[57].mxu1  ;;  %v1706_v47 = vpack.c.bf16 %v1692_v49, %v1691_v11  ;;  %v1800_v55 = vld [vmem:[#allocation2 + $0x47] sm:$0xff]  ;;  %v5977_v60 = vpack.c.bf16 %v5958_v22, %v5927_v48  ;;  %v5000_v39 = vld [vmem:[%s6696_s6 + $0x178] sm:$0xff]   ;;  %v1399_v3 = vadd.f32 %v5798_v63, %v5811_v27 }
 0x2bd   :  { %4496 = vmatprep.subr.bf16.mxu0 %v4994_v4  ;;  %1676 = vst [vmem:[#allocation2 + $0x58] sm:$0xff] %v5970_v56  ;;  %v1601_v26 = vadd.f32 %v1600_v32, %v1496_v54  ;;  %v1499_v61 = vadd.f32 %v4312_v41, %v1394_v18  ;;  %v1603_v36 = vpop.f32.mrb[58].mxu1  ;;  %v1814_v62 = vpack.c.bf16 %v1800_v55, %v1728_v40  ;;  %v5002_v25 = vld [vmem:[%s6696_s6 + $0x138] sm:$0xff]   ;;  %v1693_v23 = vld [vmem:[#allocation2 + $0x46] sm:$0xff] }
 0x2be   :  { %2729 = vmatprep.mubr.bf16.mxu0 %v1742_v51  ;;  %4565 = vmatpush3.bf16.msra.mxu1 %v5003_v5  ;;  %v4729_v8 = vpop.f32.mrb[59].mxu1  ;;  %v1851_v29 = vpack.c.bf16 %v5970_v56, %v5958_v22  ;;  %v5007_v49 = vld [vmem:[%s6696_s6 + $0x1b8] sm:$0xff]   ;;  %v1942_v15 = vld [vmem:[#allocation2 + $0x41] sm:$0xff] }
 0x2bf   :  { %2730 = vmatmul.mubr.bf16.gmra.mrb[84].mxu0 %v1706_v47  ;;  %4566 = vmatprep.subr.bf16.mxu1 %v5004_v34  ;;  %v1641_v21 = vmax.f32 %v1601_v26, 0.0  ;;  %v1604_v4 = vadd.f32 %v1603_v36, %v1499_v61  ;;  %v4313_v37 = vpop.f32.mrb[60].mxu0  ;;  %v1402_v34 = vadd.f32 %v5800_v2, %v5811_v27  ;;  %v6013_v61 = vld [vmem:[#allocation2] sm:$0xff] }
 0x2c0   :  { %2834 = vmatprep.mubr.bf16.mxu1 %v1814_v62  ;;  %4497 = vmatpush3.bf16.msra.mxu0 %v4995_v59  ;;  %v4314_v31 = vpop.f32.mrb[61].mxu0 }
 0x2c1   :  { %2835 = vmatmul.mubr.bf16.gmra.mrb[84].mxu1 %v5934_v52  ;;  %4498 = vmatprep.subr.bf16.mxu0 %v5000_v39  ;;  %v5998_v5 = vmul.f32 %v1641_v21, %v5476_v6  ;;  %v1642_v18 = vmax.f32 %v1604_v4, 0.0  ;;  %v4315_v44 = vadd.f32 %v4314_v31, %v4313_v37  ;;  %v4316_v40 = vpop.f32.mrb[62].mxu0 }
 0x2c2   :  { %4567 = vmatpush3.bf16.msra.mxu1 %v5005_v7  ;;  %v4317_v41 = vpop.f32.mrb[63].mxu0  ;;  %v1730_v54 = vld [vmem:[#allocation2 + $0x4f] sm:$0xff] }
 0x2c3   :  { %v1694_v32 = vld [vmem:[#allocation2 + $0x4e] sm:$0xff]  ;;  %4568 = vmatprep.subr.bf16.mxu1 %v5006_v13  ;;  %1677 = vst [vmem:[#allocation2 + $0x60] sm:$0xff] %v5998_v5  ;;  %v6007_v6 = vmul.f32 %v1642_v18, %v5481_v9  ;;  %v4318_v63 = vadd.f32 %v4317_v41, %v4316_v40  ;;  %v1504_v51 = vadd.f32 %v4315_v44, %v1399_v3  ;;  %v1608_v11 = vpop.f32.mrb[60].mxu1 }
 0x2c4   :  { %v1743_v59 = vpack.c.bf16 %v1730_v54, %v1800_v55  ;;  %4499 = vmatpush3.bf16.msra.mxu0 %v5002_v25  ;;  %v4732_v47 = vpop.f32.mrb[61].mxu1  ;;  %v1707_v39 = vpack.c.bf16 %v1694_v32, %v1693_v23  ;;  %v1802_v26 = vld [vmem:[#allocation2 + $0x57] sm:$0xff]  ;;  %v6011_v2 = vpack.c.bf16 %v5998_v5, %v5970_v56  ;;  %v1407_v25 = vadd.f32 %v5802_v12, %v5811_v27 }
 0x2c5   :  { %4742 = vmatprep.subr.bf16.mxu0 %v6013_v61  ;;  %1678 = vst [vmem:[#allocation2 + $0x68] sm:$0xff] %v6007_v6  ;;  %v1609_v9 = vadd.f32 %v1608_v11, %v1504_v51  ;;  %v1507_v36 = vadd.f32 %v4318_v63, %v1402_v34  ;;  %v1611_v62 = vpop.f32.mrb[62].mxu1  ;;  %v1815_v55 = vpack.c.bf16 %v1802_v26, %v1730_v54  ;;  %v1944_v57 = vld [vmem:[#allocation2 + $0x51] sm:$0xff] }
 0x2c6   :  { %2737 = vmatprep.mubr.bf16.mxu0 %v1743_v59  ;;  %4569 = vmatpush3.bf16.msra.mxu1 %v5007_v49  ;;  %v4733_v7 = vpop.f32.mrb[63].mxu1  ;;  %v1852_v8 = vpack.c.bf16 %v6007_v6, %v5998_v5  ;;  %v1410_v40 = vadd.f32 %v5804_v20, %v5811_v27  ;;  %v1954_v5 = vld [vmem:[#allocation2 + $0xa1] sm:$0xff] }
 0x2c7   :  { %2738 = vmatmul.mubr.bf16.gmra.mrb[88].mxu0 %v1707_v39  ;;  %4846 = vmatprep.subr.bf16.mxu1 %v6013_v61  ;;  %v1643_v13 = vmax.f32 %v1609_v9, 0.0  ;;  %v1612_v21 = vadd.f32 %v1611_v62, %v1507_v36  ;;  %v4319_v4 = vpop.f32.mrb[64].mxu0 }
 0x2c8   :  { %2842 = vmatprep.mubr.bf16.mxu1 %v1815_v55  ;;  %v4320_v37 = vpop.f32.mrb[65].mxu0 }
 0x2c9   :  { %2843 = vmatmul.mubr.bf16.gmra.mrb[88].mxu1 %v5977_v60  ;;  %v6024_v31 = vmul.f32 %v1643_v13, %v5499_v38  ;;  %v1644_v3 = vmax.f32 %v1612_v21, 0.0  ;;  %v4321_v18 = vadd.f32 %v4320_v37, %v4319_v4  ;;  %v4322_v44 = vpop.f32.mrb[66].mxu0  ;;  %v1695_v38 = vld [vmem:[#allocation2 + $0x56] sm:$0xff]  ;;  %v1415_v21 = vadd.f32 %v5806_v24, %v5811_v27 }
 0x2ca   :  { %v4323_v49 = vpop.f32.mrb[67].mxu0  ;;  %v1732_v34 = vld [vmem:[#allocation2 + $0x5f] sm:$0xff] }
 0x2cb   :  { %v1696_v41 = vld [vmem:[#allocation2 + $0x5e] sm:$0xff]  ;;  %1679 = vst [vmem:[#allocation2 + $0x70] sm:$0xff] %v6024_v31  ;;  %v6030_v54 = vmul.f32 %v1644_v3, %v5504_v43  ;;  %v4324_v32 = vadd.f32 %v4323_v49, %v4322_v44  ;;  %v1512_v63 = vadd.f32 %v4321_v18, %v1407_v25  ;;  %v1616_v12 = vpop.f32.mrb[64].mxu1  ;;  %v1744_v51 = vpack.c.bf16 %v1732_v34, %v1802_v26 }
 0x2cc   :  { %v4736_v11 = vpop.f32.mrb[65].mxu1  ;;  %v1708_v59 = vpack.c.bf16 %v1696_v41, %v1695_v38  ;;  %v1804_v23 = vld [vmem:[#allocation2 + $0x67] sm:$0xff]  ;;  %v6034_v47 = vpack.c.bf16 %v6024_v31, %v6007_v6  ;;  %v1418_v18 = vadd.f32 %v5813_v30, %v5811_v27 }
 0x2cd   :  { %1680 = vst [vmem:[#allocation2 + $0x78] sm:$0xff] %v6030_v54  ;;  %v1617_v20 = vadd.f32 %v1616_v12, %v1512_v63  ;;  %v1515_v39 = vadd.f32 %v4324_v32, %v1410_v40  ;;  %v1619_v9 = vpop.f32.mrb[66].mxu1  ;;  %2745 = vmatprep.mubr.bf16.mxu0 %v1744_v51  ;;  %v1816_v43 = vpack.c.bf16 %v1804_v23, %v1732_v34  ;;  %v1946_v0 = vld [vmem:[#allocation2 + $0x61] sm:$0xff] }
 0x2ce   :  { %v4737_v36 = vpop.f32.mrb[67].mxu1  ;;  %v1853_v26 = vpack.c.bf16 %v6030_v54, %v6024_v31 }
 0x2cf   :  { %2746 = vmatmul.mubr.bf16.gmra.mrb[92].mxu0 %v1708_v59  ;;  %v1645_v62 = vmax.f32 %v1617_v20, 0.0  ;;  %v1620_v55 = vadd.f32 %v1619_v9, %v1515_v39  ;;  %v4325_v7 = vpop.f32.mrb[68].mxu0  ;;  %2850 = vmatprep.mubr.bf16.mxu1 %v1816_v43 }
 0x2d0   :  { %v4326_v13 = vpop.f32.mrb[69].mxu0 }
 0x2d1   :  { %2851 = vmatmul.mubr.bf16.gmra.mrb[92].mxu1 %v6011_v2  ;;  %v6043_v4 = vmul.f32 %v1645_v62, %v5522_v14  ;;  %v1646_v37 = vmax.f32 %v1620_v55, 0.0  ;;  %v4327_v25 = vadd.f32 %v4326_v13, %v4325_v7  ;;  %v4328_v3 = vpop.f32.mrb[70].mxu0  ;;  %v1697_v14 = vld [vmem:[#allocation2 + $0x66] sm:$0xff] }
 0x2d2   :  { %v4329_v44 = vpop.f32.mrb[71].mxu0  ;;  %v1734_v40 = vld [vmem:[#allocation2 + $0x6f] sm:$0xff] }
 0x2d3   :  { %v1698_v49 = vld [vmem:[#allocation2 + $0x6e] sm:$0xff]  ;;  %1681 = vst [vmem:[#allocation2 + $0x80] sm:$0xff] %v6043_v4  ;;  %v6049_v34 = vmul.f32 %v1646_v37, %v5527_v17  ;;  %v4330_v41 = vadd.f32 %v4329_v44, %v4328_v3  ;;  %v1520_v32 = vadd.f32 %v4327_v25, %v1415_v21  ;;  %v1624_v24 = vpop.f32.mrb[68].mxu1  ;;  %v1745_v63 = vpack.c.bf16 %v1734_v40, %v1804_v23 }
 0x2d4   :  { %v4740_v12 = vpop.f32.mrb[69].mxu1  ;;  %v1709_v51 = vpack.c.bf16 %v1698_v49, %v1697_v14  ;;  %v1806_v38 = vld [vmem:[#allocation2 + $0x77] sm:$0xff]  ;;  %v6053_v11 = vpack.c.bf16 %v6043_v4, %v6030_v54  ;;  %v1938_v14 = vld [vmem:[#allocation2 + $0x21] sm:$0xff] }
 0x2d5   :  { %1682 = vst [vmem:[#allocation2 + $0x88] sm:$0xff] %v6049_v34  ;;  %v1625_v27 = vadd.f32 %v1624_v24, %v1520_v32  ;;  %v1523_v30 = vadd.f32 %v4330_v41, %v1418_v18  ;;  %v1627_v59 = vpop.f32.mrb[70].mxu1  ;;  %2753 = vmatprep.mubr.bf16.mxu0 %v1745_v63  ;;  %v1817_v17 = vpack.c.bf16 %v1806_v38, %v1734_v40  ;;  %v1699_v55 = vld [vmem:[#allocation2 + $0x76] sm:$0xff]  ;;  %v1974_v54 = vld [vmem:[#allocation2 + $0x22] sm:$0xff] }
 0x2d6   :  { %v4741_v20 = vpop.f32.mrb[71].mxu1  ;;  %v1854_v23 = vpack.c.bf16 %v6049_v34, %v6043_v4  ;;  %v1865_v63 = vld [vmem:[#allocation2 + $0x11] sm:$0xff] }
 0x2d7   :  { %2754 = vmatmul.mubr.bf16.gmra.mrb[96].mxu0 %v1709_v51  ;;  %v1647_v39 = vmax.f32 %v1625_v27, 0.0  ;;  %v1628_v9 = vadd.f32 %v1627_v59, %v1523_v30  ;;  %2858 = vmatprep.mubr.bf16.mxu1 %v1817_v17  ;;  %v1868_v27 = vld [vmem:[#allocation2 + $0x29] sm:$0xff]  ;;  %v5008_v30 = vld [vmem:[%s6696_s6 + $0x200] sm:$0xff]   ;;  %v1940_v59 = vld [vmem:[#allocation2 + $0x31] sm:$0xff] }
 0x2d8   :  { %v1884_v17 = vpack.c.bf16 %v1868_v27, %v1938_v14  ;;  %v1956_v20 = vpack.c.bf16 %v1940_v59, %v1868_v27  ;;  %v1976_v4 = vld [vmem:[#allocation2 + $0x32] sm:$0xff] }
 0x2d9   :  { %2859 = vmatmul.mubr.bf16.gmra.mrb[96].mxu1 %v6034_v47  ;;  %v6060_v43 = vmul.f32 %v1647_v39, %v5545_v50  ;;  %v1648_v36 = vmax.f32 %v1628_v9, 0.0  ;;  %v5009_v39 = vld [vmem:[%s6696_s6 + $0x208] sm:$0xff]   ;;  %v1870_v9 = vld [vmem:[#allocation2 + $0x39] sm:$0xff] }
 0x2da   :  { %v1736_v62 = vld [vmem:[#allocation2 + $0x7f] sm:$0xff]  ;;  %v1885_v28 = vpack.c.bf16 %v1870_v9, %v1940_v59 }
 0x2db   :  { %v1700_v7 = vld [vmem:[#allocation2 + $0x7e] sm:$0xff]  ;;  %1683 = vst [vmem:[#allocation2 + $0x90] sm:$0xff] %v6060_v43  ;;  %v6064_v13 = vmul.f32 %v1648_v36, %v5550_v53  ;;  %v1746_v21 = vpack.c.bf16 %v1736_v62, %v1806_v38  ;;  %v6068_v25 = vpack.c.bf16 %v6060_v43, %v6049_v34  ;;  %v5010_v36 = vld [vmem:[%s6696_s6 + $0x210] sm:$0xff]  }
 0x2dc   :  { %v1710_v37 = vpack.c.bf16 %v1700_v7, %v1699_v55  ;;  %v1808_v3 = vld [vmem:[#allocation2 + $0x87] sm:$0xff]  ;;  %v1866_v53 = vld [vmem:[#allocation2 + $0x19] sm:$0xff] }
 0x2dd   :  { %1684 = vst [vmem:[#allocation2 + $0x98] sm:$0xff] %v6064_v13  ;;  %2761 = vmatprep.mubr.bf16.mxu0 %v1746_v21  ;;  %v1818_v50 = vpack.c.bf16 %v1808_v3, %v1736_v62  ;;  %v1855_v18 = vpack.c.bf16 %v6064_v13, %v6060_v43  ;;  %v1701_v40 = vld [vmem:[#allocation2 + $0x86] sm:$0xff]  ;;  %v1883_v51 = vpack.c.bf16 %v1866_v53, %v1865_v63  ;;  %v1874_v7 = vld [vmem:[#allocation2 + $0x59] sm:$0xff]  ;;  %v5014_v21 = vld [vmem:[%s6696_s6 + $0x230] sm:$0xff]  }
 0x2de   :  { %v1955_v38 = vpack.c.bf16 %v1938_v14, %v1866_v53  ;;  %v1872_v62 = vld [vmem:[#allocation2 + $0x49] sm:$0xff]  ;;  %v5012_v55 = vld [vmem:[%s6696_s6 + $0x220] sm:$0xff]   ;;  %v1887_v35 = vpack.c.bf16 %v1874_v7, %v1944_v57  ;;  %v1927_v31 = vpack.c.bf16 %v6013_v61, %v6064_v13  ;;  %v1984_v14 = vld [vmem:[#allocation2 + $0x72] sm:$0xff] }
 0x2df   :  { %2762 = vmatmul.mubr.bf16.gmra.mrb[100].mxu0 %v1710_v37  ;;  %2866 = vmatprep.mubr.bf16.mxu1 %v1818_v50  ;;  %v1886_v16 = vpack.c.bf16 %v1872_v62, %v1942_v15  ;;  %v1876_v37 = vld [vmem:[#allocation2 + $0x69] sm:$0xff]  ;;  %v1878_v48 = vld [vmem:[#allocation2 + $0x79] sm:$0xff] }
 0x2e0   :  { %v1888_v50 = vpack.c.bf16 %v1876_v37, %v1946_v0  ;;  %v1975_v34 = vld [vmem:[#allocation2 + $0x2a] sm:$0xff]  ;;  %v1977_v43 = vld [vmem:[#allocation2 + $0x3a] sm:$0xff]  ;;  %v1986_v27 = vld [vmem:[#allocation2 + $0x82] sm:$0xff] }
 0x2e1   :  { %2867 = vmatmul.mubr.bf16.gmra.mrb[100].mxu1 %v6053_v11  ;;  %v5017_v63 = vld [vmem:[%s6698_s8 + $0x8] sm:$0xff]  }
 0x2e2   :  { %v1738_v44 = vld [vmem:[#allocation2 + $0x8f] sm:$0xff] }
 0x2e3   :  { %v1702_v49 = vld [vmem:[#allocation2 + $0x8e] sm:$0xff]  ;;  %v1747_v41 = vpack.c.bf16 %v1738_v44, %v1808_v3 }
 0x2e4   :  { %v1711_v32 = vpack.c.bf16 %v1702_v49, %v1701_v40  ;;  %v1810_v24 = vld [vmem:[#allocation2 + $0x97] sm:$0xff]  ;;  %v5016_v49 = vld [vmem:[%s6698_s8] sm:$0xff]  }
 0x2e5   :  { %2769 = vmatprep.mubr.bf16.mxu0 %v1747_v41  ;;  %v1819_v12 = vpack.c.bf16 %v1810_v24, %v1738_v44  ;;  %v1948_v3 = vld [vmem:[#allocation2 + $0x71] sm:$0xff]  ;;  %v1880_v44 = vld [vmem:[#allocation2 + $0x89] sm:$0xff] }
 0x2e6   :  { %v1960_v19 = vpack.c.bf16 %v1948_v3, %v1876_v37  ;;  %v1952_v22 = vld [vmem:[#allocation2 + $0x91] sm:$0xff]  ;;  %v1982_v41 = vld [vmem:[#allocation2 + $0x62] sm:$0xff] }
 0x2e7   :  { %2770 = vmatmul.mubr.bf16.gmra.mrb[104].mxu0 %v1711_v32  ;;  %2874 = vmatprep.mubr.bf16.mxu1 %v1819_v12  ;;  %v1981_v32 = vld [vmem:[#allocation2 + $0x5a] sm:$0xff]  ;;  %v1983_v12 = vld [vmem:[#allocation2 + $0x6a] sm:$0xff] }
 0x2e8   :  { %2915 = vmatprep.mubr.bf16.mxu0 %v1883_v51  ;;  %v1995_v24 = vpack.c.bf16 %v1982_v41, %v1981_v32  ;;  %v1996_v51 = vpack.c.bf16 %v1984_v14, %v1983_v12 }
 0x2e9   :  { %2875 = vmatmul.mubr.bf16.gmra.mrb[104].mxu1 %v6068_v25 }
 0x2ea   :  { %3020 = vmatprep.mubr.bf16.mxu1 %v1955_v38  ;;  %v5018_v38 = vld [vmem:[%s6698_s8 + $0x10] sm:$0xff]  }
 0x2ef   :  { %2916 = vmatmul.mubr.bf16.vlgmr.msra.gmra.mrb[108].mxu0 %v1847_v45  ;;  %v1957_v45 = vpack.c.bf16 %v1942_v15, %v1870_v9  ;;  %v1989_v15 = vld [vmem:[#allocation2 + $0x9a] sm:$0xff] }
 0x2f0   :  { %4743 = vmatpush3.bf16.msra.mxu0 %v5008_v30  ;;  %2923 = vmatprep.mubr.bf16.mxu0 %v1884_v17  ;;  %v1985_v30 = vld [vmem:[#allocation2 + $0x7a] sm:$0xff] }
 0x2f1   :  { %3021 = vmatmul.mubr.bf16.vlgmr.msra.gmra.mrb[108].mxu1 %v5850_v33  ;;  %4744 = vmatprep.subr.bf16.mxu0 %v6013_v61  ;;  %v5011_v33 = vld [vmem:[%s6696_s6 + $0x218] sm:$0xff]   ;;  %v1997_v59 = vpack.c.bf16 %v1986_v27, %v1985_v30 }
 0x2f2   :  { %3028 = vmatprep.mubr.bf16.mxu1 %v1956_v20  ;;  %4854 = vmatpush3.bf16.msra.mxu1 %v5016_v49  ;;  %v5019_v17 = vld [vmem:[%s6698_s8 + $0x18] sm:$0xff]  }
 0x2f3   :  { %4847 = vmatprep.subr.bf16.mxu1 %v6013_v61  ;;  %v1988_v20 = vld [vmem:[#allocation2 + $0x92] sm:$0xff] }
 0x2f4   :  { %4745 = vmatpush3.bf16.msra.mxu0 %v5009_v39  ;;  %v1987_v39 = vld [vmem:[#allocation2 + $0x8a] sm:$0xff] }
 0x2f5   :  { %4746 = vmatprep.subr.bf16.mxu0 %v6013_v61  ;;  %v1998_v9 = vpack.c.bf16 %v1988_v20, %v1987_v39 }
 0x2f6   :  { %4855 = vmatpush3.bf16.msra.mxu1 %v5017_v63 }
 0x2f7   :  { %2924 = vmatmul.mubr.bf16.gmra.mrb[112].mxu0 %v1848_v46  ;;  %v1958_v46 = vpack.c.bf16 %v1944_v57, %v1872_v62  ;;  %4848 = vmatprep.subr.bf16.mxu1 %v6013_v61 }
 0x2f8   :  { %2931 = vmatprep.mubr.bf16.mxu0 %v1885_v28  ;;  %4747 = vmatpush3.bf16.msra.mxu0 %v5010_v36  ;;  %v5020_v36 = vld [vmem:[%s6698_s8 + $0x20] sm:$0xff]  }
 0x2f9   :  { %3029 = vmatmul.mubr.bf16.gmra.mrb[112].mxu1 %v5891_v42  ;;  %4748 = vmatprep.subr.bf16.mxu0 %v6013_v61  ;;  %v5013_v42 = vld [vmem:[%s6696_s6 + $0x228] sm:$0xff]  }
 0x2fa   :  { %3036 = vmatprep.mubr.bf16.mxu1 %v1957_v45  ;;  %4856 = vmatpush3.bf16.msra.mxu1 %v5018_v38  ;;  %v1990_v28 = vld [vmem:[#allocation2 + $0xa2] sm:$0xff] }
 0x2fb   :  { %4849 = vmatprep.subr.bf16.mxu1 %v6013_v61  ;;  %v1999_v45 = vpack.c.bf16 %v1990_v28, %v1989_v15 }
 0x2fc   :  { %4749 = vmatpush3.bf16.msra.mxu0 %v5011_v33  ;;  %v5021_v33 = vld [vmem:[%s6698_s8 + $0x28] sm:$0xff]  }
 0x2fd   :  { %4750 = vmatprep.subr.bf16.mxu0 %v6013_v61 }
 0x2fe   :  { %4857 = vmatpush3.bf16.msra.mxu1 %v5019_v17 }
 0x2ff   :  { %2932 = vmatmul.mubr.bf16.gmra.mrb[116].mxu0 %v1849_v58  ;;  %v1959_v58 = vpack.c.bf16 %v1946_v0, %v1874_v7  ;;  %4850 = vmatprep.subr.bf16.mxu1 %v6013_v61 }
 0x300   :  { %2939 = vmatprep.mubr.bf16.mxu0 %v1886_v16  ;;  %4751 = vmatpush3.bf16.msra.mxu0 %v5012_v55  ;;  %v6197_v55 = vld [vmem:[%s6697_s7] ss:$0 sm:$0xff] }
 0x301   :  { %3037 = vmatmul.mubr.bf16.gmra.mrb[116].mxu1 %v5934_v52  ;;  %4752 = vmatprep.subr.bf16.mxu0 %v6013_v61  ;;  %v5015_v52 = vld [vmem:[%s6696_s6 + $0x238] sm:$0xff]  }
 0x302   :  { %3044 = vmatprep.mubr.bf16.mxu1 %v1958_v46  ;;  %4858 = vmatpush3.bf16.msra.mxu1 %v5020_v36 }
 0x303   :  { %4851 = vmatprep.subr.bf16.mxu1 %v6013_v61 }
 0x304   :  { %4753 = vmatpush3.bf16.msra.mxu0 %v5013_v42 }
 0x305   :  { %4754 = vmatprep.subr.bf16.mxu0 %v6013_v61 }
 0x306   :  { %4859 = vmatpush3.bf16.msra.mxu1 %v5021_v33 }
 0x307   :  { %2940 = vmatmul.mubr.bf16.gmra.mrb[120].mxu0 %v1850_v1  ;;  %v1950_v1 = vld [vmem:[#allocation2 + $0x81] sm:$0xff]  ;;  %4852 = vmatprep.subr.bf16.mxu1 %v6013_v61 }
 0x308   :  { %2947 = vmatprep.mubr.bf16.mxu0 %v1887_v35  ;;  %4755 = vmatpush3.bf16.msra.mxu0 %v5014_v21  ;;  %v1961_v53 = vpack.c.bf16 %v1950_v1, %v1878_v48  ;;  %v1890_v56 = vpack.c.bf16 %v1880_v44, %v1950_v1 }
 0x309   :  { %3045 = vmatmul.mubr.bf16.gmra.mrb[120].mxu1 %v5977_v60  ;;  %4756 = vmatprep.subr.bf16.mxu0 %v6013_v61  ;;  %v1889_v60 = vpack.c.bf16 %v1878_v48, %v1948_v3  ;;  %v5022_v48 = vld [vmem:[%s6698_s8 + $0x30] sm:$0xff]  }
 0x30a   :  { %3052 = vmatprep.mubr.bf16.mxu1 %v1959_v58  ;;  %4860 = vmatpush3.bf16.msra.mxu1 %v5022_v48 }
 0x30b   :  { %4853 = vmatprep.subr.bf16.mxu1 %v6013_v61 }
 0x30c   :  { %4757 = vmatpush3.bf16.msra.mxu0 %v5015_v52 }
 0x30d   :  { %4794 = vmatprep.subr.bf16.mxu0 %v6013_v61 }
 0x30f   :  { %2948 = vmatmul.mubr.bf16.gmra.mrb[124].mxu0 %v1851_v29  ;;  %v1962_v29 = vpack.c.bf16 %v1952_v22, %v1880_v44 }
 0x310   :  { %2955 = vmatprep.mubr.bf16.mxu0 %v1888_v50 }
 0x311   :  { %3053 = vmatmul.mubr.bf16.gmra.mrb[124].mxu1 %v6011_v2  ;;  %v1882_v2 = vld [vmem:[#allocation2 + $0x99] sm:$0xff] }
 0x312   :  { %3060 = vmatprep.mubr.bf16.mxu1 %v1960_v19  ;;  %v1891_v6 = vpack.c.bf16 %v1882_v2, %v1952_v22 }
 0x317   :  { %2956 = vmatmul.mubr.bf16.gmra.mrb[128].mxu0 %v1852_v8  ;;  %v1963_v8 = vpack.c.bf16 %v1954_v5, %v1882_v2 }
 0x318   :  { %2963 = vmatprep.mubr.bf16.mxu0 %v1889_v60 }
 0x319   :  { %3061 = vmatmul.mubr.bf16.gmra.mrb[128].mxu1 %v6034_v47  ;;  %v1973_v47 = vld [vmem:[#allocation2 + $0x1a] sm:$0xff] }
 0x31a   :  { %3068 = vmatprep.mubr.bf16.mxu1 %v1961_v53 }
 0x31f   :  { %2964 = vmatmul.mubr.bf16.gmra.mrb[132].mxu0 %v1853_v26  ;;  %v1991_v26 = vpack.c.bf16 %v1974_v54, %v1973_v47 }
 0x320   :  { %2971 = vmatprep.mubr.bf16.mxu0 %v1890_v56 }
 0x321   :  { %3069 = vmatmul.mubr.bf16.gmra.mrb[132].mxu1 %v6053_v11  ;;  %v1992_v11 = vpack.c.bf16 %v1976_v4, %v1975_v34 }
 0x322   :  { %3076 = vmatprep.mubr.bf16.mxu1 %v1962_v29 }
 0x327   :  { %2972 = vmatmul.mubr.bf16.gmra.mrb[136].mxu0 %v1854_v23  ;;  %v1978_v23 = vld [vmem:[#allocation2 + $0x42] sm:$0xff] }
 0x328   :  { %2979 = vmatprep.mubr.bf16.mxu0 %v1891_v6  ;;  %v1993_v13 = vpack.c.bf16 %v1978_v23, %v1977_v43 }
 0x329   :  { %3077 = vmatmul.mubr.bf16.gmra.mrb[136].mxu1 %v6068_v25  ;;  %v1980_v25 = vld [vmem:[#allocation2 + $0x52] sm:$0xff] }
 0x32a   :  { %3084 = vmatprep.mubr.bf16.mxu1 %v1963_v8 }
 0x32f   :  { %2980 = vmatmul.mubr.bf16.gmra.mrb[140].mxu0 %v1855_v18  ;;  %v1979_v18 = vld [vmem:[#allocation2 + $0x4a] sm:$0xff] }
 0x330   :  { %4758 = vmatprep.mubr.msk.bf16.mxu0 %vm5065_vm2, %v6013_v61  ;;  %v1994_v40 = vpack.c.bf16 %v1980_v25, %v1979_v18 }
 0x331   :  { %3085 = vmatmul.mubr.bf16.gmra.mrb[140].mxu1 %v1927_v31 }
 0x332   :  { %4814 = vmatprep.mubr.msk.bf16.mxu1 %vm5065_vm2, %v6013_v61 }
 0x337   :  { %4759 = vmatmul.mubr.bf16.vlgmr.msra.gmra.mrb[144].mxu0 %v1991_v26 }
 0x338   :  { %4762 = vmatprep.mubr.msk.bf16.mxu0 %vm5065_vm2, %v6013_v61  ;;  %4795 = vmatpush3.bf16.msra.mxu0 %v5016_v49 }
 0x339   :  { %4796 = vmatprep.subr.bf16.mxu0 %v6013_v61 }
 0x33c   :  { %4797 = vmatpush3.bf16.msra.mxu0 %v5017_v63 }
 0x33d   :  { %4798 = vmatprep.subr.bf16.mxu0 %v6013_v61 }
 0x33f   :  { %4763 = vmatmul.mubr.bf16.gmra.mrb[148].mxu0 %v1992_v11 }
 0x340   :  { %4766 = vmatprep.mubr.msk.bf16.mxu0 %vm5065_vm2, %v6013_v61  ;;  %4799 = vmatpush3.bf16.msra.mxu0 %v5018_v38 }
 0x341   :  { %4800 = vmatprep.subr.bf16.mxu0 %v6013_v61 }
 0x344   :  { %4801 = vmatpush3.bf16.msra.mxu0 %v5019_v17 }
 0x345   :  { %4802 = vmatprep.subr.bf16.mxu0 %v6013_v61 }
 0x347   :  { %4767 = vmatmul.mubr.bf16.gmra.mrb[152].mxu0 %v1993_v13 }
 0x348   :  { %4770 = vmatprep.mubr.msk.bf16.mxu0 %vm5065_vm2, %v6013_v61  ;;  %4803 = vmatpush3.bf16.msra.mxu0 %v5020_v36 }
 0x349   :  { %4804 = vmatprep.subr.bf16.mxu0 %v6013_v61 }
 0x34c   :  { %4805 = vmatpush3.bf16.msra.mxu0 %v5021_v33 }
 0x34d   :  { %4806 = vmatprep.subr.bf16.mxu0 %v6013_v61 }
 0x34f   :  { %4771 = vmatmul.mubr.bf16.gmra.mrb[156].mxu0 %v1994_v40  ;;  %v5023_v40 = vld [vmem:[%s6698_s8 + $0x38] sm:$0xff]  }
 0x350   :  { %4774 = vmatprep.mubr.msk.bf16.mxu0 %vm5065_vm2, %v6013_v61  ;;  %4807 = vmatpush3.bf16.msra.mxu0 %v5022_v48 }
 0x351   :  { %4808 = vmatprep.subr.bf16.mxu0 %v6013_v61  ;;  %4861 = vmatpush3.bf16.msra.mxu1 %v5023_v40 }
 0x354   :  { %4809 = vmatpush3.bf16.msra.mxu0 %v5023_v40 }
 0x357   :  { %4775 = vmatmul.mubr.bf16.gmra.mrb[160].mxu0 %v1995_v24 }
 0x358   :  { %4778 = vmatprep.mubr.msk.bf16.mxu0 %vm5065_vm2, %v6013_v61 }
 0x35f   :  { %4779 = vmatmul.mubr.bf16.gmra.mrb[164].mxu0 %v1996_v51 }
 0x360   :  { %4782 = vmatprep.mubr.msk.bf16.mxu0 %vm5065_vm2, %v6013_v61 }
 0x367   :  { %4783 = vmatmul.mubr.bf16.gmra.mrb[168].mxu0 %v1997_v59 }
 0x368   :  { %4786 = vmatprep.mubr.msk.bf16.mxu0 %vm5065_vm2, %v6013_v61 }
 0x36f   :  { %4787 = vmatmul.mubr.bf16.gmra.mrb[172].mxu0 %v1998_v9 }
 0x370   :  { %4790 = vmatprep.mubr.msk.bf16.mxu0 %vm5065_vm2, %v6013_v61 }
 0x377   :  { %4791 = vmatmul.mubr.bf16.gmra.mrb[176].mxu0 %v1999_v45 }
 0x378   :  { %4810 = vmatprep.mubr.msk.bf16.mxu0 %vm5065_vm2, %v6013_v61 }
 0x379   :  { %v4360_v62 = vpop.f32.mrb[72].mxu0 }
 0x37a   :  { %v4361_v57 = vpop.f32.mrb[73].mxu0 }
 0x37b   :  { %v4362_v16 = vadd.f32 %v4361_v57, %v4360_v62  ;;  %v4363_v46 = vpop.f32.mrb[74].mxu0  ;;  %v4430_v42 = vpop.f32.mrb[72].mxu1 }
 0x37c   :  { %v4364_v7 = vpop.f32.mrb[75].mxu0  ;;  %v4431_v21 = vpop.f32.mrb[73].mxu1 }
 0x37d   :  { %v2708_v0 = vadd.f32 %v4362_v16, %v6197_v55  ;;  %v4365_v35 = vadd.f32 %v4364_v7, %v4363_v46  ;;  %v4432_v58 = vadd.f32 %v4431_v21, %v4430_v42  ;;  %v4433_v52 = vpop.f32.mrb[74].mxu1 }
 0x37e   :  { %v4434_v37 = vpop.f32.mrb[75].mxu1 }
 0x37f   :  { %v2711_v3 = vadd.f32 %v4365_v35, %v6197_v55  ;;  %v6203_v50 = vadd.f32 %v4432_v58, %v2708_v0  ;;  %v4435_v19 = vadd.f32 %v4434_v37, %v4433_v52 }
 0x381   :  { %v6208_v1 = vadd.f32 %v4435_v19, %v2711_v3  ;;  %v4366_v60 = vpop.f32.mrb[76].mxu0 }
 0x382   :  { %v4367_v53 = vpop.f32.mrb[77].mxu0 }
 0x383   :  { %v4368_v44 = vadd.f32 %v4367_v53, %v4366_v60  ;;  %v4369_v22 = vpop.f32.mrb[78].mxu0 }
 0x384   :  { %v4436_v56 = vpop.f32.mrb[76].mxu1  ;;  %v4370_v29 = vpop.f32.mrb[79].mxu0 }
 0x385   :  { %v4437_v2 = vpop.f32.mrb[77].mxu1  ;;  %v2716_v5 = vadd.f32 %v4368_v44, %v6197_v55  ;;  %v4371_v6 = vadd.f32 %v4370_v29, %v4369_v22 }
 0x386   :  { %v4438_v8 = vadd.f32 %v4437_v2, %v4436_v56  ;;  %v4439_v31 = vpop.f32.mrb[78].mxu1 }
 0x387   :  { %v4440_v54 = vpop.f32.mrb[79].mxu1  ;;  %v2719_v47 = vadd.f32 %v4371_v6, %v6197_v55 }
 0x388   :  { %v6214_v26 = vadd.f32 %v4438_v8, %v2716_v5  ;;  %v4441_v4 = vadd.f32 %v4440_v54, %v4439_v31 }
 0x38a   :  { %v6216_v34 = vadd.f32 %v4441_v4, %v2719_v47  ;;  %v4372_v11 = vpop.f32.mrb[80].mxu0 }
 0x38b   :  { %v4373_v61 = vpop.f32.mrb[81].mxu0 }
 0x38c   :  { %v4374_v23 = vadd.f32 %v4373_v61, %v4372_v11  ;;  %v4375_v43 = vpop.f32.mrb[82].mxu0  ;;  %v4442_v13 = vpop.f32.mrb[80].mxu1 }
 0x38d   :  { %v4376_v25 = vpop.f32.mrb[83].mxu0  ;;  %v4443_v18 = vpop.f32.mrb[81].mxu1 }
 0x38e   :  { %v2724_v49 = vadd.f32 %v4374_v23, %v6197_v55  ;;  %v4377_v41 = vadd.f32 %v4376_v25, %v4375_v43  ;;  %v4444_v32 = vadd.f32 %v4443_v18, %v4442_v13  ;;  %v4445_v24 = vpop.f32.mrb[82].mxu1 }
 0x38f   :  { %v4446_v63 = vpop.f32.mrb[83].mxu1 }
 0x390   :  { %v2727_v14 = vadd.f32 %v4377_v41, %v6197_v55  ;;  %v6223_v12 = vadd.f32 %v4444_v32, %v2724_v49  ;;  %v4447_v51 = vadd.f32 %v4446_v63, %v4445_v24 }
 0x392   :  { %v6225_v38 = vadd.f32 %v4447_v51, %v2727_v14  ;;  %v4378_v27 = vpop.f32.mrb[84].mxu0 }
 0x393   :  { %v4379_v30 = vpop.f32.mrb[85].mxu0 }
 0x394   :  { %v4380_v59 = vadd.f32 %v4379_v30, %v4378_v27  ;;  %v4381_v17 = vpop.f32.mrb[86].mxu0  ;;  %v4448_v20 = vpop.f32.mrb[84].mxu1 }
 0x395   :  { %v4382_v39 = vpop.f32.mrb[87].mxu0  ;;  %v4449_v9 = vpop.f32.mrb[85].mxu1 }
 0x396   :  { %v2732_v36 = vadd.f32 %v4380_v59, %v6197_v55  ;;  %v4383_v15 = vadd.f32 %v4382_v39, %v4381_v17  ;;  %v4450_v28 = vadd.f32 %v4449_v9, %v4448_v20  ;;  %v4451_v45 = vpop.f32.mrb[86].mxu1 }
 0x397   :  { %v4452_v33 = vpop.f32.mrb[87].mxu1 }
 0x398   :  { %v2735_v62 = vadd.f32 %v4383_v15, %v6197_v55  ;;  %v6229_v57 = vadd.f32 %v4450_v28, %v2732_v36  ;;  %v4453_v16 = vadd.f32 %v4452_v33, %v4451_v45 }
 0x39a   :  { %v6231_v46 = vadd.f32 %v4453_v16, %v2735_v62  ;;  %v4384_v42 = vpop.f32.mrb[88].mxu0 }
 0x39b   :  { %v4385_v7 = vpop.f32.mrb[89].mxu0 }
 0x39c   :  { %v4386_v21 = vadd.f32 %v4385_v7, %v4384_v42  ;;  %v4387_v0 = vpop.f32.mrb[90].mxu0  ;;  %v4454_v35 = vpop.f32.mrb[88].mxu1 }
 0x39d   :  { %v4388_v58 = vpop.f32.mrb[91].mxu0  ;;  %v4455_v52 = vpop.f32.mrb[89].mxu1 }
 0x39e   :  { %v2740_v37 = vadd.f32 %v4386_v21, %v6197_v55  ;;  %v4389_v3 = vadd.f32 %v4388_v58, %v4387_v0  ;;  %v4456_v19 = vadd.f32 %v4455_v52, %v4454_v35  ;;  %v4457_v48 = vpop.f32.mrb[90].mxu1 }
 0x39f   :  { %v4458_v60 = vpop.f32.mrb[91].mxu1 }
 0x3a0   :  { %v2743_v53 = vadd.f32 %v4389_v3, %v6197_v55  ;;  %v6235_v44 = vadd.f32 %v4456_v19, %v2740_v37  ;;  %v4459_v22 = vadd.f32 %v4458_v60, %v4457_v48 }
 0x3a2   :  { %v6237_v56 = vadd.f32 %v4459_v22, %v2743_v53  ;;  %v4390_v29 = vpop.f32.mrb[92].mxu0 }
 0x3a3   :  { %v4391_v2 = vpop.f32.mrb[93].mxu0 }
 0x3a4   :  { %v4392_v5 = vadd.f32 %v4391_v2, %v4390_v29  ;;  %v4393_v6 = vpop.f32.mrb[94].mxu0  ;;  %v4460_v8 = vpop.f32.mrb[92].mxu1 }
 0x3a5   :  { %v4394_v31 = vpop.f32.mrb[95].mxu0  ;;  %v4461_v54 = vpop.f32.mrb[93].mxu1 }
 0x3a6   :  { %v2748_v47 = vadd.f32 %v4392_v5, %v6197_v55  ;;  %v4395_v4 = vadd.f32 %v4394_v31, %v4393_v6  ;;  %v4462_v11 = vadd.f32 %v4461_v54, %v4460_v8  ;;  %v4463_v61 = vpop.f32.mrb[94].mxu1 }
 0x3a7   :  { %v4464_v23 = vpop.f32.mrb[95].mxu1 }
 0x3a8   :  { %v2751_v43 = vadd.f32 %v4395_v4, %v6197_v55  ;;  %v6241_v13 = vadd.f32 %v4462_v11, %v2748_v47  ;;  %v4465_v25 = vadd.f32 %v4464_v23, %v4463_v61 }
 0x3aa   :  { %v6243_v18 = vadd.f32 %v4465_v25, %v2751_v43  ;;  %v4396_v40 = vpop.f32.mrb[96].mxu0 }
 0x3ab   :  { %v4397_v49 = vpop.f32.mrb[97].mxu0 }
 0x3ac   :  { %v4398_v41 = vadd.f32 %v4397_v49, %v4396_v40  ;;  %v4399_v32 = vpop.f32.mrb[98].mxu0  ;;  %v4466_v24 = vpop.f32.mrb[96].mxu1 }
 0x3ad   :  { %v4400_v63 = vpop.f32.mrb[99].mxu0  ;;  %v4467_v14 = vpop.f32.mrb[97].mxu1 }
 0x3ae   :  { %v2756_v51 = vadd.f32 %v4398_v41, %v6197_v55  ;;  %v4401_v27 = vadd.f32 %v4400_v63, %v4399_v32  ;;  %v4468_v30 = vadd.f32 %v4467_v14, %v4466_v24  ;;  %v4469_v59 = vpop.f32.mrb[98].mxu1 }
 0x3af   :  { %v4470_v17 = vpop.f32.mrb[99].mxu1 }
 0x3b0   :  { %v2759_v20 = vadd.f32 %v4401_v27, %v6197_v55  ;;  %v6247_v39 = vadd.f32 %v4468_v30, %v2756_v51  ;;  %v4471_v9 = vadd.f32 %v4470_v17, %v4469_v59 }
 0x3b2   :  { %v6249_v36 = vadd.f32 %v4471_v9, %v2759_v20  ;;  %v4402_v15 = vpop.f32.mrb[100].mxu0 }
 0x3b3   :  { %v4403_v28 = vpop.f32.mrb[101].mxu0 }
 0x3b4   :  { %v4404_v45 = vadd.f32 %v4403_v28, %v4402_v15  ;;  %v4405_v33 = vpop.f32.mrb[102].mxu0  ;;  %v4472_v62 = vpop.f32.mrb[100].mxu1 }
 0x3b5   :  { %v4406_v16 = vpop.f32.mrb[103].mxu0  ;;  %v4473_v42 = vpop.f32.mrb[101].mxu1 }
 0x3b6   :  { %v2764_v7 = vadd.f32 %v4404_v45, %v6197_v55  ;;  %v4407_v21 = vadd.f32 %v4406_v16, %v4405_v33  ;;  %v4474_v0 = vadd.f32 %v4473_v42, %v4472_v62  ;;  %v4475_v35 = vpop.f32.mrb[102].mxu1 }
 0x3b7   :  { %v4476_v58 = vpop.f32.mrb[103].mxu1 }
 0x3b8   :  { %v2767_v52 = vadd.f32 %v4407_v21, %v6197_v55  ;;  %v6253_v37 = vadd.f32 %v4474_v0, %v2764_v7  ;;  %v4477_v3 = vadd.f32 %v4476_v58, %v4475_v35 }
 0x3ba   :  { %v6255_v19 = vadd.f32 %v4477_v3, %v2767_v52  ;;  %v4408_v48 = vpop.f32.mrb[104].mxu0 }
 0x3bb   :  { %v4409_v60 = vpop.f32.mrb[105].mxu0 }
 0x3bc   :  { %v4410_v53 = vadd.f32 %v4409_v60, %v4408_v48  ;;  %v4411_v22 = vpop.f32.mrb[106].mxu0  ;;  %v4478_v29 = vpop.f32.mrb[104].mxu1 }
 0x3bd   :  { %v4412_v2 = vpop.f32.mrb[107].mxu0  ;;  %v4479_v5 = vpop.f32.mrb[105].mxu1 }
 0x3be   :  { %v2772_v6 = vadd.f32 %v4410_v53, %v6197_v55  ;;  %v4413_v8 = vadd.f32 %v4412_v2, %v4411_v22  ;;  %v4480_v31 = vadd.f32 %v4479_v5, %v4478_v29  ;;  %v4481_v54 = vpop.f32.mrb[106].mxu1 }
 0x3bf   :  { %v4482_v47 = vpop.f32.mrb[107].mxu1 }
 0x3c0   :  { %v2775_v4 = vadd.f32 %v4413_v8, %v6197_v55  ;;  %v6259_v11 = vadd.f32 %v4480_v31, %v2772_v6  ;;  %v4483_v61 = vadd.f32 %v4482_v47, %v4481_v54 }
 0x3c2   :  { %v6261_v23 = vadd.f32 %v4483_v61, %v2775_v4  ;;  %v4500_v43 = vpop.f32.mrb[108].mxu0 }
 0x3c3   :  { %v4501_v25 = vpop.f32.mrb[109].mxu0 }
 0x3c4   :  { %v4502_v40 = vadd.f32 %v4501_v25, %v4500_v43  ;;  %v4503_v49 = vpop.f32.mrb[110].mxu0  ;;  %v4570_v41 = vpop.f32.mrb[108].mxu1 }
 0x3c5   :  { %v4504_v32 = vpop.f32.mrb[111].mxu0  ;;  %v4571_v24 = vpop.f32.mrb[109].mxu1 }
 0x3c6   :  { %v2918_v63 = vadd.f32 %v4502_v40, %v6203_v50  ;;  %v4505_v14 = vadd.f32 %v4504_v32, %v4503_v49  ;;  %v4572_v51 = vadd.f32 %v4571_v24, %v4570_v41  ;;  %v4573_v27 = vpop.f32.mrb[110].mxu1 }
 0x3c7   :  { %v4574_v30 = vpop.f32.mrb[111].mxu1 }
 0x3c8   :  { %v2921_v55 = vadd.f32 %v4505_v14, %v6208_v1  ;;  %v4575_v59 = vadd.f32 %v4574_v30, %v4573_v27  ;;  %v6265_v17 = vadd.f32 %v4572_v51, %v2918_v63 }
 0x3ca   :  { %v4506_v20 = vpop.f32.mrb[112].mxu0  ;;  %v6267_v9 = vadd.f32 %v4575_v59, %v2921_v55 }
 0x3cb   :  { %v4507_v15 = vpop.f32.mrb[113].mxu0 }
 0x3cc   :  { %v4508_v28 = vadd.f32 %v4507_v15, %v4506_v20  ;;  %v4509_v45 = vpop.f32.mrb[114].mxu0  ;;  %v4576_v33 = vpop.f32.mrb[112].mxu1 }
 0x3cd   :  { %v4510_v62 = vpop.f32.mrb[115].mxu0  ;;  %v4577_v16 = vpop.f32.mrb[113].mxu1 }
 0x3ce   :  { %v2926_v50 = vadd.f32 %v4508_v28, %v6214_v26  ;;  %v4511_v42 = vadd.f32 %v4510_v62, %v4509_v45  ;;  %v4578_v7 = vadd.f32 %v4577_v16, %v4576_v33  ;;  %v4579_v21 = vpop.f32.mrb[114].mxu1 }
 0x3cf   :  { %v4580_v0 = vpop.f32.mrb[115].mxu1 }
 0x3d0   :  { %v2929_v1 = vadd.f32 %v4511_v42, %v6216_v34  ;;  %v4581_v35 = vadd.f32 %v4580_v0, %v4579_v21  ;;  %v6271_v58 = vadd.f32 %v4578_v7, %v2926_v50 }
 0x3d2   :  { %v4512_v52 = vpop.f32.mrb[116].mxu0  ;;  %v6273_v3 = vadd.f32 %v4581_v35, %v2929_v1 }
 0x3d3   :  { %v4513_v48 = vpop.f32.mrb[117].mxu0 }
 0x3d4   :  { %v4514_v60 = vadd.f32 %v4513_v48, %v4512_v52  ;;  %v4515_v53 = vpop.f32.mrb[118].mxu0  ;;  %v4582_v22 = vpop.f32.mrb[116].mxu1 }
 0x3d5   :  { %v4516_v29 = vpop.f32.mrb[119].mxu0  ;;  %v4583_v2 = vpop.f32.mrb[117].mxu1 }
 0x3d6   :  { %v2934_v26 = vadd.f32 %v4514_v60, %v6223_v12  ;;  %v4517_v5 = vadd.f32 %v4516_v29, %v4515_v53  ;;  %v4584_v6 = vadd.f32 %v4583_v2, %v4582_v22  ;;  %v4585_v8 = vpop.f32.mrb[118].mxu1 }
 0x3d7   :  { %v4586_v31 = vpop.f32.mrb[119].mxu1 }
 0x3d8   :  { %v2937_v34 = vadd.f32 %v4517_v5, %v6225_v38  ;;  %v4587_v54 = vadd.f32 %v4586_v31, %v4585_v8  ;;  %v6277_v47 = vadd.f32 %v4584_v6, %v2934_v26 }
 0x3da   :  { %v4518_v4 = vpop.f32.mrb[120].mxu0  ;;  %v6279_v61 = vadd.f32 %v4587_v54, %v2937_v34 }
 0x3db   :  { %v4519_v43 = vpop.f32.mrb[121].mxu0 }
 0x3dc   :  { %v4520_v25 = vadd.f32 %v4519_v43, %v4518_v4  ;;  %v4521_v40 = vpop.f32.mrb[122].mxu0  ;;  %v4588_v49 = vpop.f32.mrb[120].mxu1 }
 0x3dd   :  { %v4522_v41 = vpop.f32.mrb[123].mxu0  ;;  %v4589_v32 = vpop.f32.mrb[121].mxu1 }
 0x3de   :  { %v2942_v12 = vadd.f32 %v4520_v25, %v6229_v57  ;;  %v4523_v24 = vadd.f32 %v4522_v41, %v4521_v40  ;;  %v4590_v63 = vadd.f32 %v4589_v32, %v4588_v49  ;;  %v4591_v14 = vpop.f32.mrb[122].mxu1 }
 0x3df   :  { %v4592_v51 = vpop.f32.mrb[123].mxu1 }
 0x3e0   :  { %v2945_v38 = vadd.f32 %v4523_v24, %v6231_v46  ;;  %v4593_v27 = vadd.f32 %v4592_v51, %v4591_v14  ;;  %v6283_v30 = vadd.f32 %v4590_v63, %v2942_v12 }
 0x3e2   :  { %v4524_v55 = vpop.f32.mrb[124].mxu0  ;;  %v6285_v59 = vadd.f32 %v4593_v27, %v2945_v38 }
 0x3e3   :  { %v4525_v20 = vpop.f32.mrb[125].mxu0 }
 0x3e4   :  { %v4526_v15 = vadd.f32 %v4525_v20, %v4524_v55  ;;  %v4527_v28 = vpop.f32.mrb[126].mxu0  ;;  %v4594_v45 = vpop.f32.mrb[124].mxu1 }
 0x3e5   :  { %v4528_v33 = vpop.f32.mrb[127].mxu0  ;;  %v4595_v62 = vpop.f32.mrb[125].mxu1 }
 0x3e6   :  { %v2950_v57 = vadd.f32 %v4526_v15, %v6235_v44  ;;  %v4529_v16 = vadd.f32 %v4528_v33, %v4527_v28  ;;  %v4596_v50 = vadd.f32 %v4595_v62, %v4594_v45  ;;  %v4597_v42 = vpop.f32.mrb[126].mxu1 }
 0x3e7   :  { %v4598_v7 = vpop.f32.mrb[127].mxu1 }
 0x3e8   :  { %v2953_v46 = vadd.f32 %v4529_v16, %v6237_v56  ;;  %v4599_v21 = vadd.f32 %v4598_v7, %v4597_v42  ;;  %v6289_v0 = vadd.f32 %v4596_v50, %v2950_v57 }
 0x3ea   :  { %v4530_v1 = vpop.f32.mrb[128].mxu0  ;;  %v6291_v35 = vadd.f32 %v4599_v21, %v2953_v46 }
 0x3eb   :  { %v4531_v52 = vpop.f32.mrb[129].mxu0 }
 0x3ec   :  { %v4532_v48 = vadd.f32 %v4531_v52, %v4530_v1  ;;  %v4533_v60 = vpop.f32.mrb[130].mxu0  ;;  %v4600_v53 = vpop.f32.mrb[128].mxu1 }
 0x3ed   :  { %v4534_v22 = vpop.f32.mrb[131].mxu0  ;;  %v4601_v29 = vpop.f32.mrb[129].mxu1 }
 0x3ee   :  { %v2958_v44 = vadd.f32 %v4532_v48, %v6241_v13  ;;  %v4535_v2 = vadd.f32 %v4534_v22, %v4533_v60  ;;  %v4602_v26 = vadd.f32 %v4601_v29, %v4600_v53  ;;  %v4603_v5 = vpop.f32.mrb[130].mxu1 }
 0x3ef   :  { %v4604_v6 = vpop.f32.mrb[131].mxu1 }
 0x3f0   :  { %v2961_v56 = vadd.f32 %v4535_v2, %v6243_v18  ;;  %v4605_v8 = vadd.f32 %v4604_v6, %v4603_v5  ;;  %v6295_v31 = vadd.f32 %v4602_v26, %v2958_v44 }
 0x3f2   :  { %v4536_v34 = vpop.f32.mrb[132].mxu0  ;;  %v6297_v54 = vadd.f32 %v4605_v8, %v2961_v56 }
 0x3f3   :  { %v4537_v4 = vpop.f32.mrb[133].mxu0 }
 0x3f4   :  { %v4538_v43 = vadd.f32 %v4537_v4, %v4536_v34  ;;  %v4539_v25 = vpop.f32.mrb[134].mxu0  ;;  %v4606_v40 = vpop.f32.mrb[132].mxu1 }
 0x3f5   :  { %v4540_v49 = vpop.f32.mrb[135].mxu0  ;;  %v4607_v41 = vpop.f32.mrb[133].mxu1 }
 0x3f6   :  { %v2966_v13 = vadd.f32 %v4538_v43, %v6247_v39  ;;  %v4541_v32 = vadd.f32 %v4540_v49, %v4539_v25  ;;  %v4608_v12 = vadd.f32 %v4607_v41, %v4606_v40  ;;  %v4609_v24 = vpop.f32.mrb[134].mxu1 }
 0x3f7   :  { %v4610_v63 = vpop.f32.mrb[135].mxu1 }
 0x3f8   :  { %v2969_v18 = vadd.f32 %v4541_v32, %v6249_v36  ;;  %v4611_v14 = vadd.f32 %v4610_v63, %v4609_v24  ;;  %v6301_v51 = vadd.f32 %v4608_v12, %v2966_v13 }
 0x3fa   :  { %v4542_v38 = vpop.f32.mrb[136].mxu0  ;;  %v6303_v27 = vadd.f32 %v4611_v14, %v2969_v18 }
 0x3fb   :  { %v4543_v55 = vpop.f32.mrb[137].mxu0 }
 0x3fc   :  { %v4544_v20 = vadd.f32 %v4543_v55, %v4542_v38  ;;  %v4545_v15 = vpop.f32.mrb[138].mxu0  ;;  %v4612_v28 = vpop.f32.mrb[136].mxu1 }
 0x3fd   :  { %v4546_v45 = vpop.f32.mrb[139].mxu0  ;;  %v4613_v33 = vpop.f32.mrb[137].mxu1 }
 0x3fe   :  { %v2974_v39 = vadd.f32 %v4544_v20, %v6253_v37  ;;  %v4547_v62 = vadd.f32 %v4546_v45, %v4545_v15  ;;  %v4614_v57 = vadd.f32 %v4613_v33, %v4612_v28  ;;  %v4615_v16 = vpop.f32.mrb[138].mxu1 }
 0x3ff   :  { %v4616_v50 = vpop.f32.mrb[139].mxu1 }
 0x400   :  { %v2977_v36 = vadd.f32 %v4547_v62, %v6255_v19  ;;  %v4617_v42 = vadd.f32 %v4616_v50, %v4615_v16  ;;  %v6307_v7 = vadd.f32 %v4614_v57, %v2974_v39  ;;  %v6331_v39 = vld [vmem:[#allocation2] sm:$0xff] }
 0x402   :  { %v4548_v46 = vpop.f32.mrb[140].mxu0  ;;  %v6309_v21 = vadd.f32 %v4617_v42, %v2977_v36 }
 0x403   :  { %v4549_v1 = vpop.f32.mrb[141].mxu0 }
 0x404   :  { %v4550_v52 = vadd.f32 %v4549_v1, %v4548_v46  ;;  %v4551_v48 = vpop.f32.mrb[142].mxu0  ;;  %v4618_v60 = vpop.f32.mrb[140].mxu1 }
 0x405   :  { %v4552_v53 = vpop.f32.mrb[143].mxu0  ;;  %v4619_v22 = vpop.f32.mrb[141].mxu1 }
 0x406   :  { %v2982_v37 = vadd.f32 %v4550_v52, %v6259_v11  ;;  %v4553_v29 = vadd.f32 %v4552_v53, %v4551_v48  ;;  %v4620_v44 = vadd.f32 %v4619_v22, %v4618_v60  ;;  %v4621_v2 = vpop.f32.mrb[142].mxu1  ;;  %v6321_v11 = vld [vmem:[%s6703_s13] ss:$0 sm:$0xff] }
 0x407   :  { %v4622_v26 = vpop.f32.mrb[143].mxu1 }
 0x408   :  { %v2985_v19 = vadd.f32 %v4553_v29, %v6261_v23  ;;  %v4623_v5 = vadd.f32 %v4622_v26, %v4621_v2  ;;  %v6313_v6 = vadd.f32 %v4620_v44, %v2982_v37 }
 0x40a   :  { %v3127_v56 = vpop.f32.mrb[144].mxu0  ;;  %v6315_v8 = vadd.f32 %v4623_v5, %v2985_v19 }
 0x40b   :  { %v3128_v34 = vadd.f32 %v3127_v56, %v6265_v17  ;;  %v4760_v4 = vpop.f32.mrb[145].mxu0 }
 0x40c   :  { %v3130_v43 = vpop.f32.mrb[146].mxu0 }
 0x40d   :  { %v3198_v25 = vmax.f32 %v3128_v34, 0.0  ;;  %v3131_v40 = vadd.f32 %v3130_v43, %v6267_v9  ;;  %v4761_v49 = vpop.f32.mrb[147].mxu0 }
 0x40f   :  { %v3199_v23 = vmax.f32 %v3131_v40, 0.0  ;;  %v3426_v41 = vmul.f32 %v6321_v11, %v3198_v25 }
 0x411   :  { %v3216_v13 = vpack.c.bf16 %v3199_v23, %v3198_v25  ;;  %3444 = vadd.xlane.f32.xlu0 %v3426_v41  ;;  %v3427_v32 = vmul.f32 %v6321_v11, %v3199_v23 }
 0x412   :  { %v3135_v12 = vpop.f32.mrb[148].mxu0 }
 0x413   :  { %v3136_v17 = vadd.f32 %v3135_v12, %v6271_v58  ;;  %v4764_v24 = vpop.f32.mrb[149].mxu0  ;;  %3446 = vadd.xlane.f32.xlu1 %v3427_v32  ;;  %4811 = vmatmul.mubr.bf16.vlgmr.msra.gmra.mrb[180].mxu0 %v3216_v13 }
 0x414   :  { %v3138_v63 = vpop.f32.mrb[150].mxu0 }
 0x415   :  { %v3200_v18 = vmax.f32 %v3136_v17, 0.0  ;;  %v3139_v14 = vadd.f32 %v3138_v63, %v6273_v3  ;;  %v4765_v38 = vpop.f32.mrb[151].mxu0 }
 0x417   :  { %v3201_v9 = vmax.f32 %v3139_v14, 0.0  ;;  %v3428_v55 = vmul.f32 %v6321_v11, %v3200_v18 }
 0x419   :  { %v3217_v20 = vpack.c.bf16 %v3201_v9, %v3200_v18  ;;  %3448 = vadd.xlane.f32.xlu0 %v3428_v55  ;;  %v3429_v58 = vmul.f32 %v6321_v11, %v3201_v9 }
 0x41a   :  { %v3143_v15 = vpop.f32.mrb[152].mxu0 }
 0x41b   :  { %v3144_v28 = vadd.f32 %v3143_v15, %v6277_v47  ;;  %v4768_v45 = vpop.f32.mrb[153].mxu0  ;;  %4815 = vmatmul.mubr.bf16.vlgmr.msra.gmra.mrb[144].mxu1 %v3217_v20 }
 0x41c   :  { %v3146_v33 = vpop.f32.mrb[154].mxu0  ;;  %4818 = vmatprep.mubr.msk.bf16.mxu1 %vm5065_vm2, %v6331_v39 }
 0x41d   :  { %v3202_v3 = vmax.f32 %v3144_v28, 0.0  ;;  %v3147_v62 = vadd.f32 %v3146_v33, %v6279_v61  ;;  %v4769_v57 = vpop.f32.mrb[155].mxu0  ;;  %3450 = vadd.xlane.f32.xlu0 %v3429_v58 }
 0x41f   :  { %v3203_v16 = vmax.f32 %v3147_v62, 0.0  ;;  %v3430_v50 = vmul.f32 %v6321_v11, %v3202_v3 }
 0x421   :  { %v3218_v36 = vpack.c.bf16 %v3203_v16, %v3202_v3  ;;  %3452 = vadd.xlane.f32.xlu1 %v3430_v50  ;;  %v3431_v47 = vmul.f32 %v6321_v11, %v3203_v16 }
 0x422   :  { %v3151_v42 = vpop.f32.mrb[156].mxu0 }
 0x423   :  { %v3152_v46 = vadd.f32 %v3151_v42, %v6283_v30  ;;  %v4772_v1 = vpop.f32.mrb[157].mxu0  ;;  %4819 = vmatmul.mubr.bf16.gmra.mrb[148].mxu1 %v3218_v36  ;;  %3454 = vadd.xlane.f32.xlu0 %v3431_v47 }
 0x424   :  { %v3154_v52 = vpop.f32.mrb[158].mxu0  ;;  %4822 = vmatprep.mubr.msk.bf16.mxu1 %vm5065_vm2, %v6331_v39 }
 0x425   :  { %v3204_v61 = vmax.f32 %v3152_v46, 0.0  ;;  %v3155_v48 = vadd.f32 %v3154_v52, %v6285_v59  ;;  %v4773_v60 = vpop.f32.mrb[159].mxu0 }
 0x427   :  { %v3205_v53 = vmax.f32 %v3155_v48, 0.0  ;;  %v3432_v22 = vmul.f32 %v6321_v11, %v3204_v61 }
 0x429   :  { %v3219_v37 = vpack.c.bf16 %v3205_v53, %v3204_v61  ;;  %3456 = vadd.xlane.f32.xlu1 %v3432_v22  ;;  %v3433_v29 = vmul.f32 %v6321_v11, %v3205_v53 }
 0x42a   :  { %v3159_v44 = vpop.f32.mrb[160].mxu0 }
 0x42b   :  { %v3160_v30 = vadd.f32 %v3159_v44, %v6289_v0  ;;  %v4776_v2 = vpop.f32.mrb[161].mxu0  ;;  %4823 = vmatmul.mubr.bf16.gmra.mrb[152].mxu1 %v3219_v37  ;;  %3458 = vadd.xlane.f32.xlu0 %v3433_v29 }
 0x42c   :  { %v3162_v26 = vpop.f32.mrb[162].mxu0  ;;  %4826 = vmatprep.mubr.msk.bf16.mxu1 %vm5065_vm2, %v6331_v39 }
 0x42d   :  { %v3206_v19 = vmax.f32 %v3160_v30, 0.0  ;;  %v3163_v59 = vadd.f32 %v3162_v26, %v6291_v35  ;;  %v4777_v5 = vpop.f32.mrb[163].mxu0 }
 0x42f   :  { %v3207_v56 = vmax.f32 %v3163_v59, 0.0  ;;  %v3434_v34 = vmul.f32 %v6321_v11, %v3206_v19 }
 0x431   :  { %v3220_v4 = vpack.c.bf16 %v3207_v56, %v3206_v19  ;;  %3460 = vadd.xlane.f32.xlu1 %v3434_v34  ;;  %v3435_v43 = vmul.f32 %v6321_v11, %v3207_v56  ;;  %v5068_v19 = vmov 1  }
 0x432   :  { %v3167_v25 = vpop.f32.mrb[164].mxu0 }
 0x433   :  { %v3168_v0 = vadd.f32 %v3167_v25, %v6295_v31  ;;  %v4780_v40 = vpop.f32.mrb[165].mxu0  ;;  %4827 = vmatmul.mubr.bf16.gmra.mrb[156].mxu1 %v3220_v4  ;;  %3462 = vadd.xlane.f32.xlu0 %v3435_v43 }
 0x434   :  { %v3170_v49 = vpop.f32.mrb[166].mxu0  ;;  %4830 = vmatprep.mubr.msk.bf16.mxu1 %vm5065_vm2, %v6331_v39 }
 0x435   :  { %v3208_v23 = vmax.f32 %v3168_v0, 0.0  ;;  %v3171_v35 = vadd.f32 %v3170_v49, %v6297_v54  ;;  %v4781_v41 = vpop.f32.mrb[167].mxu0 }
 0x437   :  { %v3209_v13 = vmax.f32 %v3171_v35, 0.0  ;;  %v3436_v32 = vmul.f32 %v6321_v11, %v3208_v23 }
 0x439   :  { %v3221_v12 = vpack.c.bf16 %v3209_v13, %v3208_v23  ;;  %3464 = vadd.xlane.f32.xlu1 %v3436_v32  ;;  %v3437_v17 = vmul.f32 %v6321_v11, %v3209_v13 }
 0x43a   :  { %v3175_v24 = vpop.f32.mrb[168].mxu0 }
 0x43b   :  { %v3176_v31 = vadd.f32 %v3175_v24, %v6301_v51  ;;  %v4784_v63 = vpop.f32.mrb[169].mxu0  ;;  %4831 = vmatmul.mubr.bf16.gmra.mrb[160].mxu1 %v3221_v12  ;;  %3466 = vadd.xlane.f32.xlu0 %v3437_v17 }
 0x43c   :  { %v3178_v18 = vpop.f32.mrb[170].mxu0  ;;  %4834 = vmatprep.mubr.msk.bf16.mxu1 %vm5065_vm2, %v6331_v39 }
 0x43d   :  { %v3210_v14 = vmax.f32 %v3176_v31, 0.0  ;;  %v3179_v54 = vadd.f32 %v3178_v18, %v6303_v27  ;;  %v4785_v38 = vpop.f32.mrb[171].mxu0 }
 0x43f   :  { %v3211_v9 = vmax.f32 %v3179_v54, 0.0  ;;  %v3438_v55 = vmul.f32 %v6321_v11, %v3210_v14 }
 0x441   :  { %v3222_v20 = vpack.c.bf16 %v3211_v9, %v3210_v14  ;;  %3468 = vadd.xlane.f32.xlu1 %v3438_v55  ;;  %v3439_v15 = vmul.f32 %v6321_v11, %v3211_v9 }
 0x442   :  { %v3183_v28 = vpop.f32.mrb[172].mxu0 }
 0x443   :  { %v3184_v51 = vadd.f32 %v3183_v28, %v6307_v7  ;;  %v4788_v45 = vpop.f32.mrb[173].mxu0  ;;  %4835 = vmatmul.mubr.bf16.gmra.mrb[164].mxu1 %v3222_v20  ;;  %3470 = vadd.xlane.f32.xlu0 %v3439_v15 }
 0x444   :  { %v3186_v58 = vpop.f32.mrb[174].mxu0  ;;  %4838 = vmatprep.mubr.msk.bf16.mxu1 %vm5065_vm2, %v6331_v39 }
 0x445   :  { %v3212_v33 = vmax.f32 %v3184_v51, 0.0  ;;  %v3187_v27 = vadd.f32 %v3186_v58, %v6309_v21  ;;  %v4789_v3 = vpop.f32.mrb[175].mxu0 }
 0x447   :  { %v3213_v62 = vmax.f32 %v3187_v27, 0.0  ;;  %v3440_v57 = vmul.f32 %v6321_v11, %v3212_v33 }
 0x449   :  { %v3223_v16 = vpack.c.bf16 %v3213_v62, %v3212_v33  ;;  %3472 = vadd.xlane.f32.xlu1 %v3440_v57  ;;  %v3441_v50 = vmul.f32 %v6321_v11, %v3213_v62 }
 0x44a   :  { %v3191_v36 = vpop.f32.mrb[176].mxu0 }
 0x44b   :  { %v3192_v7 = vadd.f32 %v3191_v36, %v6313_v6  ;;  %v4792_v47 = vpop.f32.mrb[177].mxu0  ;;  %4839 = vmatmul.mubr.bf16.gmra.mrb[168].mxu1 %v3223_v16  ;;  %3474 = vadd.xlane.f32.xlu0 %v3441_v50  ;;  %v6377_v6 = vld [vmem:[%s6699_s9] ss:$0 sm:$0xff] }
 0x44c   :  { %v3194_v42 = vpop.f32.mrb[178].mxu0  ;;  %4842 = vmatprep.mubr.msk.bf16.mxu1 %vm5065_vm2, %v6331_v39 }
 0x44d   :  { %v3214_v46 = vmax.f32 %v3192_v7, 0.0  ;;  %v3195_v21 = vadd.f32 %v3194_v42, %v6315_v8  ;;  %v4793_v1 = vpop.f32.mrb[179].mxu0 }
 0x44f   :  { %v3215_v52 = vmax.f32 %v3195_v21, 0.0  ;;  %v3442_v61 = vmul.f32 %v6321_v11, %v3214_v46 }
 0x451   :  { %v3224_v48 = vpack.c.bf16 %v3215_v52, %v3214_v46  ;;  %3476 = vadd.xlane.f32.xlu1 %v3442_v61  ;;  %v3443_v60 = vmul.f32 %v6321_v11, %v3215_v52 }
 0x453   :  { %3478 = vadd.xlane.f32.xlu0 %v3443_v60  ;;  %4843 = vmatmul.mubr.bf16.gmra.mrb[172].mxu1 %v3224_v48 }
 0x4e6   :  { %v3330_v53 = vpop.f32.mrb[180].mxu0 }
 0x4e7   :  { %v3331_v39 = vadd.f32 %v6377_v6, %v3330_v53  ;;  %v4812_v22 = vpop.f32.mrb[181].mxu0  ;;  %v3447_v53 = vpop.xlane.xlu1 %3446 }
 0x4e8   :  { %v3333_v8 = vpop.f32.mrb[182].mxu0 }
 0x4e9   :  { %v3401_v37 = vmax.f32 %v3331_v39, 0.0  ;;  %v3334_v29 = vadd.f32 %v6377_v6, %v3333_v8  ;;  %v4813_v44 = vpop.f32.mrb[183].mxu0 }
 0x4eb   :  { %v3402_v30 = vmax.f32 %v3334_v29, 0.0  ;;  %3556 = vperm.xlu1 %4870, %v3401_v37  }
 0x4ed   :  { %3561 = vperm.xlu0 %4869, %v3402_v30  }
 0x4ee   :  { %v3338_v11 = vpop.f32.mrb[144].mxu1 }
 0x4ef   :  { %v3339_v2 = vadd.f32 %v6377_v6, %v3338_v11  ;;  %v4816_v26 = vpop.f32.mrb[145].mxu1  ;;  %4871 = vset.pattern.permute.xlu1 %v5068_v19 }
 0x4f0   :  { %v3341_v59 = vpop.f32.mrb[146].mxu1  ;;  %3609 = vperm.xlu1 %4871, %v3401_v37   ;;  %v6416_v26 = vld [vmem:[#allocation5] ss:$0 sm:$0xff] }
 0x4f1   :  { %v4817_v5 = vpop.f32.mrb[147].mxu1  ;;  %4872 = vset.pattern.permute.xlu0 %v5068_v19  ;;  %v3403_v56 = vmax.f32 %v3339_v2, 0.0  ;;  %v3342_v0 = vadd.f32 %v6377_v6, %v3341_v59  ;;  %v3453_v2 = vpop.xlane.xlu1 %3452 }
 0x4f2   :  { %3613 = vperm.xlu0 %4872, %v3402_v30   ;;  %v3491_v59 = vadd.f32 %v6416_v26, %v3453_v2  ;;  %v6476_v2 = vld [vmem:[%s6700_s10 + $0x10] sm:$0xff] }
 0x4f3   :  { %v3404_v23 = vmax.f32 %v3342_v0, 0.0 }
 0x4f4   :  { %4873 = vset.pattern.permute.xlu1 %v5066_v10 }
 0x4f5   :  { %3566 = vperm.xlu1 %4873, %v3403_v56  }
 0x4f6   :  { %v3346_v34 = vpop.f32.mrb[148].mxu1  ;;  %4877 = vset.pattern.permute.xlu0 %v5066_v10 }
 0x4f7   :  { %v3347_v4 = vadd.f32 %v6377_v6, %v3346_v34  ;;  %v4820_v43 = vpop.f32.mrb[149].mxu1 }
 0x4f8   :  { %v3349_v25 = vpop.f32.mrb[150].mxu1  ;;  %v3445_v43 = vpop.xlane.xlu0 %3444 }
 0x4f9   :  { %v3405_v40 = vmax.f32 %v3347_v4, 0.0  ;;  %v4821_v49 = vpop.f32.mrb[151].mxu1  ;;  %4874 = vset.pattern.permute.xlu1 %v5068_v19  ;;  %v3350_v17 = vadd.f32 %v6377_v6, %v3349_v25 }
 0x4fa   :  { %3617 = vperm.xlu1 %4874, %v3403_v56   ;;  %v3509_v56 = vmax.f32 %v3491_v59, 0.0  ;;  %v3457_v49 = vpop.xlane.xlu1 %3456 }
 0x4fb   :  { %3576 = vperm.xlu0 %4877, %v3405_v40   ;;  %v3406_v63 = vmax.f32 %v3350_v17, 0.0 }
 0x4fc   :  { %v3449_v25 = vpop.xlane.xlu0 %3448 }
 0x4fe   :  { %v3354_v35 = vpop.f32.mrb[152].mxu1  ;;  %4875 = vset.pattern.permute.xlu1 %v5066_v10 }
 0x4ff   :  { %v3355_v41 = vadd.f32 %v6377_v6, %v3354_v35  ;;  %v4824_v13 = vpop.f32.mrb[153].mxu1  ;;  %4878 = vset.pattern.permute.xlu0 %v5068_v19  ;;  %3571 = vperm.xlu1 %4875, %v3404_v23  }
 0x500   :  { %v3357_v32 = vpop.f32.mrb[154].mxu1  ;;  %3625 = vperm.xlu0 %4878, %v3405_v40   ;;  %v3451_v0 = vpop.xlane.xlu0 %3450 }
 0x501   :  { %v4825_v12 = vpop.f32.mrb[155].mxu1  ;;  %v3407_v24 = vmax.f32 %v3355_v41, 0.0  ;;  %v3358_v9 = vadd.f32 %v6377_v6, %v3357_v32  ;;  %v3488_v41 = vadd.f32 %v6416_v26, %v3447_v53  ;;  %v6429_v13 = vpop.xlane.xlu1 %3460 }
 0x503   :  { %4876 = vset.pattern.permute.xlu1 %v5068_v19  ;;  %v3408_v45 = vmax.f32 %v3358_v9, 0.0  ;;  %v3506_v12 = vmax.f32 %v3488_v41, 0.0 }
 0x504   :  { %4881 = vset.pattern.permute.xlu0 %v5066_v10  ;;  %3621 = vperm.xlu1 %4876, %v3404_v23   ;;  %v3455_v40 = vpop.xlane.xlu0 %3454 }
 0x505   :  { %3586 = vperm.xlu0 %4881, %v3407_v24   ;;  %v3465_v17 = vpop.xlane.xlu1 %3464 }
 0x506   :  { %v3362_v31 = vpop.f32.mrb[156].mxu1 }
 0x507   :  { %v4828_v18 = vpop.f32.mrb[157].mxu1  ;;  %v3363_v54 = vadd.f32 %v6377_v6, %v3362_v31  ;;  %v3497_v31 = vadd.f32 %v6416_v26, %v3465_v17  ;;  %v6503_v17 = vld [vmem:[%s6701_s11 + $0x28] sm:$0xff] }
 0x508   :  { %v3365_v14 = vpop.f32.mrb[158].mxu1  ;;  %4879 = vset.pattern.permute.xlu1 %v5066_v10  ;;  %v6426_v23 = vpop.xlane.xlu0 %3458 }
 0x509   :  { %v4829_v38 = vpop.f32.mrb[159].mxu1  ;;  %4882 = vset.pattern.permute.xlu0 %v5068_v19  ;;  %3581 = vperm.xlu1 %4879, %v3406_v63   ;;  %v3409_v55 = vmax.f32 %v3363_v54, 0.0  ;;  %v3366_v20 = vadd.f32 %v6377_v6, %v3365_v14  ;;  %v3515_v18 = vmax.f32 %v3497_v31, 0.0  ;;  %v3469_v54 = vpop.xlane.xlu1 %3468 }
 0x50a   :  { %3633 = vperm.xlu0 %4882, %v3407_v24  }
 0x50b   :  { %v3410_v58 = vmax.f32 %v3366_v20, 0.0 }
 0x50c   :  { %v3463_v32 = vpop.xlane.xlu0 %3462 }
 0x50d   :  { %4880 = vset.pattern.permute.xlu1 %v5068_v19 }
 0x50e   :  { %v3370_v15 = vpop.f32.mrb[160].mxu1  ;;  %4885 = vset.pattern.permute.xlu0 %v5066_v10  ;;  %3629 = vperm.xlu1 %4880, %v3406_v63   ;;  %v3489_v63 = vadd.f32 %v6416_v26, %v3449_v25  ;;  %v6489_v25 = vld [vmem:[%s6700_s10 + $0x18] sm:$0xff] }
 0x50f   :  { %v4832_v28 = vpop.f32.mrb[161].mxu1  ;;  %3596 = vperm.xlu0 %4885, %v3409_v55   ;;  %v3371_v27 = vadd.f32 %v6377_v6, %v3370_v15 }
 0x510   :  { %v3373_v51 = vpop.f32.mrb[162].mxu1  ;;  %v3467_v14 = vpop.xlane.xlu0 %3466  ;;  %v3507_v38 = vmax.f32 %v3489_v63, 0.0 }
 0x511   :  { %v4833_v33 = vpop.f32.mrb[163].mxu1  ;;  %v3411_v3 = vmax.f32 %v3371_v27, 0.0  ;;  %v3374_v48 = vadd.f32 %v6377_v6, %v3373_v51  ;;  %v3498_v9 = vadd.f32 %v6416_v26, %v3467_v14  ;;  %v3499_v51 = vadd.f32 %v6416_v26, %v3469_v54  ;;  %v6513_v14 = vld [vmem:[%s6700_s10 + $0x28] sm:$0xff] }
 0x512   :  { %4883 = vset.pattern.permute.xlu1 %v5066_v10 }
 0x513   :  { %3786 = vperm.xlu0 %4885, %v3410_v58   ;;  %3591 = vperm.xlu1 %4883, %v3408_v45   ;;  %v3412_v22 = vmax.f32 %v3374_v48, 0.0  ;;  %v3516_v20 = vmax.f32 %v3498_v9, 0.0  ;;  %v3517_v33 = vmax.f32 %v3499_v51, 0.0  ;;  %v6522_v51 = vld [vmem:[%s6701_s11 + $0x30] sm:$0xff] }
 0x516   :  { %v3378_v62 = vpop.f32.mrb[164].mxu1 }
 0x517   :  { %v3379_v57 = vadd.f32 %v6377_v6, %v3378_v62  ;;  %v4836_v16 = vpop.f32.mrb[165].mxu1  ;;  %4887 = vset.pattern.permute.xlu0 %v5068_v19  ;;  %4884 = vset.pattern.permute.xlu1 %v5068_v19 }
 0x518   :  { %v3381_v50 = vpop.f32.mrb[166].mxu1  ;;  %3843 = vperm.xlu0 %4887, %v3411_v3   ;;  %3637 = vperm.xlu1 %4884, %v3408_v45   ;;  %v3471_v45 = vpop.xlane.xlu0 %3470 }
 0x519   :  { %v4837_v36 = vpop.f32.mrb[167].mxu1  ;;  %v3413_v7 = vmax.f32 %v3379_v57, 0.0  ;;  %v3382_v47 = vadd.f32 %v6377_v6, %v3381_v50  ;;  %v3500_v27 = vadd.f32 %v6416_v26, %v3471_v45  ;;  %v3492_v57 = vadd.f32 %v6416_v26, %v3455_v40 }
 0x51b   :  { %v3414_v21 = vmax.f32 %v3382_v47, 0.0  ;;  %v3518_v16 = vmax.f32 %v3500_v27, 0.0  ;;  %v6527_v27 = vld [vmem:[%s6700_s10 + $0x30] sm:$0xff] }
 0x51c   :  { %4889 = vset.pattern.permute.xlu0 %v5066_v10  ;;  %3641 = vperm.xlu1 %4884, %v3409_v55   ;;  %v3490_v55 = vadd.f32 %v6416_v26, %v3451_v0 }
 0x51d   :  { %3801 = vperm.xlu0 %4889, %v3413_v7  }
 0x51e   :  { %v3386_v42 = vpop.f32.mrb[168].mxu1  ;;  %v3508_v28 = vmax.f32 %v3490_v55, 0.0 }
 0x51f   :  { %v4840_v46 = vpop.f32.mrb[169].mxu1  ;;  %v3387_v34 = vadd.f32 %v6377_v6, %v3386_v42 }
 0x520   :  { %v3389_v1 = vpop.f32.mrb[170].mxu1  ;;  %3839 = vperm.xlu1 %4884, %v3410_v58   ;;  %v3493_v46 = vadd.f32 %v6416_v26, %v3457_v49 }
 0x521   :  { %v3390_v52 = vadd.f32 %v6377_v6, %v3389_v1  ;;  %v4841_v61 = vpop.f32.mrb[171].mxu1  ;;  %4891 = vset.pattern.permute.xlu0 %v5068_v19  ;;  %v3415_v4 = vmax.f32 %v3387_v34, 0.0 }
 0x522   :  { %3855 = vperm.xlu0 %4891, %v3414_v21  }
 0x523   :  { %v3416_v60 = vmax.f32 %v3390_v52, 0.0  ;;  %v3511_v52 = vmax.f32 %v3493_v46, 0.0 }
 0x524   :  { %4886 = vset.pattern.permute.xlu1 %v5066_v10 }
 0x525   :  { %3791 = vperm.xlu1 %4886, %v3411_v3   ;;  %v3475_v3 = vpop.xlane.xlu0 %3474 }
 0x526   :  { %3863 = vperm.xlu0 %4891, %v3416_v60   ;;  %v3394_v39 = vpop.f32.mrb[172].mxu1  ;;  %v3502_v61 = vadd.f32 %v6416_v26, %v3475_v3  ;;  %v6532_v3 = vld [vmem:[%s6700_s10 + $0x38] sm:$0xff] }
 0x527   :  { %v3395_v8 = vadd.f32 %v6377_v6, %v3394_v39  ;;  %v4844_v37 = vpop.f32.mrb[173].mxu1 }
 0x528   :  { %v3397_v29 = vpop.f32.mrb[174].mxu1  ;;  %v3520_v53 = vmax.f32 %v3502_v61, 0.0  ;;  %v6455_v37 = vld [vmem:[%s6700_s10 + $0x8] sm:$0xff] }
 0x529   :  { %v3417_v44 = vmax.f32 %v3395_v8, 0.0  ;;  %v3398_v30 = vadd.f32 %v6377_v6, %v3397_v29  ;;  %3796 = vperm.xlu1 %4886, %v3412_v22   ;;  %v4845_v11 = vpop.f32.mrb[175].mxu1  ;;  %v3487_v6 = vadd.f32 %v6416_v26, %v3445_v43  ;;  %v6442_v50 = vpop.xlane.xlu0 %3478  ;;  %v6460_v29 = vld [vmem:[%s6701_s11] sm:$0xff] }
 0x52a   :  { %4894 = vset.pattern.permute.xlu0 %v5066_v10  ;;  %v6471_v11 = vld [vmem:[%s6700_s10] sm:$0xff] }
 0x52b   :  { %3821 = vperm.xlu0 %4894, %v3417_v44   ;;  %v3418_v5 = vmax.f32 %v3398_v30, 0.0  ;;  %v3505_v35 = vmax.f32 %v3487_v6, 0.0 }
 0x52d   :  { %4888 = vset.pattern.permute.xlu1 %v5068_v19 }
 0x52e   :  { %3847 = vperm.xlu1 %4888, %v3412_v22   ;;  %v6450_v22 = vld [vmem:[%s6701_s11 + $0x8] sm:$0xff] }
 0x52f   :  { %3826 = vperm.xlu0 %4894, %v3418_v5  }
 0x532   :  { %3851 = vperm.xlu1 %4888, %v3413_v7   ;;  %v3510_v7 = vmax.f32 %v3492_v57, 0.0 }
 0x533   :  { %3716 = vperm.xlu0 %4894, %v3509_v56  }
 0x536   :  { %4890 = vset.pattern.permute.xlu1 %v5066_v10 }
 0x537   :  { %3806 = vperm.xlu1 %4890, %v3414_v21  }
 0x53b   :  { %3811 = vperm.xlu1 %4890, %v3415_v4  }
 0x53f   :  { %4892 = vset.pattern.permute.xlu1 %v5068_v19 }
 0x540   :  { %3859 = vperm.xlu1 %4892, %v3415_v4  }
 0x544   :  { %4893 = vset.pattern.permute.xlu1 %v5066_v10 }
 0x545   :  { %3816 = vperm.xlu1 %4893, %v3416_v60  }
 0x549   :  { %4895 = vset.pattern.permute.xlu1 %v5068_v19  ;;  %v3496_v19 = vadd.f32 %v6416_v26, %v3463_v32 }
 0x54a   :  { %3867 = vperm.xlu1 %4895, %v3417_v44   ;;  %v6465_v44 = vld [vmem:[%s6701_s11 + $0x10] sm:$0xff] }
 0x54b   :  { %v3514_v24 = vmax.f32 %v3496_v19, 0.0 }
 0x54e   :  { %3871 = vperm.xlu1 %4895, %v3418_v5   ;;  %v6481_v5 = vld [vmem:[%s6701_s11 + $0x18] sm:$0xff] }
 0x552   :  { %4896 = vset.pattern.permute.xlu1 %v5066_v10  ;;  %v3473_v10 = vpop.xlane.xlu1 %3472 }
 0x553   :  { %3696 = vperm.xlu1 %4896, %v3505_v35   ;;  %v3501_v47 = vadd.f32 %v6416_v26, %v3473_v10 }
 0x555   :  { %v3519_v21 = vmax.f32 %v3501_v47, 0.0 }
 0x556   :  { %v6437_v15 = vpop.xlane.xlu1 %3476 }
 0x557   :  { %3701 = vperm.xlu1 %4896, %v3506_v12   ;;  %v6498_v12 = vld [vmem:[%s6701_s11 + $0x20] sm:$0xff] }
 0x55b   :  { %3925 = vperm.xlu1 %4896, %v3514_v24  }
 0x55f   :  { %3930 = vperm.xlu1 %4896, %v3515_v18   ;;  %v6508_v18 = vld [vmem:[%s6700_s10 + $0x20] sm:$0xff] }
 0x563   :  { %3706 = vperm.xlu1 %4896, %v3507_v38  }
 0x567   :  { %3935 = vperm.xlu1 %4896, %v3516_v20  }
 0x56a   :  { %v3557_v58 = vpop.permute.xlu1 %3556 }
 0x56b   :  { %3711 = vperm.xlu1 %4896, %v3508_v28   ;;  %v3599_v0 = vmul.f32 %v3557_v58, %v6471_v11 }
 0x56c   :  { %v3562_v42 = vpop.permute.xlu0 %3561 }
 0x56d   :  { %v3600_v56 = vmul.f32 %v3562_v42, %v6455_v37 }
 0x56f   :  { %v3610_v62 = vpop.permute.xlu1 %3609  ;;  %3940 = vperm.xlu1 %4896, %v3517_v33  }
 0x570   :  { %v3644_v34 = vmul.f32 %v3610_v62, %v6460_v29  ;;  %v6537_v62 = vld [vmem:[%s6701_s11 + $0x38] sm:$0xff] }
 0x571   :  { %v3614_v48 = vpop.permute.xlu0 %3613 }
 0x572   :  { %v3645_v30 = vmul.f32 %v3614_v48, %v6450_v22  ;;  %v3653_v35 = vadd.f32 %v3644_v34, %v3599_v0 }
 0x573   :  { %3945 = vperm.xlu1 %4896, %v3518_v16  }
 0x574   :  { %v3567_v36 = vpop.permute.xlu1 %3566  ;;  %v3654_v40 = vadd.f32 %v3645_v30, %v3600_v56 }
 0x575   :  { %v3601_v6 = vmul.f32 %v3567_v36, %v6476_v2 }
 0x576   :  { %v3662_v31 = vadd.f32 %v3654_v40, %v3653_v35  ;;  %v3551_v40 = vlaneseq }
 0x577   :  { %3721 = vperm.xlu1 %4896, %v3510_v7  }
 0x579   :  { %v3618_v1 = vpop.permute.xlu1 %3617 }
 0x57a   :  { %v3577_v39 = vpop.permute.xlu0 %3576  ;;  %v3646_v4 = vmul.f32 %v3618_v1, %v6465_v44 }
 0x57b   :  { %3950 = vperm.xlu1 %4896, %v3519_v21   ;;  %v3603_v10 = vmul.f32 %v3577_v39, %v6508_v18  ;;  %v6546_v21 = vld [vmem:[%s6700_s10 + $0x40] sm:$0xff] }
 0x57c   :  { %v3655_v41 = vadd.f32 %v3646_v4, %v3601_v6 }
 0x57e   :  { %v3572_v60 = vpop.permute.xlu1 %3571  ;;  %v3663_v54 = vadd.f32 %v3662_v31, %v3655_v41 }
 0x57f   :  { %3726 = vperm.xlu1 %4896, %v3511_v52   ;;  %v3626_v59 = vpop.permute.xlu0 %3625  ;;  %v3602_v32 = vmul.f32 %v3572_v60, %v6489_v25  ;;  %v6551_v52 = vld [vmem:[%s6701_s11 + $0x40] sm:$0xff]  ;;  %s5069_s11 = smov [#allocation7]  }
 0x580   :  { %v3648_v38 = vmul.f32 %v3626_v59, %v6498_v12  ;;  %s4017_s30 = sshll.u32 %s5069_s11, 4  ;;  %s4018_s30 = int_to_ptr.vmem [resolvable:$true] %s4017_s30 }
 0x581   :  { %s5039_s7 = scalar_lea.vmem %s4018_s30, 32  ;;  %p5044_p1 = scmp.lt.s32.totalorder %s4018_s30, %s4018_s30 }
 0x582   :  { %v3657_v58 = vadd.f32 %v3648_v38, %v3603_v10  ;;  %p5040_p0 = scmp.ne.s32.totalorder %s4018_s30, %s5039_s7  ;;  %p5045_p2 = scmp.lt.s32.totalorder %s5039_s7, %s5039_s7 }
 0x583   :  { %v3622_v8 = vpop.permute.xlu1 %3621  ;;  %3955 = vperm.xlu1 %4896, %v3520_v53  }
 0x584   :  { %v3647_v49 = vmul.f32 %v3622_v8, %v6481_v5  ;;  %v3587_v19 = vpop.permute.xlu0 %3586  ;;  %p5046_p3 = por %p5045_p2, %p5044_p1 }
 0x585   :  { %v3605_v7 = vmul.f32 %v3587_v19, %v6527_v27 }
 0x586   :  { %v3656_v63 = vadd.f32 %v3647_v49, %v3602_v32  ;;  %v6555_v32 = vand.u32 127, %v3551_v40  ;;  %p5047_p4 = pnand %p5046_p3, %p5040_p0 }
 0x588   :  { %v3582_v43 = vpop.permute.xlu1 %3581  ;;  %v3664_v55 = vadd.f32 %v3663_v54, %v3656_v63  ;;  %vm3553_vm6 = vcmp.lt.s32.totalorder %v6555_v32, 42 }
 0x589   :  { %v3604_v20 = vmul.f32 %v3582_v43, %v6513_v14  ;;  %v3634_v45 = vpop.permute.xlu0 %3633 }
 0x58a   :  { %v3650_v57 = vmul.f32 %v3634_v45, %v6522_v51  ;;  %v3665_v16 = vadd.f32 %v3664_v55, %v3657_v58 }
 0x58c   :  { %v3659_v61 = vadd.f32 %v3650_v57, %v3605_v7 }
 0x58d   :  { %v3630_v24 = vpop.permute.xlu1 %3629 }
 0x58e   :  { %v3649_v9 = vmul.f32 %v3630_v24, %v6503_v17  ;;  %v3597_v1 = vpop.permute.xlu0 %3596  ;;  %v3676_v24 = vld [vmem:[%s6702_s12] sm:$0x1] }
 0x58f   :  { %v3607_v53 = vmul.f32 %v3597_v1, %v6546_v21 }
 0x590   :  { %v3658_v33 = vadd.f32 %v3649_v9, %v3604_v20 }
 0x592   :  { %v3592_v28 = vpop.permute.xlu1 %3591  ;;  %v3666_v47 = vadd.f32 %v3665_v16, %v3658_v33  ;;  %v3787_v49 = vpop.permute.xlu0 %3786 }
 0x593   :  { %v3606_v42 = vmul.f32 %v3592_v28, %v6532_v3 }
 0x594   :  { %v3667_v39 = vadd.f32 %v3666_v47, %v3659_v61 }
 0x597   :  { %v3638_v36 = vpop.permute.xlu1 %3637  ;;  %v3844_v63 = vpop.permute.xlu0 %3843 }
 0x598   :  { %v3651_v46 = vmul.f32 %v3638_v36, %v6537_v62  ;;  %v3875_v57 = vmul.f32 %v3844_v63, %v6450_v22 }
 0x59a   :  { %v3660_v48 = vadd.f32 %v3651_v46, %v3606_v42  ;;  %v3829_v42 = vmul.f32 %v3787_v49, %v6471_v11 }
 0x59b   :  { %v3642_v60 = vpop.permute.xlu1 %3641 }
 0x59c   :  { %v3652_v8 = vmul.f32 %v3642_v60, %v6551_v52  ;;  %v3668_v30 = vadd.f32 %v3667_v39, %v3660_v48  ;;  %v3802_v20 = vpop.permute.xlu0 %3801  ;;  %v3494_v48 = vadd.f32 %v6416_v26, %v6426_v23 }
 0x59e   :  { %v3661_v59 = vadd.f32 %v3652_v8, %v3607_v53 }
 0x59f   :  { %v3840_v56 = vpop.permute.xlu1 %3839 }
 0x5a0   :  { %v3669_v34 = vadd.f32 %v3668_v30, %v3661_v59  ;;  %v3874_v16 = vmul.f32 %v3840_v56, %v6460_v29  ;;  %v3512_v30 = vmax.f32 %v3494_v48, 0.0  ;;  %v3541_v48 = vld [vmem:[%s6705_s15] sm:$0xff] }
 0x5a1   :  { %v3856_v45 = vpop.permute.xlu0 %3855 }
 0x5a2   :  { %v3670_v4 = vrot.slane %v3669_v34, 4  ;;  %v3883_v60 = vadd.f32 %v3874_v16, %v3829_v42 }
 0x5a4   :  { %v3671_v43 = vadd.f32 %v3670_v4, %v3669_v34  ;;  %v3792_v0 = vpop.permute.xlu1 %3791 }
 0x5a5   :  { %v3830_v33 = vmul.f32 %v3792_v0, %v6455_v37  ;;  %v3864_v7 = vpop.permute.xlu0 %3863  ;;  %v3832_v37 = vmul.f32 %v3802_v20, %v6489_v25 }
 0x5a6   :  { %v3672_v6 = vrot.slane %v3671_v43, 2 }
 0x5a7   :  { %v3884_v46 = vadd.f32 %v3875_v57, %v3830_v33 }
 0x5a8   :  { %v3673_v35 = vadd.f32 %v3672_v6, %v3671_v43  ;;  %v3797_v41 = vpop.permute.xlu1 %3796 }
 0x5a9   :  { %v3831_v1 = vmul.f32 %v3797_v41, %v6476_v2  ;;  %v3892_v53 = vadd.f32 %v3884_v46, %v3883_v60  ;;  %v3503_v2 = vadd.f32 %v6416_v26, %v6437_v15  ;;  %v3504_v41 = vadd.f32 %v6416_v26, %v6442_v50  ;;  %v3542_v46 = vld [vmem:[%s6705_s15 + $0x8] sm:$0xff] }
 0x5aa   :  { %v3674_v19 = vrot.slane %v3673_v35, 1 }
 0x5ab   :  { %v3521_v4 = vmax.f32 %v3503_v2, 0.0  ;;  %v3522_v63 = vmax.f32 %v3504_v41, 0.0  ;;  %v3545_v2 = vld [vmem:[%s6705_s15 + $0x20] sm:$0xff] }
 0x5ac   :  { %v3675_v31 = vadd.f32 %v3674_v19, %v3673_v35 }
 0x5ad   :  { %v3848_v54 = vpop.permute.xlu1 %3847 }
 0x5ae   :  { %v3677_v38 = vadd.f32 %v3676_v24, %v3675_v31  ;;  %v3876_v36 = vmul.f32 %v3848_v54, %v6465_v44  ;;  %v3878_v44 = vmul.f32 %v3856_v45, %v6498_v12 }
 0x5b0   :  { %v6563_v9 = vsel %vm3553_vm6, %v3677_v38, -inf  ;;  %v3885_v22 = vadd.f32 %v3876_v36, %v3831_v1 }
 0x5b1   :  { %v3852_v10 = vpop.permute.xlu1 %3851  ;;  %v3680_v55 = vsel %vm3679_vm7, %v6563_v9, -inf }
 0x5b2   :  { %3681 = vmax.xlane.f32.xlu0 %v3680_v55  ;;  %v3877_v61 = vmul.f32 %v3852_v10, %v6481_v5  ;;  %v3822_v5 = vpop.permute.xlu0 %3821  ;;  %v3893_v59 = vadd.f32 %v3892_v53, %v3885_v22  ;;  %v3544_v22 = vld [vmem:[%s6705_s15 + $0x18] sm:$0xff] }
 0x5b3   :  { %v3836_v0 = vmul.f32 %v3822_v5, %v6532_v3 }
 0x5b4   :  { %v3886_v39 = vadd.f32 %v3877_v61, %v3832_v37  ;;  %v3543_v37 = vld [vmem:[%s6705_s15 + $0x10] sm:$0xff] }
 0x5b6   :  { %v3807_v28 = vpop.permute.xlu1 %3806  ;;  %v3894_v34 = vadd.f32 %v3893_v59, %v3886_v39  ;;  %v3827_v49 = vpop.permute.xlu0 %3826 }
 0x5b7   :  { %v3833_v29 = vmul.f32 %v3807_v28, %v6508_v18  ;;  %v3880_v18 = vmul.f32 %v3864_v7, %v6522_v51  ;;  %v3837_v19 = vmul.f32 %v3827_v49, %v6546_v21 }
 0x5b9   :  { %v3887_v23 = vadd.f32 %v3878_v44, %v3833_v29 }
 0x5ba   :  { %v3812_v58 = vpop.permute.xlu1 %3811  ;;  %v3717_v61 = vpop.permute.xlu0 %3716 }
 0x5bb   :  { %v3834_v25 = vmul.f32 %v3812_v58, %v6513_v14  ;;  %v3895_v15 = vadd.f32 %v3894_v34, %v3887_v23 }
 0x5bf   :  { %v3860_v47 = vpop.permute.xlu1 %3859 }
 0x5c0   :  { %v3879_v11 = vmul.f32 %v3860_v47, %v6503_v17  ;;  %v3495_v17 = vadd.f32 %v6416_v26, %v6429_v13  ;;  %v3906_v26 = vld [vmem:[%s6702_s12] sm:$0x1] }
 0x5c2   :  { %v3888_v12 = vadd.f32 %v3879_v11, %v3834_v25 }
 0x5c4   :  { %v3817_v8 = vpop.permute.xlu1 %3816  ;;  %v3896_v14 = vadd.f32 %v3895_v15, %v3888_v12  ;;  %v3547_v12 = vld [vmem:[%s6705_s15 + $0x30] sm:$0xff] }
 0x5c5   :  { %v3835_v56 = vmul.f32 %v3817_v8, %v6527_v27  ;;  %v3513_v27 = vmax.f32 %v3495_v17, 0.0 }
 0x5c7   :  { %v3889_v40 = vadd.f32 %v3880_v18, %v3835_v56  ;;  %v3546_v56 = vld [vmem:[%s6705_s15 + $0x28] sm:$0xff] }
 0x5c8   :  { %3731 = vperm.xlu0 %4894, %v3512_v30  }
 0x5c9   :  { %v3868_v43 = vpop.permute.xlu1 %3867  ;;  %v3897_v13 = vadd.f32 %v3896_v14, %v3889_v40 }
 0x5ca   :  { %v3881_v6 = vmul.f32 %v3868_v43, %v6537_v62 }
 0x5cc   :  { %v3890_v35 = vadd.f32 %v3881_v6, %v3836_v0  ;;  %3960 = vperm.xlu0 %4894, %v3521_v4   ;;  %v3548_v0 = vld [vmem:[%s6705_s15 + $0x38] sm:$0xff] }
 0x5cd   :  { %v3872_v51 = vpop.permute.xlu1 %3871 }
 0x5ce   :  { %v3882_v24 = vmul.f32 %v3872_v51, %v6551_v52  ;;  %v3898_v31 = vadd.f32 %v3897_v13, %v3890_v35 }
 0x5d0   :  { %v3891_v3 = vadd.f32 %v3882_v24, %v3837_v19  ;;  %3736 = vperm.xlu0 %4894, %v3513_v27  }
 0x5d2   :  { %v3899_v54 = vadd.f32 %v3898_v31, %v3891_v3  ;;  %v3697_v45 = vpop.permute.xlu1 %3696 }
 0x5d3   :  { %v3739_v29 = vmul.f32 %v3697_v45, %v3541_v48 }
 0x5d4   :  { %v3900_v62 = vrot.slane %v3899_v54, 4  ;;  %3965 = vperm.xlu0 %4894, %v3522_v63   ;;  %v3549_v63 = vld [vmem:[%s6705_s15 + $0x40] sm:$0xff] }
 0x5d5   :  { %v3748_v5 = vsel %vm461_vm4, %v3739_v29, 0.0 }
 0x5d6   :  { %v3901_v38 = vadd.f32 %v3900_v62, %v3899_v54  ;;  %v3702_v58 = vpop.permute.xlu1 %3701 }
 0x5d7   :  { %v3740_v60 = vmul.f32 %v3702_v58, %v3542_v46 }
 0x5d8   :  { %v3902_v10 = vrot.slane %v3901_v38, 2 }
 0x5d9   :  { %v3749_v11 = vsel %vm461_vm4, %v3740_v60, 0.0 }
 0x5da   :  { %v3903_v55 = vadd.f32 %v3902_v10, %v3901_v38  ;;  %v3926_v33 = vpop.permute.xlu1 %3925  ;;  %v3750_v25 = vadd.f32 %v3749_v11, %v3748_v5 }
 0x5db   :  { %v3968_v14 = vmul.f32 %v3926_v33, %v3541_v48 }
 0x5dc   :  { %v3904_v20 = vrot.slane %v3903_v55, 1 }
 0x5dd   :  { %v3977_v62 = vsel %vm461_vm4, %v3968_v14, 0.0 }
 0x5de   :  { %v3905_v50 = vadd.f32 %v3904_v20, %v3903_v55  ;;  %v3931_v57 = vpop.permute.xlu1 %3930 }
 0x5df   :  { %v3969_v40 = vmul.f32 %v3931_v57, %v3542_v46 }
 0x5e0   :  { %v3907_v21 = vadd.f32 %v3906_v26, %v3905_v50 }
 0x5e1   :  { %v3978_v13 = vsel %vm461_vm4, %v3969_v40, 0.0 }
 0x5e2   :  { %v6598_v52 = vsel %vm3553_vm6, %v3907_v21, -inf  ;;  %v3707_v16 = vpop.permute.xlu1 %3706  ;;  %v3979_v20 = vadd.f32 %v3978_v13, %v3977_v62 }
 0x5e3   :  { %v3909_v28 = vsel %vm3679_vm7, %v6598_v52, -inf  ;;  %v3741_v44 = vmul.f32 %v3707_v16, %v3543_v37 }
 0x5e4   :  { %3910 = vmax.xlane.f32.xlu1 %v3909_v28 }
 0x5e5   :  { %v3751_v59 = vsel %vm461_vm4, %v3741_v44, 0.0 }
 0x5e6   :  { %v3936_v36 = vpop.permute.xlu1 %3935  ;;  %v3752_v34 = vadd.f32 %v3751_v59, %v3750_v25 }
 0x5e7   :  { %v3970_v35 = vmul.f32 %v3936_v36, %v3543_v37 }
 0x5e9   :  { %v3980_v38 = vsel %vm461_vm4, %v3970_v35, 0.0 }
 0x5ea   :  { %v3712_v7 = vpop.permute.xlu1 %3711  ;;  %v3981_v57 = vadd.f32 %v3980_v38, %v3979_v20 }
 0x5eb   :  { %v3742_v8 = vmul.f32 %v3712_v7, %v3544_v22 }
 0x5ed   :  { %v3753_v18 = vsel %vm461_vm4, %v3742_v8, 0.0 }
 0x5ee   :  { %v3941_v47 = vpop.permute.xlu1 %3940  ;;  %v3754_v43 = vadd.f32 %v3753_v18, %v3752_v34 }
 0x5ef   :  { %v3971_v24 = vmul.f32 %v3941_v47, %v3544_v22 }
 0x5f1   :  { %v3982_v45 = vsel %vm461_vm4, %v3971_v24, 0.0 }
 0x5f2   :  { %v3946_v42 = vpop.permute.xlu1 %3945 }
 0x5f3   :  { %v3972_v10 = vmul.f32 %v3946_v42, %v3545_v2  ;;  %v3983_v42 = vadd.f32 %v3982_v45, %v3981_v57 }
 0x5f5   :  { %v3984_v36 = vsel %vm461_vm4, %v3972_v10, 0.0  ;;  %v3779_v10 = vld [vmem:[#allocation6] sm:$0x1] }
 0x5f6   :  { %v3722_v1 = vpop.permute.xlu1 %3721  ;;  %v3985_v37 = vadd.f32 %v3984_v36, %v3983_v42 }
 0x5f7   :  { %v3744_v4 = vmul.f32 %v3722_v1, %v3546_v56 }
 0x5f9   :  { %v3757_v27 = vsel %vm461_vm4, %v3744_v4, 0.0 }
 0x5fa   :  { %v3951_v53 = vpop.permute.xlu1 %3950 }
 0x5fb   :  { %v3973_v58 = vmul.f32 %v3951_v53, %v3546_v56  ;;  %v3771_v56 = vld [vmem:[%s6706_s16] sm:$0x1] }
 0x5fe   :  { %v3727_v17 = vpop.permute.xlu1 %3726 }
 0x5ff   :  { %v3745_v6 = vmul.f32 %v3727_v17, %v3547_v12 }
 0x601   :  { %v3759_v31 = vsel %vm461_vm4, %v3745_v6, 0.0 }
 0x602   :  { %v3956_v50 = vpop.permute.xlu1 %3955 }
 0x603   :  { %v3974_v7 = vmul.f32 %v3956_v50, %v3547_v12  ;;  %v3550_v12 = vld [vmem:[%s6707_s17] sm:$0x1] }
 0x605   :  { %v3988_v22 = vsel %vm461_vm4, %v3974_v7, 0.0 }
 0x63f   :  { %v3682_v39 = vpop.xlane.xlu0 %3681 }
 0x640   :  { %v6616_v30 = vsub.f32 %v6563_v9, %v3682_v39  ;;  %v3743_v9 = vmul.f32 %v3717_v61, %v3545_v2  ;;  %v3986_v61 = vsel %vm461_vm4, %v3973_v58, 0.0 }
 0x641   :  { %v3987_v44 = vadd.f32 %v3986_v61, %v3985_v37 }
 0x642   :  { %v3684_v23 = vmul.f32 1.442695, %v6616_v30  ;;  %v3755_v49 = vsel %vm461_vm4, %v3743_v9, 0.0 }
 0x643   :  { %v3756_v41 = vadd.f32 %v3755_v49, %v3754_v43  ;;  %v3989_v11 = vadd.f32 %v3988_v22, %v3987_v44 }
 0x644   :  { %5024 = vpow2.f32 %v3684_v23 }
 0x645   :  { %v3758_v3 = vadd.f32 %v3757_v27, %v3756_v41 }
 0x647   :  { %v3732_v15 = vpop.permute.xlu0 %3731  ;;  %v3760_v26 = vadd.f32 %v3759_v31, %v3758_v3 }
 0x648   :  { %v3746_v51 = vmul.f32 %v3732_v15, %v3548_v0 }
 0x64a   :  { %v3761_v55 = vsel %vm461_vm4, %v3746_v51, 0.0  ;;  %v4000_v51 = vld [vmem:[%s6706_s16] sm:$0x1] }
 0x64b   :  { %v3961_v19 = vpop.permute.xlu0 %3960  ;;  %v3762_v16 = vadd.f32 %v3761_v55, %v3760_v26 }
 0x64c   :  { %v3975_v48 = vmul.f32 %v3961_v19, %v3548_v0 }
 0x64e   :  { %v5025_v54 = vpop.eup %5024  ;;  %v3990_v39 = vsel %vm461_vm4, %v3975_v48, 0.0 }
 0x64f   :  { %v3737_v21 = vpop.permute.xlu0 %3736  ;;  %v3686_v28 = vsel %vm3679_vm7, %v5025_v54, 0.0  ;;  %v3991_v5 = vadd.f32 %v3990_v39, %v3989_v11 }
 0x650   :  { %v3747_v33 = vmul.f32 %v3737_v21, %v3549_v63  ;;  %3687 = vadd.xlane.f32.xlu0 %v3686_v28  ;;  %v4007_v21 = vld [vmem:[#allocation6] sm:$0x1] }
 0x652   :  { %v3763_v47 = vsel %vm461_vm4, %v3747_v33, 0.0 }
 0x653   :  { %v3764_v46 = vadd.f32 %v3763_v47, %v3762_v16  ;;  %v3966_v1 = vpop.permute.xlu0 %3965 }
 0x654   :  { %v3976_v29 = vmul.f32 %v3966_v1, %v3549_v63 }
 0x655   :  { %v3765_v60 = vrot.slane %v3764_v46, 4 }
 0x656   :  { %v3992_v2 = vsel %vm461_vm4, %v3976_v29, 0.0 }
 0x657   :  { %v3766_v53 = vadd.f32 %v3765_v60, %v3764_v46  ;;  %v3993_v25 = vadd.f32 %v3992_v2, %v3991_v5 }
 0x659   :  { %v3767_v8 = vrot.slane %v3766_v53, 2  ;;  %v3994_v9 = vrot.slane %v3993_v25, 4 }
 0x65b   :  { %v3768_v59 = vadd.f32 %v3767_v8, %v3766_v53  ;;  %v3995_v4 = vadd.f32 %v3994_v9, %v3993_v25 }
 0x65d   :  { %v3769_v23 = vrot.slane %v3768_v59, 1  ;;  %v3996_v15 = vrot.slane %v3995_v4, 2 }
 0x65f   :  { %v3770_v18 = vadd.f32 %v3769_v23, %v3768_v59  ;;  %v3997_v40 = vadd.f32 %v3996_v15, %v3995_v4 }
 0x661   :  { %v3772_v34 = vadd.f32 %v3771_v56, %v3770_v18  ;;  %v3998_v6 = vrot.slane %v3997_v40, 1 }
 0x663   :  { %v3773_v17 = vmax.f32 %v3772_v34, 0.0  ;;  %v3999_v27 = vadd.f32 %v3998_v6, %v3997_v40 }
 0x665   :  { %v3774_v43 = vmul.f32 %v3773_v17, %v3550_v12  ;;  %v4001_v41 = vadd.f32 %v4000_v51, %v3999_v27 }
 0x667   :  { %v3776_v0 = vsel %vm3775_vm8, %v3774_v43, 0.0  ;;  %v4002_v19 = vmax.f32 %v4001_v41, 0.0 }
 0x668   :  { %3777 = vadd.xlane.f32.xlu1 %v3776_v0 }
 0x669   :  { %v4003_v31 = vmul.f32 %v4002_v19, %v3550_v12 }
 0x66b   :  { %v4004_v3 = vsel %vm3775_vm8, %v4003_v31, 0.0 }
 0x671   :  { %v3911_v49 = vpop.xlane.xlu1 %3910 }
 0x672   :  { %v3912_v14 = vsub.f32 %v6598_v52, %v3911_v49 }
 0x674   :  { %v3913_v35 = vmul.f32 1.442695, %v3912_v14 }
 0x676   :  { %5026 = vpow2.f32 %v3913_v35 }
 0x680   :  { %v5027_v13 = vpop.eup %5026 }
 0x681   :  { %v3915_v24 = vsel %vm3679_vm7, %v5027_v13, 0.0 }
 0x682   :  { %3916 = vadd.xlane.f32.xlu1 %v3915_v24 }
 0x686   :  { %4005 = vadd.xlane.f32.xlu1 %v4004_v3 }
 0x6dd   :  { %v3688_v63 = vpop.xlane.xlu0 %3687 }
 0x6de   :  { %5028 = vlog2.f32 %v3688_v63 }
 0x6e8   :  { %v5029_v52 = vpop.eup %5028 }
 0x6e9   :  { %v3690_v54 = vmul.f32 0.6931472, %v5029_v52 }
 0x6eb   :  { %v3691_v62 = vsub.f32 %v6616_v30, %v3690_v54 }
 0x6ed   :  { %v3692_v38 = vsel %vm3553_vm6, %v3691_v62, 0.0 }
 0x6ee   :  { %3693 = vst [vmem:[#allocation7] sm:$0x1] %v3692_v38 }
 0x6f5   :  { %v3778_v55 = vpop.xlane.xlu1 %3777 }
 0x6f6   :  { %v3780_v20 = vadd.f32 %v3779_v10, %v3778_v55 }
 0x6f8   :  { %5030 = vtanh.f32 %v3780_v20 }
 0x702   :  { %v5031_v26 = vpop.eup %5030 }
 0x703   :  { %3783 = vst.msk [vmem:[%s6709_s20] sm:$0x1] %vm3782_vm9, %v5031_v26 }
 0x70f   :  { %v3917_v50 = vpop.xlane.xlu1 %3916 }
 0x710   :  { %5032 = vlog2.f32 %v3917_v50 }
 0x713   :  { %v4006_v28 = vpop.xlane.xlu1 %4005 }
 0x714   :  { %v4008_v30 = vadd.f32 %v4007_v21, %v4006_v28 }
 0x716   :  { %5034 = vtanh.f32 %v4008_v30 }
 0x71a   :  { %v5033_v45 = vpop.eup %5032 }
 0x71b   :  { %v3919_v58 = vmul.f32 0.6931472, %v5033_v45 }
 0x71d   :  { %v3920_v33 = vsub.f32 %v3912_v14, %v3919_v58 }
 0x71f   :  { %v3921_v57 = vsel %vm3553_vm6, %v3920_v33, 0.0 }
 0x720   :  { %v5035_v16 = vpop.eup %5034  ;;  %3922 = vst [vmem:[#allocation7 + $0x1] sm:$0x1] %v3921_v57 }
 0x721   :  { %4010 = vst.msk [vmem:[%s6709_s20 + $0x1] sm:$0x1] %vm3782_vm9, %v5035_v16 }
 0x722   :  { %5050 = shalt.err (!%p5047_p4)
}
 0x723   :  { %s5051_s1 = scalar_lea.hbm %s6708_s19, 32 }
 0x724   :  { %p5052_p5 = scmp.ne.s32.totalorder %s6708_s19, %s5051_s1  ;;  %p5055_p6 = scmp.lt.u32.totalorder %s5051_s1, %s6708_s19 }
 0x726   :  { %p5057_p7 = pnand %p5055_p6, %p5052_p5 }
 0x728   :  { %5060 = shalt.err (!%p5057_p7)
}
 0x729   :  { %4020 = dma.vmem_to_hbm [thread:$0]  %s4018_s30, 32, %s6708_s19, [#allocation8]  }
 0x72a   :  { %5061 = dma.done.wait [#allocation8], 32  }
 0x72b   :  { %5062 = vsyncadd [#allocation8], 4294967264 }
 0x72c   :  { %4028 = vsyncpa [#allocation8], 1 }

</bundles_post_ra>
